<compile_context>
chip_gen: v7x
topology: tpu7x:2x2x1
jax: 0.10.0
libtpu: 0.0.40
codegen_flags: <defaults>
</compile_context>

<pallas_src>
import functools
import math

import jax
import jax.numpy as jnp
from jax import lax
from jax.experimental import pallas as pl
from jax.experimental.pallas import tpu as pltpu

_NEG = float(-1e30)  # large finite "masked" score: avoids -inf - -inf = NaN


def _round_up(x, m):
    return -(-x // m) * m


# -----------------------------------------------------------------------------
# Kernel.  Grid = (batch, q_tile); q-tile axis is "arbitrary" so the per-batch
# QKV scratch (computed at qi == 0) persists across the q tiles of that batch.
# -----------------------------------------------------------------------------
def _fused_mha_kernel(x_ref, wqkv_ref, wout_ref, bout_ref, o_ref, qkv_ref, *,
                      num_heads, dh_pad, approx_reciprocal):
    T_pad, _ = x_ref.shape                 # full (padded) sequence for this batch
    tq, D = o_ref.shape                    # q-tile rows, model width (= H * d_out)
    Dp = num_heads * dh_pad                # lane-padded width per Q/K/V
    cdtype = qkv_ref.dtype                 # MXU input dtype (bf16 or f32)

    qi = pl.program_id(1)

    # ---- once per batch element: fused Q/K/V projection into VMEM scratch ----
    # Done in tq-row chunks so the f32 matmul temporary stays (tq, 3*Dp).
    @pl.when(qi == 0)
    def _():
        def proj_chunk(c, carry):
            r = pl.multiple_of(c * tq, tq)
            xc = x_ref[pl.ds(r, tq), :]
            qkv_ref[pl.ds(r, tq), :] = jnp.dot(
                xc, wqkv_ref[...], preferred_element_type=jnp.float32
            ).astype(cdtype)
            return carry
        lax.fori_loop(0, T_pad // tq, proj_chunk, 0)

    # ---- per q-tile flash attention ----
    q_start = pl.multiple_of(qi * tq, tq)
    q_all = qkv_ref[pl.ds(q_start, tq), 0:Dp]          # (tq, Dp); scale pre-folded

    # Causal mask for the single diagonal KV tile, from small broadcast iotas.
    row_l = lax.broadcasted_iota(jnp.int32, (tq, 1), 0)
    col_l = lax.broadcasted_iota(jnp.int32, (1, tq), 1)
    diag_mask = col_l > row_l                           # (tq, tq) bool

    # Output accumulator initialized with the bias (hoisted broadcast).
    y_acc = jnp.broadcast_to(bout_ref[...].astype(jnp.float32), (tq, D))

    for h in range(num_heads):                          # static unroll (small H)
        lo = h * dh_pad
        qh = q_all[:, lo:lo + dh_pad]                   # lane-aligned register view

        def kv_step(kt, carry, masked):
            m, l, acc = carry
            ks = pl.multiple_of(kt * tq, tq)
            k_t = qkv_ref[pl.ds(ks, tq), Dp + lo:Dp + lo + dh_pad]
            v_t = qkv_ref[pl.ds(ks, tq), 2 * Dp + lo:2 * Dp + lo + dh_pad]
            s = lax.dot_general(qh, k_t, (((1,), (1,)), ((), ())),
                                preferred_element_type=jnp.float32)  # (tq, tq)
            if masked:
                s = jnp.where(diag_mask, _NEG, s)
            m_new = jnp.maximum(m, jnp.max(s, axis=-1, keepdims=True))
            alpha = jnp.exp(m - m_new)
            p = jnp.exp(s - m_new)
            l_new = alpha * l + jnp.sum(p, axis=-1, keepdims=True)
            acc_new = alpha * acc + jnp.dot(p.astype(cdtype), v_t,
                                            preferred_element_type=jnp.float32)
            return m_new, l_new, acc_new

        init = (jnp.full((tq, 1), _NEG, jnp.float32),
                jnp.zeros((tq, 1), jnp.float32),
                jnp.zeros((tq, dh_pad), jnp.float32))

        # Off-diagonal KV tiles (all fully visible -> no mask-select pass);
        # tiles above the diagonal are skipped entirely (causal).
        m, l, acc = lax.fori_loop(0, qi,
                                  lambda kt, c: kv_step(kt, c, False), init)
        # Diagonal KV tile (kt == qi) — the only tile needing the mask.
        m, l, acc = kv_step(qi, (m, l, acc), True)

        # Normalize AFTER the AV matmul: a (tq, dh_pad) multiply, not (tq, T).
        if approx_reciprocal:
            inv_l = pl.reciprocal(l, approx=True)
        else:
            inv_l = 1.0 / l
        ctx_h = (acc * inv_l).astype(cdtype)            # (tq, dh_pad)

        # Fused output projection (no concat): accumulate ctx_h @ W_out[rows_h].
        y_acc = y_acc + jnp.dot(ctx_h, wout_ref[lo:lo + dh_pad, :],
                                preferred_element_type=jnp.float32)

    o_ref[...] = y_acc.astype(o_ref.dtype)              # lane-dense (tq, D) store


# -----------------------------------------------------------------------------
# Wrapper.
# -----------------------------------------------------------------------------
def mha_wrapper_forward(x, wq, wk, wv, w_out, b_out, *,
                        compute_dtype=jnp.bfloat16,
                        q_tile=256,              # 256 for v6e/v7x, use 128 on v5e
                        pad_head_lanes=True,
                        approx_reciprocal=True):
    """Forward pass of Ch03_MHA_Wrapper (dropout = identity).

    x       : (B, T, d_in) float32
    wq/wk/wv: (H, d_in, d_out)   per-head linear weights (x @ W layout)
    w_out   : (D, D), D = H*d_out, laid out so y = ctx @ w_out + b_out
    b_out   : (D,)
    compute_dtype : MXU input dtype (bf16 recommended on all generations);
                    accumulation and softmax stay in float32.
    """
    B, T, d_in = x.shape
    H, _, dh = wq.shape
    D = H * dh

    dh_pad = _round_up(dh, 128) if pad_head_lanes else dh
    Dp = H * dh_pad

    # q/kv tile size; pad T so every tile is full (padded keys are never visible
    # to real queries because of causality; padded query rows are sliced off).
    tq = min(q_tile, _round_up(T, 16))
    T_pad = _round_up(T, tq)
    n_q = T_pad // tq

    # ---- host-side parameter prep: pad head lanes, fold scale, cast once ----
    def _pad_heads(w):  # (H, d_in, dh) -> (d_in, H * dh_pad)
        w_p = jnp.zeros((H, d_in, dh_pad), jnp.float32).at[:, :, :dh].set(w)
        return jnp.transpose(w_p, (1, 0, 2)).reshape(d_in, Dp)

    scale = 1.0 / math.sqrt(dh)
    w_qkv = jnp.concatenate(
        [_pad_heads(wq) * scale, _pad_heads(wk), _pad_heads(wv)],
        axis=-1).astype(compute_dtype)                               # (d_in, 3*Dp)

    w_out_p = (jnp.zeros((H, dh_pad, D), jnp.float32)
               .at[:, :dh, :].set(w_out.reshape(H, dh, D))
               .reshape(Dp, D).astype(compute_dtype))                # (Dp, D)
    b2 = b_out.reshape(1, D).astype(jnp.float32)

    x_c = x
    if T_pad != T:
        x_c = jnp.pad(x_c, ((0, 0), (0, T_pad - T), (0, 0)))
    x_c = x_c.astype(compute_dtype)

    kernel = functools.partial(_fused_mha_kernel, num_heads=H, dh_pad=dh_pad,
                               approx_reciprocal=approx_reciprocal)

    # Advisory cost estimate (causal ~half of the score/AV work).
    kv_sum2 = T_pad * (T_pad + tq)        # ~ 2 * sum over query rows of kv_len
    cost = pl.CostEstimate(
        flops=int(2 * B * T_pad * d_in * 3 * Dp
                  + 2 * B * H * dh_pad * kv_sum2
                  + 2 * B * T_pad * Dp * D),
        transcendentals=int(B * H * kv_sum2 // 2),
        bytes_accessed=int(x_c.size * x_c.dtype.itemsize
                           + w_qkv.size * w_qkv.dtype.itemsize
                           + w_out_p.size * w_out_p.dtype.itemsize
                           + b2.size * 4
                           + B * T_pad * D * 4),
    )

    def _const_spec(shape, single_buffer):
        idx = lambda b, q: (0, 0)
        if single_buffer:
            # Constant index map -> double buffering is pure VMEM waste.
            return pl.BlockSpec(shape, idx, pipeline_mode=pl.Buffered(1))
        return pl.BlockSpec(shape, idx)

    def _build(single_buffer):
        grid_spec = pltpu.PrefetchScalarGridSpec(
            num_scalar_prefetch=0,
            grid=(B, n_q),
            in_specs=[
                pl.BlockSpec((None, T_pad, d_in), lambda b, q: (b, 0, 0)),
                _const_spec((d_in, 3 * Dp), single_buffer),
                _const_spec((Dp, D), single_buffer),
                _const_spec((1, D), single_buffer),
            ],
            out_specs=pl.BlockSpec((None, tq, D), lambda b, q: (b, q, 0)),
            scratch_shapes=[pltpu.VMEM((T_pad, 3 * Dp), compute_dtype)],
        )
        return pl.pallas_call(
            kernel,
            out_shape=jax.ShapeDtypeStruct((B, T_pad, D), x.dtype),
            grid_spec=grid_spec,
            compiler_params=pltpu.CompilerParams(
                dimension_semantics=("parallel", "arbitrary"),
                vmem_limit_bytes=64 * 1024 * 1024,
            ),
            cost_estimate=cost,
        )

    try:
        out = _build(True)(x_c, w_qkv, w_out_p, b2)
    except Exception:
        # Fallback if this JAX build rejects pipeline_mode=pl.Buffered(1).
        out = _build(False)(x_c, w_qkv, w_out_p, b2)

    if T_pad != T:
        out = out[:, :T, :]
    return out


# -----------------------------------------------------------------------------
# Plain-JAX reference matching the PyTorch semantics (dropout = 0).
# -----------------------------------------------------------------------------
def _reference_forward(x, wq, wk, wv, w_out, b_out):
    B, T, d_in = x.shape
    H, _, d_out = wq.shape
    q = jnp.einsum("btd,hde->bhte", x, wq)
    k = jnp.einsum("btd,hde->bhte", x, wk)
    v = jnp.einsum("btd,hde->bhte", x, wv)
    scores = jnp.einsum("bhqe,bhke->bhqk", q, k)
    mask = jnp.triu(jnp.ones((T, T), dtype=bool), k=1)
    scores = jnp.where(mask, -jnp.inf, scores)
    w = jax.nn.softmax(scores / math.sqrt(d_out), axis=-1)
    ctx = jnp.einsum("bhqk,bhke->bhqe", w, v)
    ctx = jnp.transpose(ctx, (0, 2, 1, 3)).reshape(B, T, H * d_out)
    return ctx @ w_out + b_out


if __name__ == "__main__":
    # Small shapes consistent with the module.
    B, T = 2, 8
    d_in, d_out, num_heads = 32, 16, 4
    D = d_out * num_heads

    key = jax.random.PRNGKey(0)
    kx, kq, kk, kv, kw, kb = jax.random.split(key, 6)

    x = jax.random.normal(kx, (B, T, d_in), dtype=jnp.float32)

    lim_in = 1.0 / math.sqrt(d_in)
    wq = jax.random.uniform(kq, (num_heads, d_in, d_out), jnp.float32, -lim_in, lim_in)
    wk = jax.random.uniform(kk, (num_heads, d_in, d_out), jnp.float32, -lim_in, lim_in)
    wv = jax.random.uniform(kv, (num_heads, d_in, d_out), jnp.float32, -lim_in, lim_in)

    lim_o = 1.0 / math.sqrt(D)
    # Stored in (in, out) layout so the kernel computes ctx @ w_out + b_out.
    w_out = jax.random.uniform(kw, (D, D), jnp.float32, -lim_o, lim_o)
    b_out = jax.random.uniform(kb, (D,), jnp.float32, -lim_o, lim_o)

    ref = _reference_forward(x, wq, wk, wv, w_out, b_out)

    # f32 MXU path, exact reciprocal.
    out_f32 = jax.block_until_ready(
        mha_wrapper_forward(x, wq, wk, wv, w_out, b_out,
                            compute_dtype=jnp.float32,
                            approx_reciprocal=False))
    assert out_f32.shape == (B, T, D), out_f32.shape
    assert jnp.allclose(out_f32, ref, atol=2e-2, rtol=2e-2), "f32 mismatch vs reference"

    # bf16 MXU inputs (recommended), f32 accumulation + softmax, approx recip.
    out_bf16 = jax.block_until_ready(
        mha_wrapper_forward(x, wq, wk, wv, w_out, b_out,
                            compute_dtype=jnp.bfloat16))
    assert out_bf16.shape == (B, T, D), out_bf16.shape
    assert jnp.allclose(out_bf16, ref, atol=1e-1, rtol=1e-1), "bf16 mismatch vs reference"

    print("KERNEL_OK")
</pallas_src>

<mosaic_0001>
module attributes {stable_mosaic.version = 11 : i64} {
  func.func @_fused_mha_kernel(%arg0: i32, %arg1: i32, %arg2: memref<1x16x32xf32, #tpu.memory_space<vmem>>, %arg3: memref<32x1536xf32, #tpu.memory_space<vmem>>, %arg4: memref<512x64xf32, #tpu.memory_space<vmem>>, %arg5: memref<1x64xf32, #tpu.memory_space<vmem>>, %arg6: memref<1x16x64xf32, #tpu.memory_space<vmem>>, %arg7: memref<16x1536xf32, #tpu.memory_space<vmem>>) attributes {dimension_semantics = [#tpu.dimension_semantics<parallel>, #tpu.dimension_semantics<arbitrary>], iteration_bounds = array<i64: 2, 1>, scalar_prefetch = 0 : i64, scratch_operands = 1 : i64, tpu.core_type = #tpu.core_type<tc>, window_params = [{transform_indices = @transform_0, window_bounds = array<i64: 1, 16, 32>}, {pipeline_mode = #tpu.pipeline_mode<synchronous>, transform_indices = @transform_1, window_bounds = array<i64: 32, 1536>}, {pipeline_mode = #tpu.pipeline_mode<synchronous>, transform_indices = @transform_2, window_bounds = array<i64: 512, 64>}, {pipeline_mode = #tpu.pipeline_mode<synchronous>, transform_indices = @transform_3, window_bounds = array<i64: 1, 64>}, {transform_indices = @transform_4, window_bounds = array<i64: 1, 16, 64>}]} {
    %c0_i32 = arith.constant 0 : i32
    %0 = arith.cmpi eq, %arg1, %c0_i32 : i32
    %1 = arith.extui %0 : i1 to i32
    %c0_i32_0 = arith.constant 0 : i32
    %2 = arith.cmpi ne, %1, %c0_i32_0 : i32
    scf.if %2 {
      %c0_i32_61 = arith.constant 0 : i32
      %c16_i32_62 = arith.constant 16 : i32
      %174 = arith.muli %c0_i32_61, %c16_i32_62 : i32
      %175 = tpu.assume_multiple %174, 16 : i32
      %c0_63 = arith.constant 0 : index
      %176 = arith.index_cast %175 : i32 to index
      %c0_64 = arith.constant 0 : index
      %177 = vector.load %arg2[%c0_63, %176, %c0_64] : memref<1x16x32xf32, #tpu.memory_space<vmem>>, vector<1x16x32xf32>
      %178 = vector.shape_cast %177 : vector<1x16x32xf32> to vector<16x32xf32>
      %c0_65 = arith.constant 0 : index
      %c0_66 = arith.constant 0 : index
      %179 = vector.load %arg3[%c0_65, %c0_66] : memref<32x1536xf32, #tpu.memory_space<vmem>>, vector<32x1536xf32>
      %cst_67 = arith.constant dense<0.000000e+00> : vector<16x1536xf32>
      %180 = tpu.matmul %178, %179, %cst_67 {dimension_numbers = #tpu.dot_dimension_numbers<[1], [0], [0], [1], [0, 0, 1, 1], [], []>} : vector<16x32xf32>, vector<32x1536xf32>, vector<16x1536xf32> -> vector<16x1536xf32>
      %181 = arith.index_cast %175 : i32 to index
      %c0_68 = arith.constant 0 : index
      %182 = vector.load %arg7[%181, %c0_68] : memref<16x1536xf32, #tpu.memory_space<vmem>>, vector<16x1536xf32>
      tpu.vector_store %arg7[%181, %c0_68], %180 {strides = array<i32>} : memref<16x1536xf32, #tpu.memory_space<vmem>>, vector<16x1536xf32>,
      %c1_i32_69 = arith.constant 1 : i32
    } else {
    }
    %c16_i32 = arith.constant 16 : i32
    %3 = arith.muli %arg1, %c16_i32 : i32
    %4 = tpu.assume_multiple %3, 16 : i32
    %5 = arith.index_cast %4 : i32 to index
    %c0 = arith.constant 0 : index
    %6 = vector.load %arg7[%5, %c0] : memref<16x1536xf32, #tpu.memory_space<vmem>>, vector<16x512xf32>
    %7 = tpu.iota {dimensions = array<i32: 0>} : vector<16x1xi32>
    %8 = tpu.iota {dimensions = array<i32: 1>} : vector<1x16xi32>
    %9 = vector.broadcast %8 : vector<1x16xi32> to vector<16x16xi32>
    %10 = vector.broadcast %7 : vector<16x1xi32> to vector<16x16xi32>
    %11 = arith.cmpi sgt, %9, %10 : vector<16x16xi32>
    %c0_1 = arith.constant 0 : index
    %c0_2 = arith.constant 0 : index
    %12 = vector.load %arg5[%c0_1, %c0_2] : memref<1x64xf32, #tpu.memory_space<vmem>>, vector<1x64xf32>
    %13 = vector.shape_cast %12 : vector<1x64xf32> to vector<1x64xf32>
    %14 = vector.broadcast %13 : vector<1x64xf32> to vector<16x64xf32>
    %15 = vector.extract_strided_slice %6 {offsets = [0, 0], sizes = [16, 128], strides = [1, 1]} : vector<16x512xf32> to vector<16x128xf32>
    %cst = arith.constant -1.000000e+30 : f32
    %16 = vector.broadcast %cst : f32 to vector<16x1xf32>
    %cst_3 = arith.constant 0.000000e+00 : f32
    %17 = vector.broadcast %cst_3 : f32 to vector<16x1xf32>
    %cst_4 = arith.constant 0.000000e+00 : f32
    %18 = vector.broadcast %cst_4 : f32 to vector<16x128xf32>
    %c0_i32_5 = arith.constant 0 : i32
    %19 = arith.subi %arg1, %c0_i32_5 : i32
    %20 = arith.addi %c0_i32_5, %19 : i32
    %c1_i32 = arith.constant 1 : i32
    %21:3 = scf.for %arg8 = %c0_i32_5 to %20 step %c1_i32 iter_args(%arg9 = %16, %arg10 = %17, %arg11 = %18) -> (vector<16x1xf32>, vector<16x1xf32>, vector<16x128xf32>)  : i32 {
      %c16_i32_61 = arith.constant 16 : i32
      %174 = arith.muli %arg8, %c16_i32_61 : i32
      %175 = tpu.assume_multiple %174, 16 : i32
      %176 = arith.index_cast %175 : i32 to index
      %c512_62 = arith.constant 512 : index
      %177 = vector.load %arg7[%176, %c512_62] : memref<16x1536xf32, #tpu.memory_space<vmem>>, vector<16x128xf32>
      %178 = arith.index_cast %175 : i32 to index
      %c1024_63 = arith.constant 1024 : index
      %179 = vector.load %arg7[%178, %c1024_63] : memref<16x1536xf32, #tpu.memory_space<vmem>>, vector<16x128xf32>
      %cst_64 = arith.constant dense<0.000000e+00> : vector<16x16xf32>
      %180 = tpu.matmul %15, %177, %cst_64 {dimension_numbers = #tpu.dot_dimension_numbers<[1], [1], [0], [0], [0, 0, 1, 0], [], []>} : vector<16x128xf32>, vector<16x128xf32>, vector<16x16xf32> -> vector<16x16xf32>
      %cst_65 = arith.constant dense<0xFF800000> : vector<16xf32>
      %181 = vector.multi_reduction <maximumf>, %180, %cst_65 [1] : vector<16x16xf32> to vector<16xf32>
      %182 = vector.shape_cast %181 : vector<16xf32> to vector<16x1xf32>
      %183 = arith.maximumf %arg9, %182 : vector<16x1xf32>
      %184 = arith.subf %arg9, %183 : vector<16x1xf32>
      %185 = math.exp %184 : vector<16x1xf32>
      %186 = vector.broadcast %183 : vector<16x1xf32> to vector<16x16xf32>
      %187 = arith.subf %180, %186 : vector<16x16xf32>
      %188 = math.exp %187 : vector<16x16xf32>
      %189 = arith.mulf %185, %arg10 : vector<16x1xf32>
      %cst_66 = arith.constant dense<0.000000e+00> : vector<16xf32>
      %190 = vector.multi_reduction <add>, %188, %cst_66 [1] : vector<16x16xf32> to vector<16xf32>
      %191 = vector.shape_cast %190 : vector<16xf32> to vector<16x1xf32>
      %192 = arith.addf %189, %191 : vector<16x1xf32>
      %193 = vector.broadcast %185 : vector<16x1xf32> to vector<16x128xf32>
      %194 = arith.mulf %193, %arg11 : vector<16x128xf32>
      %cst_67 = arith.constant dense<0.000000e+00> : vector<16x128xf32>
      %195 = tpu.matmul %188, %179, %cst_67 {dimension_numbers = #tpu.dot_dimension_numbers<[1], [0], [0], [1], [0, 0, 1, 1], [], []>} : vector<16x16xf32>, vector<16x128xf32>, vector<16x128xf32> -> vector<16x128xf32>
      %196 = arith.addf %194, %195 : vector<16x128xf32>
      scf.yield %183, %192, %196 : vector<16x1xf32>, vector<16x1xf32>, vector<16x128xf32>
    }
    %c16_i32_6 = arith.constant 16 : i32
    %22 = arith.muli %arg1, %c16_i32_6 : i32
    %23 = tpu.assume_multiple %22, 16 : i32
    %24 = arith.index_cast %23 : i32 to index
    %c512 = arith.constant 512 : index
    %25 = vector.load %arg7[%24, %c512] : memref<16x1536xf32, #tpu.memory_space<vmem>>, vector<16x128xf32>
    %26 = arith.index_cast %23 : i32 to index
    %c1024 = arith.constant 1024 : index
    %27 = vector.load %arg7[%26, %c1024] : memref<16x1536xf32, #tpu.memory_space<vmem>>, vector<16x128xf32>
    %cst_7 = arith.constant dense<0.000000e+00> : vector<16x16xf32>
    %28 = tpu.matmul %15, %25, %cst_7 {dimension_numbers = #tpu.dot_dimension_numbers<[1], [1], [0], [0], [0, 0, 1, 0], [], []>} : vector<16x128xf32>, vector<16x128xf32>, vector<16x16xf32> -> vector<16x16xf32>
    %cst_8 = arith.constant -1.000000e+30 : f32
    %29 = vector.broadcast %cst_8 : f32 to vector<16x16xf32>
    %30 = arith.select %11, %29, %28 : vector<16x16xi1>, vector<16x16xf32>
    %cst_9 = arith.constant dense<0xFF800000> : vector<16xf32>
    %31 = vector.multi_reduction <maximumf>, %30, %cst_9 [1] : vector<16x16xf32> to vector<16xf32>
    %32 = vector.shape_cast %31 : vector<16xf32> to vector<16x1xf32>
    %33 = arith.maximumf %21#0, %32 : vector<16x1xf32>
    %34 = arith.subf %21#0, %33 : vector<16x1xf32>
    %35 = math.exp %34 : vector<16x1xf32>
    %36 = vector.broadcast %33 : vector<16x1xf32> to vector<16x16xf32>
    %37 = arith.subf %30, %36 : vector<16x16xf32>
    %38 = math.exp %37 : vector<16x16xf32>
    %39 = arith.mulf %35, %21#1 : vector<16x1xf32>
    %cst_10 = arith.constant dense<0.000000e+00> : vector<16xf32>
    %40 = vector.multi_reduction <add>, %38, %cst_10 [1] : vector<16x16xf32> to vector<16xf32>
    %41 = vector.shape_cast %40 : vector<16xf32> to vector<16x1xf32>
    %42 = arith.addf %39, %41 : vector<16x1xf32>
    %43 = vector.broadcast %35 : vector<16x1xf32> to vector<16x128xf32>
    %44 = arith.mulf %43, %21#2 : vector<16x128xf32>
    %cst_11 = arith.constant dense<0.000000e+00> : vector<16x128xf32>
    %45 = tpu.matmul %38, %27, %cst_11 {dimension_numbers = #tpu.dot_dimension_numbers<[1], [0], [0], [1], [0, 0, 1, 1], [], []>} : vector<16x16xf32>, vector<16x128xf32>, vector<16x128xf32> -> vector<16x128xf32>
    %46 = arith.addf %44, %45 : vector<16x128xf32>
    %cst_12 = arith.constant 1.000000e+00 : f32
    %47 = vector.broadcast %cst_12 : f32 to vector<16x1xf32>
    %48 = arith.divf %47, %42 : vector<16x1xf32>
    %49 = vector.broadcast %48 : vector<16x1xf32> to vector<16x128xf32>
    %50 = arith.mulf %46, %49 : vector<16x128xf32>
    %c0_13 = arith.constant 0 : index
    %c0_14 = arith.constant 0 : index
    %51 = vector.load %arg4[%c0_13, %c0_14] : memref<512x64xf32, #tpu.memory_space<vmem>>, vector<128x64xf32>
    %cst_15 = arith.constant dense<0.000000e+00> : vector<16x64xf32>
    %52 = tpu.matmul %50, %51, %cst_15 {dimension_numbers = #tpu.dot_dimension_numbers<[1], [0], [0], [1], [0, 0, 1, 1], [], []>} : vector<16x128xf32>, vector<128x64xf32>, vector<16x64xf32> -> vector<16x64xf32>
    %53 = arith.addf %14, %52 : vector<16x64xf32>
    %54 = vector.extract_strided_slice %6 {offsets = [0, 128], sizes = [16, 128], strides = [1, 1]} : vector<16x512xf32> to vector<16x128xf32>
    %cst_16 = arith.constant -1.000000e+30 : f32
    %55 = vector.broadcast %cst_16 : f32 to vector<16x1xf32>
    %cst_17 = arith.constant 0.000000e+00 : f32
    %56 = vector.broadcast %cst_17 : f32 to vector<16x1xf32>
    %cst_18 = arith.constant 0.000000e+00 : f32
    %57 = vector.broadcast %cst_18 : f32 to vector<16x128xf32>
    %c0_i32_19 = arith.constant 0 : i32
    %58 = arith.subi %arg1, %c0_i32_19 : i32
    %59 = arith.addi %c0_i32_19, %58 : i32
    %c1_i32_20 = arith.constant 1 : i32
    %60:3 = scf.for %arg8 = %c0_i32_19 to %59 step %c1_i32_20 iter_args(%arg9 = %55, %arg10 = %56, %arg11 = %57) -> (vector<16x1xf32>, vector<16x1xf32>, vector<16x128xf32>)  : i32 {
      %c16_i32_61 = arith.constant 16 : i32
      %174 = arith.muli %arg8, %c16_i32_61 : i32
      %175 = tpu.assume_multiple %174, 16 : i32
      %176 = arith.index_cast %175 : i32 to index
      %c640_62 = arith.constant 640 : index
      %177 = vector.load %arg7[%176, %c640_62] : memref<16x1536xf32, #tpu.memory_space<vmem>>, vector<16x128xf32>
      %178 = arith.index_cast %175 : i32 to index
      %c1152_63 = arith.constant 1152 : index
      %179 = vector.load %arg7[%178, %c1152_63] : memref<16x1536xf32, #tpu.memory_space<vmem>>, vector<16x128xf32>
      %cst_64 = arith.constant dense<0.000000e+00> : vector<16x16xf32>
      %180 = tpu.matmul %54, %177, %cst_64 {dimension_numbers = #tpu.dot_dimension_numbers<[1], [1], [0], [0], [0, 0, 1, 0], [], []>} : vector<16x128xf32>, vector<16x128xf32>, vector<16x16xf32> -> vector<16x16xf32>
      %cst_65 = arith.constant dense<0xFF800000> : vector<16xf32>
      %181 = vector.multi_reduction <maximumf>, %180, %cst_65 [1] : vector<16x16xf32> to vector<16xf32>
      %182 = vector.shape_cast %181 : vector<16xf32> to vector<16x1xf32>
      %183 = arith.maximumf %arg9, %182 : vector<16x1xf32>
      %184 = arith.subf %arg9, %183 : vector<16x1xf32>
      %185 = math.exp %184 : vector<16x1xf32>
      %186 = vector.broadcast %183 : vector<16x1xf32> to vector<16x16xf32>
      %187 = arith.subf %180, %186 : vector<16x16xf32>
      %188 = math.exp %187 : vector<16x16xf32>
      %189 = arith.mulf %185, %arg10 : vector<16x1xf32>
      %cst_66 = arith.constant dense<0.000000e+00> : vector<16xf32>
      %190 = vector.multi_reduction <add>, %188, %cst_66 [1] : vector<16x16xf32> to vector<16xf32>
      %191 = vector.shape_cast %190 : vector<16xf32> to vector<16x1xf32>
      %192 = arith.addf %189, %191 : vector<16x1xf32>
      %193 = vector.broadcast %185 : vector<16x1xf32> to vector<16x128xf32>
      %194 = arith.mulf %193, %arg11 : vector<16x128xf32>
      %cst_67 = arith.constant dense<0.000000e+00> : vector<16x128xf32>
      %195 = tpu.matmul %188, %179, %cst_67 {dimension_numbers = #tpu.dot_dimension_numbers<[1], [0], [0], [1], [0, 0, 1, 1], [], []>} : vector<16x16xf32>, vector<16x128xf32>, vector<16x128xf32> -> vector<16x128xf32>
      %196 = arith.addf %194, %195 : vector<16x128xf32>
      scf.yield %183, %192, %196 : vector<16x1xf32>, vector<16x1xf32>, vector<16x128xf32>
    }
    %c16_i32_21 = arith.constant 16 : i32
    %61 = arith.muli %arg1, %c16_i32_21 : i32
    %62 = tpu.assume_multiple %61, 16 : i32
    %63 = arith.index_cast %62 : i32 to index
    %c640 = arith.constant 640 : index
    %64 = vector.load %arg7[%63, %c640] : memref<16x1536xf32, #tpu.memory_space<vmem>>, vector<16x128xf32>
    %65 = arith.index_cast %62 : i32 to index
    %c1152 = arith.constant 1152 : index
    %66 = vector.load %arg7[%65, %c1152] : memref<16x1536xf32, #tpu.memory_space<vmem>>, vector<16x128xf32>
    %cst_22 = arith.constant dense<0.000000e+00> : vector<16x16xf32>
    %67 = tpu.matmul %54, %64, %cst_22 {dimension_numbers = #tpu.dot_dimension_numbers<[1], [1], [0], [0], [0, 0, 1, 0], [], []>} : vector<16x128xf32>, vector<16x128xf32>, vector<16x16xf32> -> vector<16x16xf32>
    %cst_23 = arith.constant -1.000000e+30 : f32
    %68 = vector.broadcast %cst_23 : f32 to vector<16x16xf32>
    %69 = arith.select %11, %68, %67 : vector<16x16xi1>, vector<16x16xf32>
    %cst_24 = arith.constant dense<0xFF800000> : vector<16xf32>
    %70 = vector.multi_reduction <maximumf>, %69, %cst_24 [1] : vector<16x16xf32> to vector<16xf32>
    %71 = vector.shape_cast %70 : vector<16xf32> to vector<16x1xf32>
    %72 = arith.maximumf %60#0, %71 : vector<16x1xf32>
    %73 = arith.subf %60#0, %72 : vector<16x1xf32>
    %74 = math.exp %73 : vector<16x1xf32>
    %75 = vector.broadcast %72 : vector<16x1xf32> to vector<16x16xf32>
    %76 = arith.subf %69, %75 : vector<16x16xf32>
    %77 = math.exp %76 : vector<16x16xf32>
    %78 = arith.mulf %74, %60#1 : vector<16x1xf32>
    %cst_25 = arith.constant dense<0.000000e+00> : vector<16xf32>
    %79 = vector.multi_reduction <add>, %77, %cst_25 [1] : vector<16x16xf32> to vector<16xf32>
    %80 = vector.shape_cast %79 : vector<16xf32> to vector<16x1xf32>
    %81 = arith.addf %78, %80 : vector<16x1xf32>
    %82 = vector.broadcast %74 : vector<16x1xf32> to vector<16x128xf32>
    %83 = arith.mulf %82, %60#2 : vector<16x128xf32>
    %cst_26 = arith.constant dense<0.000000e+00> : vector<16x128xf32>
    %84 = tpu.matmul %77, %66, %cst_26 {dimension_numbers = #tpu.dot_dimension_numbers<[1], [0], [0], [1], [0, 0, 1, 1], [], []>} : vector<16x16xf32>, vector<16x128xf32>, vector<16x128xf32> -> vector<16x128xf32>
    %85 = arith.addf %83, %84 : vector<16x128xf32>
    %cst_27 = arith.constant 1.000000e+00 : f32
    %86 = vector.broadcast %cst_27 : f32 to vector<16x1xf32>
    %87 = arith.divf %86, %81 : vector<16x1xf32>
    %88 = vector.broadcast %87 : vector<16x1xf32> to vector<16x128xf32>
    %89 = arith.mulf %85, %88 : vector<16x128xf32>
    %c128 = arith.constant 128 : index
    %c0_28 = arith.constant 0 : index
    %90 = vector.load %arg4[%c128, %c0_28] : memref<512x64xf32, #tpu.memory_space<vmem>>, vector<128x64xf32>
    %cst_29 = arith.constant dense<0.000000e+00> : vector<16x64xf32>
    %91 = tpu.matmul %89, %90, %cst_29 {dimension_numbers = #tpu.dot_dimension_numbers<[1], [0], [0], [1], [0, 0, 1, 1], [], []>} : vector<16x128xf32>, vector<128x64xf32>, vector<16x64xf32> -> vector<16x64xf32>
    %92 = arith.addf %53, %91 : vector<16x64xf32>
    %93 = vector.extract_strided_slice %6 {offsets = [0, 256], sizes = [16, 128], strides = [1, 1]} : vector<16x512xf32> to vector<16x128xf32>
    %cst_30 = arith.constant -1.000000e+30 : f32
    %94 = vector.broadcast %cst_30 : f32 to vector<16x1xf32>
    %cst_31 = arith.constant 0.000000e+00 : f32
    %95 = vector.broadcast %cst_31 : f32 to vector<16x1xf32>
    %cst_32 = arith.constant 0.000000e+00 : f32
    %96 = vector.broadcast %cst_32 : f32 to vector<16x128xf32>
    %c0_i32_33 = arith.constant 0 : i32
    %97 = arith.subi %arg1, %c0_i32_33 : i32
    %98 = arith.addi %c0_i32_33, %97 : i32
    %c1_i32_34 = arith.constant 1 : i32
    %99:3 = scf.for %arg8 = %c0_i32_33 to %98 step %c1_i32_34 iter_args(%arg9 = %94, %arg10 = %95, %arg11 = %96) -> (vector<16x1xf32>, vector<16x1xf32>, vector<16x128xf32>)  : i32 {
      %c16_i32_61 = arith.constant 16 : i32
      %174 = arith.muli %arg8, %c16_i32_61 : i32
      %175 = tpu.assume_multiple %174, 16 : i32
      %176 = arith.index_cast %175 : i32 to index
      %c768_62 = arith.constant 768 : index
      %177 = vector.load %arg7[%176, %c768_62] : memref<16x1536xf32, #tpu.memory_space<vmem>>, vector<16x128xf32>
      %178 = arith.index_cast %175 : i32 to index
      %c1280_63 = arith.constant 1280 : index
      %179 = vector.load %arg7[%178, %c1280_63] : memref<16x1536xf32, #tpu.memory_space<vmem>>, vector<16x128xf32>
      %cst_64 = arith.constant dense<0.000000e+00> : vector<16x16xf32>
      %180 = tpu.matmul %93, %177, %cst_64 {dimension_numbers = #tpu.dot_dimension_numbers<[1], [1], [0], [0], [0, 0, 1, 0], [], []>} : vector<16x128xf32>, vector<16x128xf32>, vector<16x16xf32> -> vector<16x16xf32>
      %cst_65 = arith.constant dense<0xFF800000> : vector<16xf32>
      %181 = vector.multi_reduction <maximumf>, %180, %cst_65 [1] : vector<16x16xf32> to vector<16xf32>
      %182 = vector.shape_cast %181 : vector<16xf32> to vector<16x1xf32>
      %183 = arith.maximumf %arg9, %182 : vector<16x1xf32>
      %184 = arith.subf %arg9, %183 : vector<16x1xf32>
      %185 = math.exp %184 : vector<16x1xf32>
      %186 = vector.broadcast %183 : vector<16x1xf32> to vector<16x16xf32>
      %187 = arith.subf %180, %186 : vector<16x16xf32>
      %188 = math.exp %187 : vector<16x16xf32>
      %189 = arith.mulf %185, %arg10 : vector<16x1xf32>
      %cst_66 = arith.constant dense<0.000000e+00> : vector<16xf32>
      %190 = vector.multi_reduction <add>, %188, %cst_66 [1] : vector<16x16xf32> to vector<16xf32>
      %191 = vector.shape_cast %190 : vector<16xf32> to vector<16x1xf32>
      %192 = arith.addf %189, %191 : vector<16x1xf32>
      %193 = vector.broadcast %185 : vector<16x1xf32> to vector<16x128xf32>
      %194 = arith.mulf %193, %arg11 : vector<16x128xf32>
      %cst_67 = arith.constant dense<0.000000e+00> : vector<16x128xf32>
      %195 = tpu.matmul %188, %179, %cst_67 {dimension_numbers = #tpu.dot_dimension_numbers<[1], [0], [0], [1], [0, 0, 1, 1], [], []>} : vector<16x16xf32>, vector<16x128xf32>, vector<16x128xf32> -> vector<16x128xf32>
      %196 = arith.addf %194, %195 : vector<16x128xf32>
      scf.yield %183, %192, %196 : vector<16x1xf32>, vector<16x1xf32>, vector<16x128xf32>
    }
    %c16_i32_35 = arith.constant 16 : i32
    %100 = arith.muli %arg1, %c16_i32_35 : i32
    %101 = tpu.assume_multiple %100, 16 : i32
    %102 = arith.index_cast %101 : i32 to index
    %c768 = arith.constant 768 : index
    %103 = vector.load %arg7[%102, %c768] : memref<16x1536xf32, #tpu.memory_space<vmem>>, vector<16x128xf32>
    %104 = arith.index_cast %101 : i32 to index
    %c1280 = arith.constant 1280 : index
    %105 = vector.load %arg7[%104, %c1280] : memref<16x1536xf32, #tpu.memory_space<vmem>>, vector<16x128xf32>
    %cst_36 = arith.constant dense<0.000000e+00> : vector<16x16xf32>
    %106 = tpu.matmul %93, %103, %cst_36 {dimension_numbers = #tpu.dot_dimension_numbers<[1], [1], [0], [0], [0, 0, 1, 0], [], []>} : vector<16x128xf32>, vector<16x128xf32>, vector<16x16xf32> -> vector<16x16xf32>
    %cst_37 = arith.constant -1.000000e+30 : f32
    %107 = vector.broadcast %cst_37 : f32 to vector<16x16xf32>
    %108 = arith.select %11, %107, %106 : vector<16x16xi1>, vector<16x16xf32>
    %cst_38 = arith.constant dense<0xFF800000> : vector<16xf32>
    %109 = vector.multi_reduction <maximumf>, %108, %cst_38 [1] : vector<16x16xf32> to vector<16xf32>
    %110 = vector.shape_cast %109 : vector<16xf32> to vector<16x1xf32>
    %111 = arith.maximumf %99#0, %110 : vector<16x1xf32>
    %112 = arith.subf %99#0, %111 : vector<16x1xf32>
    %113 = math.exp %112 : vector<16x1xf32>
    %114 = vector.broadcast %111 : vector<16x1xf32> to vector<16x16xf32>
    %115 = arith.subf %108, %114 : vector<16x16xf32>
    %116 = math.exp %115 : vector<16x16xf32>
    %117 = arith.mulf %113, %99#1 : vector<16x1xf32>
    %cst_39 = arith.constant dense<0.000000e+00> : vector<16xf32>
    %118 = vector.multi_reduction <add>, %116, %cst_39 [1] : vector<16x16xf32> to vector<16xf32>
    %119 = vector.shape_cast %118 : vector<16xf32> to vector<16x1xf32>
    %120 = arith.addf %117, %119 : vector<16x1xf32>
    %121 = vector.broadcast %113 : vector<16x1xf32> to vector<16x128xf32>
    %122 = arith.mulf %121, %99#2 : vector<16x128xf32>
    %cst_40 = arith.constant dense<0.000000e+00> : vector<16x128xf32>
    %123 = tpu.matmul %116, %105, %cst_40 {dimension_numbers = #tpu.dot_dimension_numbers<[1], [0], [0], [1], [0, 0, 1, 1], [], []>} : vector<16x16xf32>, vector<16x128xf32>, vector<16x128xf32> -> vector<16x128xf32>
    %124 = arith.addf %122, %123 : vector<16x128xf32>
    %cst_41 = arith.constant 1.000000e+00 : f32
    %125 = vector.broadcast %cst_41 : f32 to vector<16x1xf32>
    %126 = arith.divf %125, %120 : vector<16x1xf32>
    %127 = vector.broadcast %126 : vector<16x1xf32> to vector<16x128xf32>
    %128 = arith.mulf %124, %127 : vector<16x128xf32>
    %c256 = arith.constant 256 : index
    %c0_42 = arith.constant 0 : index
    %129 = vector.load %arg4[%c256, %c0_42] : memref<512x64xf32, #tpu.memory_space<vmem>>, vector<128x64xf32>
    %cst_43 = arith.constant dense<0.000000e+00> : vector<16x64xf32>
    %130 = tpu.matmul %128, %129, %cst_43 {dimension_numbers = #tpu.dot_dimension_numbers<[1], [0], [0], [1], [0, 0, 1, 1], [], []>} : vector<16x128xf32>, vector<128x64xf32>, vector<16x64xf32> -> vector<16x64xf32>
    %131 = arith.addf %92, %130 : vector<16x64xf32>
    %132 = vector.extract_strided_slice %6 {offsets = [0, 384], sizes = [16, 128], strides = [1, 1]} : vector<16x512xf32> to vector<16x128xf32>
    %cst_44 = arith.constant -1.000000e+30 : f32
    %133 = vector.broadcast %cst_44 : f32 to vector<16x1xf32>
    %cst_45 = arith.constant 0.000000e+00 : f32
    %134 = vector.broadcast %cst_45 : f32 to vector<16x1xf32>
    %cst_46 = arith.constant 0.000000e+00 : f32
    %135 = vector.broadcast %cst_46 : f32 to vector<16x128xf32>
    %c0_i32_47 = arith.constant 0 : i32
    %136 = arith.subi %arg1, %c0_i32_47 : i32
    %137 = arith.addi %c0_i32_47, %136 : i32
    %c1_i32_48 = arith.constant 1 : i32
    %138:3 = scf.for %arg8 = %c0_i32_47 to %137 step %c1_i32_48 iter_args(%arg9 = %133, %arg10 = %134, %arg11 = %135) -> (vector<16x1xf32>, vector<16x1xf32>, vector<16x128xf32>)  : i32 {
      %c16_i32_61 = arith.constant 16 : i32
      %174 = arith.muli %arg8, %c16_i32_61 : i32
      %175 = tpu.assume_multiple %174, 16 : i32
      %176 = arith.index_cast %175 : i32 to index
      %c896_62 = arith.constant 896 : index
      %177 = vector.load %arg7[%176, %c896_62] : memref<16x1536xf32, #tpu.memory_space<vmem>>, vector<16x128xf32>
      %178 = arith.index_cast %175 : i32 to index
      %c1408_63 = arith.constant 1408 : index
      %179 = vector.load %arg7[%178, %c1408_63] : memref<16x1536xf32, #tpu.memory_space<vmem>>, vector<16x128xf32>
      %cst_64 = arith.constant dense<0.000000e+00> : vector<16x16xf32>
      %180 = tpu.matmul %132, %177, %cst_64 {dimension_numbers = #tpu.dot_dimension_numbers<[1], [1], [0], [0], [0, 0, 1, 0], [], []>} : vector<16x128xf32>, vector<16x128xf32>, vector<16x16xf32> -> vector<16x16xf32>
      %cst_65 = arith.constant dense<0xFF800000> : vector<16xf32>
      %181 = vector.multi_reduction <maximumf>, %180, %cst_65 [1] : vector<16x16xf32> to vector<16xf32>
      %182 = vector.shape_cast %181 : vector<16xf32> to vector<16x1xf32>
      %183 = arith.maximumf %arg9, %182 : vector<16x1xf32>
      %184 = arith.subf %arg9, %183 : vector<16x1xf32>
      %185 = math.exp %184 : vector<16x1xf32>
      %186 = vector.broadcast %183 : vector<16x1xf32> to vector<16x16xf32>
      %187 = arith.subf %180, %186 : vector<16x16xf32>
      %188 = math.exp %187 : vector<16x16xf32>
      %189 = arith.mulf %185, %arg10 : vector<16x1xf32>
      %cst_66 = arith.constant dense<0.000000e+00> : vector<16xf32>
      %190 = vector.multi_reduction <add>, %188, %cst_66 [1] : vector<16x16xf32> to vector<16xf32>
      %191 = vector.shape_cast %190 : vector<16xf32> to vector<16x1xf32>
      %192 = arith.addf %189, %191 : vector<16x1xf32>
      %193 = vector.broadcast %185 : vector<16x1xf32> to vector<16x128xf32>
      %194 = arith.mulf %193, %arg11 : vector<16x128xf32>
      %cst_67 = arith.constant dense<0.000000e+00> : vector<16x128xf32>
      %195 = tpu.matmul %188, %179, %cst_67 {dimension_numbers = #tpu.dot_dimension_numbers<[1], [0], [0], [1], [0, 0, 1, 1], [], []>} : vector<16x16xf32>, vector<16x128xf32>, vector<16x128xf32> -> vector<16x128xf32>
      %196 = arith.addf %194, %195 : vector<16x128xf32>
      scf.yield %183, %192, %196 : vector<16x1xf32>, vector<16x1xf32>, vector<16x128xf32>
    }
    %c16_i32_49 = arith.constant 16 : i32
    %139 = arith.muli %arg1, %c16_i32_49 : i32
    %140 = tpu.assume_multiple %139, 16 : i32
    %141 = arith.index_cast %140 : i32 to index
    %c896 = arith.constant 896 : index
    %142 = vector.load %arg7[%141, %c896] : memref<16x1536xf32, #tpu.memory_space<vmem>>, vector<16x128xf32>
    %143 = arith.index_cast %140 : i32 to index
    %c1408 = arith.constant 1408 : index
    %144 = vector.load %arg7[%143, %c1408] : memref<16x1536xf32, #tpu.memory_space<vmem>>, vector<16x128xf32>
    %cst_50 = arith.constant dense<0.000000e+00> : vector<16x16xf32>
    %145 = tpu.matmul %132, %142, %cst_50 {dimension_numbers = #tpu.dot_dimension_numbers<[1], [1], [0], [0], [0, 0, 1, 0], [], []>} : vector<16x128xf32>, vector<16x128xf32>, vector<16x16xf32> -> vector<16x16xf32>
    %cst_51 = arith.constant -1.000000e+30 : f32
    %146 = vector.broadcast %cst_51 : f32 to vector<16x16xf32>
    %147 = arith.select %11, %146, %145 : vector<16x16xi1>, vector<16x16xf32>
    %cst_52 = arith.constant dense<0xFF800000> : vector<16xf32>
    %148 = vector.multi_reduction <maximumf>, %147, %cst_52 [1] : vector<16x16xf32> to vector<16xf32>
    %149 = vector.shape_cast %148 : vector<16xf32> to vector<16x1xf32>
    %150 = arith.maximumf %138#0, %149 : vector<16x1xf32>
    %151 = arith.subf %138#0, %150 : vector<16x1xf32>
    %152 = math.exp %151 : vector<16x1xf32>
    %153 = vector.broadcast %150 : vector<16x1xf32> to vector<16x16xf32>
    %154 = arith.subf %147, %153 : vector<16x16xf32>
    %155 = math.exp %154 : vector<16x16xf32>
    %156 = arith.mulf %152, %138#1 : vector<16x1xf32>
    %cst_53 = arith.constant dense<0.000000e+00> : vector<16xf32>
    %157 = vector.multi_reduction <add>, %155, %cst_53 [1] : vector<16x16xf32> to vector<16xf32>
    %158 = vector.shape_cast %157 : vector<16xf32> to vector<16x1xf32>
    %159 = arith.addf %156, %158 : vector<16x1xf32>
    %160 = vector.broadcast %152 : vector<16x1xf32> to vector<16x128xf32>
    %161 = arith.mulf %160, %138#2 : vector<16x128xf32>
    %cst_54 = arith.constant dense<0.000000e+00> : vector<16x128xf32>
    %162 = tpu.matmul %155, %144, %cst_54 {dimension_numbers = #tpu.dot_dimension_numbers<[1], [0], [0], [1], [0, 0, 1, 1], [], []>} : vector<16x16xf32>, vector<16x128xf32>, vector<16x128xf32> -> vector<16x128xf32>
    %163 = arith.addf %161, %162 : vector<16x128xf32>
    %cst_55 = arith.constant 1.000000e+00 : f32
    %164 = vector.broadcast %cst_55 : f32 to vector<16x1xf32>
    %165 = arith.divf %164, %159 : vector<16x1xf32>
    %166 = vector.broadcast %165 : vector<16x1xf32> to vector<16x128xf32>
    %167 = arith.mulf %163, %166 : vector<16x128xf32>
    %c384 = arith.constant 384 : index
    %c0_56 = arith.constant 0 : index
    %168 = vector.load %arg4[%c384, %c0_56] : memref<512x64xf32, #tpu.memory_space<vmem>>, vector<128x64xf32>
    %cst_57 = arith.constant dense<0.000000e+00> : vector<16x64xf32>
    %169 = tpu.matmul %167, %168, %cst_57 {dimension_numbers = #tpu.dot_dimension_numbers<[1], [0], [0], [1], [0, 0, 1, 1], [], []>} : vector<16x128xf32>, vector<128x64xf32>, vector<16x64xf32> -> vector<16x64xf32>
    %170 = arith.addf %131, %169 : vector<16x64xf32>
    %c0_58 = arith.constant 0 : index
    %c0_59 = arith.constant 0 : index
    %c0_60 = arith.constant 0 : index
    %171 = vector.load %arg6[%c0_58, %c0_59, %c0_60] : memref<1x16x64xf32, #tpu.memory_space<vmem>>, vector<1x16x64xf32>
    %172 = vector.shape_cast %171 : vector<1x16x64xf32> to vector<16x64xf32>
    %173 = vector.shape_cast %170 : vector<16x64xf32> to vector<1x16x64xf32>
    tpu.vector_store %arg6[%c0_58, %c0_59, %c0_60], %173 {strides = array<i32>} : memref<1x16x64xf32, #tpu.memory_space<vmem>>, vector<1x16x64xf32>,
    return
  }
  func.func @transform_0(%arg0: i32, %arg1: i32) -> (i32, i32, i32) {
    %c0_i32 = arith.constant 0 : i32
    %c0_i32_0 = arith.constant 0 : i32
    %c0_i32_1 = arith.constant 0 : i32
    return %arg0, %c0_i32, %c0_i32_0 : i32, i32, i32
  }
  func.func @transform_1(%arg0: i32, %arg1: i32) -> (i32, i32) {
    %c0_i32 = arith.constant 0 : i32
    %c0_i32_0 = arith.constant 0 : i32
    %c0_i32_1 = arith.constant 0 : i32
    return %c0_i32, %c0_i32_0 : i32, i32
  }
  func.func @transform_2(%arg0: i32, %arg1: i32) -> (i32, i32) {
    %c0_i32 = arith.constant 0 : i32
    %c0_i32_0 = arith.constant 0 : i32
    %c0_i32_1 = arith.constant 0 : i32
    return %c0_i32, %c0_i32_0 : i32, i32
  }
  func.func @transform_3(%arg0: i32, %arg1: i32) -> (i32, i32) {
    %c0_i32 = arith.constant 0 : i32
    %c0_i32_0 = arith.constant 0 : i32
    %c0_i32_1 = arith.constant 0 : i32
    return %c0_i32, %c0_i32_0 : i32, i32
  }
  func.func @transform_4(%arg0: i32, %arg1: i32) -> (i32, i32, i32) {
    %c0_i32 = arith.constant 0 : i32
    %c0_i32_0 = arith.constant 0 : i32
    return %arg0, %arg1, %c0_i32 : i32, i32, i32
  }
}

module attributes {stable_mosaic.version = 11 : i64} {
  func.func @_fused_mha_kernel(%arg0: i32, %arg1: i32, %arg2: memref<1x16x32xf32, #tpu.memory_space<vmem>>, %arg3: memref<32x1536xf32, #tpu.memory_space<vmem>>, %arg4: memref<512x64xf32, #tpu.memory_space<vmem>>, %arg5: memref<1x64xf32, #tpu.memory_space<vmem>>, %arg6: memref<1x16x64xf32, #tpu.memory_space<vmem>>, %arg7: memref<16x1536xf32, #tpu.memory_space<vmem>>) attributes {dimension_semantics = [#tpu.dimension_semantics<parallel>, #tpu.dimension_semantics<arbitrary>], iteration_bounds = array<i64: 2, 1>, scalar_prefetch = 0 : i64, scratch_operands = 1 : i64, tpu.core_type = #tpu.core_type<tc>, window_params = [{transform_indices = @transform_0, window_bounds = array<i64: 1, 16, 32>}, {pipeline_mode = #tpu.pipeline_mode<synchronous>, transform_indices = @transform_1, window_bounds = array<i64: 32, 1536>}, {pipeline_mode = #tpu.pipeline_mode<synchronous>, transform_indices = @transform_2, window_bounds = array<i64: 512, 64>}, {pipeline_mode = #tpu.pipeline_mode<synchronous>, transform_indices = @transform_3, window_bounds = array<i64: 1, 64>}, {transform_indices = @transform_4, window_bounds = array<i64: 1, 16, 64>}]} {
    %c0_i32 = arith.constant 0 : i32
    %0 = arith.cmpi eq, %arg1, %c0_i32 : i32
    %1 = arith.extui %0 : i1 to i32
    %c0_i32_0 = arith.constant 0 : i32
    %2 = arith.cmpi ne, %1, %c0_i32_0 : i32
    scf.if %2 {
      %c0_i32_61 = arith.constant 0 : i32
      %c16_i32_62 = arith.constant 16 : i32
      %174 = arith.muli %c0_i32_61, %c16_i32_62 : i32
      %175 = tpu.assume_multiple %174, 16 : i32
      %c0_63 = arith.constant 0 : index
      %176 = arith.index_cast %175 : i32 to index
      %c0_64 = arith.constant 0 : index
      %177 = vector.load %arg2[%c0_63, %176, %c0_64] : memref<1x16x32xf32, #tpu.memory_space<vmem>>, vector<1x16x32xf32>
      %178 = vector.shape_cast %177 : vector<1x16x32xf32> to vector<16x32xf32>
      %c0_65 = arith.constant 0 : index
      %c0_66 = arith.constant 0 : index
      %179 = vector.load %arg3[%c0_65, %c0_66] : memref<32x1536xf32, #tpu.memory_space<vmem>>, vector<32x1536xf32>
      %cst_67 = arith.constant dense<0.000000e+00> : vector<16x1536xf32>
      %180 = tpu.matmul %178, %179, %cst_67 {dimension_numbers = #tpu.dot_dimension_numbers<[1], [0], [0], [1], [0, 0, 1, 1], [], []>} : vector<16x32xf32>, vector<32x1536xf32>, vector<16x1536xf32> -> vector<16x1536xf32>
      %181 = arith.index_cast %175 : i32 to index
      %c0_68 = arith.constant 0 : index
      %182 = vector.load %arg7[%181, %c0_68] : memref<16x1536xf32, #tpu.memory_space<vmem>>, vector<16x1536xf32>
      tpu.vector_store %arg7[%181, %c0_68], %180 {strides = array<i32>} : memref<16x1536xf32, #tpu.memory_space<vmem>>, vector<16x1536xf32>,
      %c1_i32_69 = arith.constant 1 : i32
    } else {
    }
    %c16_i32 = arith.constant 16 : i32
    %3 = arith.muli %arg1, %c16_i32 : i32
    %4 = tpu.assume_multiple %3, 16 : i32
    %5 = arith.index_cast %4 : i32 to index
    %c0 = arith.constant 0 : index
    %6 = vector.load %arg7[%5, %c0] : memref<16x1536xf32, #tpu.memory_space<vmem>>, vector<16x512xf32>
    %7 = tpu.iota {dimensions = array<i32: 0>} : vector<16x1xi32>
    %8 = tpu.iota {dimensions = array<i32: 1>} : vector<1x16xi32>
    %9 = vector.broadcast %8 : vector<1x16xi32> to vector<16x16xi32>
    %10 = vector.broadcast %7 : vector<16x1xi32> to vector<16x16xi32>
    %11 = arith.cmpi sgt, %9, %10 : vector<16x16xi32>
    %c0_1 = arith.constant 0 : index
    %c0_2 = arith.constant 0 : index
    %12 = vector.load %arg5[%c0_1, %c0_2] : memref<1x64xf32, #tpu.memory_space<vmem>>, vector<1x64xf32>
    %13 = vector.shape_cast %12 : vector<1x64xf32> to vector<1x64xf32>
    %14 = vector.broadcast %13 : vector<1x64xf32> to vector<16x64xf32>
    %15 = vector.extract_strided_slice %6 {offsets = [0, 0], sizes = [16, 128], strides = [1, 1]} : vector<16x512xf32> to vector<16x128xf32>
    %cst = arith.constant -1.000000e+30 : f32
    %16 = vector.broadcast %cst : f32 to vector<16x1xf32>
    %cst_3 = arith.constant 0.000000e+00 : f32
    %17 = vector.broadcast %cst_3 : f32 to vector<16x1xf32>
    %cst_4 = arith.constant 0.000000e+00 : f32
    %18 = vector.broadcast %cst_4 : f32 to vector<16x128xf32>
    %c0_i32_5 = arith.constant 0 : i32
    %19 = arith.subi %arg1, %c0_i32_5 : i32
    %20 = arith.addi %c0_i32_5, %19 : i32
    %c1_i32 = arith.constant 1 : i32
    %21:3 = scf.for %arg8 = %c0_i32_5 to %20 step %c1_i32 iter_args(%arg9 = %16, %arg10 = %17, %arg11 = %18) -> (vector<16x1xf32>, vector<16x1xf32>, vector<16x128xf32>)  : i32 {
      %c16_i32_61 = arith.constant 16 : i32
      %174 = arith.muli %arg8, %c16_i32_61 : i32
      %175 = tpu.assume_multiple %174, 16 : i32
      %176 = arith.index_cast %175 : i32 to index
      %c512_62 = arith.constant 512 : index
      %177 = vector.load %arg7[%176, %c512_62] : memref<16x1536xf32, #tpu.memory_space<vmem>>, vector<16x128xf32>
      %178 = arith.index_cast %175 : i32 to index
      %c1024_63 = arith.constant 1024 : index
      %179 = vector.load %arg7[%178, %c1024_63] : memref<16x1536xf32, #tpu.memory_space<vmem>>, vector<16x128xf32>
      %cst_64 = arith.constant dense<0.000000e+00> : vector<16x16xf32>
      %180 = tpu.matmul %15, %177, %cst_64 {dimension_numbers = #tpu.dot_dimension_numbers<[1], [1], [0], [0], [0, 0, 1, 0], [], []>} : vector<16x128xf32>, vector<16x128xf32>, vector<16x16xf32> -> vector<16x16xf32>
      %cst_65 = arith.constant dense<0xFF800000> : vector<16xf32>
      %181 = vector.multi_reduction <maximumf>, %180, %cst_65 [1] : vector<16x16xf32> to vector<16xf32>
      %182 = vector.shape_cast %181 : vector<16xf32> to vector<16x1xf32>
      %183 = arith.maximumf %arg9, %182 : vector<16x1xf32>
      %184 = arith.subf %arg9, %183 : vector<16x1xf32>
      %185 = math.exp %184 : vector<16x1xf32>
      %186 = vector.broadcast %183 : vector<16x1xf32> to vector<16x16xf32>
      %187 = arith.subf %180, %186 : vector<16x16xf32>
      %188 = math.exp %187 : vector<16x16xf32>
      %189 = arith.mulf %185, %arg10 : vector<16x1xf32>
      %cst_66 = arith.constant dense<0.000000e+00> : vector<16xf32>
      %190 = vector.multi_reduction <add>, %188, %cst_66 [1] : vector<16x16xf32> to vector<16xf32>
      %191 = vector.shape_cast %190 : vector<16xf32> to vector<16x1xf32>
      %192 = arith.addf %189, %191 : vector<16x1xf32>
      %193 = vector.broadcast %185 : vector<16x1xf32> to vector<16x128xf32>
      %194 = arith.mulf %193, %arg11 : vector<16x128xf32>
      %cst_67 = arith.constant dense<0.000000e+00> : vector<16x128xf32>
      %195 = tpu.matmul %188, %179, %cst_67 {dimension_numbers = #tpu.dot_dimension_numbers<[1], [0], [0], [1], [0, 0, 1, 1], [], []>} : vector<16x16xf32>, vector<16x128xf32>, vector<16x128xf32> -> vector<16x128xf32>
      %196 = arith.addf %194, %195 : vector<16x128xf32>
      scf.yield %183, %192, %196 : vector<16x1xf32>, vector<16x1xf32>, vector<16x128xf32>
    }
    %c16_i32_6 = arith.constant 16 : i32
    %22 = arith.muli %arg1, %c16_i32_6 : i32
    %23 = tpu.assume_multiple %22, 16 : i32
    %24 = arith.index_cast %23 : i32 to index
    %c512 = arith.constant 512 : index
    %25 = vector.load %arg7[%24, %c512] : memref<16x1536xf32, #tpu.memory_space<vmem>>, vector<16x128xf32>
    %26 = arith.index_cast %23 : i32 to index
    %c1024 = arith.constant 1024 : index
    %27 = vector.load %arg7[%26, %c1024] : memref<16x1536xf32, #tpu.memory_space<vmem>>, vector<16x128xf32>
    %cst_7 = arith.constant dense<0.000000e+00> : vector<16x16xf32>
    %28 = tpu.matmul %15, %25, %cst_7 {dimension_numbers = #tpu.dot_dimension_numbers<[1], [1], [0], [0], [0, 0, 1, 0], [], []>} : vector<16x128xf32>, vector<16x128xf32>, vector<16x16xf32> -> vector<16x16xf32>
    %cst_8 = arith.constant -1.000000e+30 : f32
    %29 = vector.broadcast %cst_8 : f32 to vector<16x16xf32>
    %30 = arith.select %11, %29, %28 : vector<16x16xi1>, vector<16x16xf32>
    %cst_9 = arith.constant dense<0xFF800000> : vector<16xf32>
    %31 = vector.multi_reduction <maximumf>, %30, %cst_9 [1] : vector<16x16xf32> to vector<16xf32>
    %32 = vector.shape_cast %31 : vector<16xf32> to vector<16x1xf32>
    %33 = arith.maximumf %21#0, %32 : vector<16x1xf32>
    %34 = arith.subf %21#0, %33 : vector<16x1xf32>
    %35 = math.exp %34 : vector<16x1xf32>
    %36 = vector.broadcast %33 : vector<16x1xf32> to vector<16x16xf32>
    %37 = arith.subf %30, %36 : vector<16x16xf32>
    %38 = math.exp %37 : vector<16x16xf32>
    %39 = arith.mulf %35, %21#1 : vector<16x1xf32>
    %cst_10 = arith.constant dense<0.000000e+00> : vector<16xf32>
    %40 = vector.multi_reduction <add>, %38, %cst_10 [1] : vector<16x16xf32> to vector<16xf32>
    %41 = vector.shape_cast %40 : vector<16xf32> to vector<16x1xf32>
    %42 = arith.addf %39, %41 : vector<16x1xf32>
    %43 = vector.broadcast %35 : vector<16x1xf32> to vector<16x128xf32>
    %44 = arith.mulf %43, %21#2 : vector<16x128xf32>
    %cst_11 = arith.constant dense<0.000000e+00> : vector<16x128xf32>
    %45 = tpu.matmul %38, %27, %cst_11 {dimension_numbers = #tpu.dot_dimension_numbers<[1], [0], [0], [1], [0, 0, 1, 1], [], []>} : vector<16x16xf32>, vector<16x128xf32>, vector<16x128xf32> -> vector<16x128xf32>
    %46 = arith.addf %44, %45 : vector<16x128xf32>
    %cst_12 = arith.constant 1.000000e+00 : f32
    %47 = vector.broadcast %cst_12 : f32 to vector<16x1xf32>
    %48 = arith.divf %47, %42 : vector<16x1xf32>
    %49 = vector.broadcast %48 : vector<16x1xf32> to vector<16x128xf32>
    %50 = arith.mulf %46, %49 : vector<16x128xf32>
    %c0_13 = arith.constant 0 : index
    %c0_14 = arith.constant 0 : index
    %51 = vector.load %arg4[%c0_13, %c0_14] : memref<512x64xf32, #tpu.memory_space<vmem>>, vector<128x64xf32>
    %cst_15 = arith.constant dense<0.000000e+00> : vector<16x64xf32>
    %52 = tpu.matmul %50, %51, %cst_15 {dimension_numbers = #tpu.dot_dimension_numbers<[1], [0], [0], [1], [0, 0, 1, 1], [], []>} : vector<16x128xf32>, vector<128x64xf32>, vector<16x64xf32> -> vector<16x64xf32>
    %53 = arith.addf %14, %52 : vector<16x64xf32>
    %54 = vector.extract_strided_slice %6 {offsets = [0, 128], sizes = [16, 128], strides = [1, 1]} : vector<16x512xf32> to vector<16x128xf32>
    %cst_16 = arith.constant -1.000000e+30 : f32
    %55 = vector.broadcast %cst_16 : f32 to vector<16x1xf32>
    %cst_17 = arith.constant 0.000000e+00 : f32
    %56 = vector.broadcast %cst_17 : f32 to vector<16x1xf32>
    %cst_18 = arith.constant 0.000000e+00 : f32
    %57 = vector.broadcast %cst_18 : f32 to vector<16x128xf32>
    %c0_i32_19 = arith.constant 0 : i32
    %58 = arith.subi %arg1, %c0_i32_19 : i32
    %59 = arith.addi %c0_i32_19, %58 : i32
    %c1_i32_20 = arith.constant 1 : i32
    %60:3 = scf.for %arg8 = %c0_i32_19 to %59 step %c1_i32_20 iter_args(%arg9 = %55, %arg10 = %56, %arg11 = %57) -> (vector<16x1xf32>, vector<16x1xf32>, vector<16x128xf32>)  : i32 {
      %c16_i32_61 = arith.constant 16 : i32
      %174 = arith.muli %arg8, %c16_i32_61 : i32
      %175 = tpu.assume_multiple %174, 16 : i32
      %176 = arith.index_cast %175 : i32 to index
      %c640_62 = arith.constant 640 : index
      %177 = vector.load %arg7[%176, %c640_62] : memref<16x1536xf32, #tpu.memory_space<vmem>>, vector<16x128xf32>
      %178 = arith.index_cast %175 : i32 to index
      %c1152_63 = arith.constant 1152 : index
      %179 = vector.load %arg7[%178, %c1152_63] : memref<16x1536xf32, #tpu.memory_space<vmem>>, vector<16x128xf32>
      %cst_64 = arith.constant dense<0.000000e+00> : vector<16x16xf32>
      %180 = tpu.matmul %54, %177, %cst_64 {dimension_numbers = #tpu.dot_dimension_numbers<[1], [1], [0], [0], [0, 0, 1, 0], [], []>} : vector<16x128xf32>, vector<16x128xf32>, vector<16x16xf32> -> vector<16x16xf32>
      %cst_65 = arith.constant dense<0xFF800000> : vector<16xf32>
      %181 = vector.multi_reduction <maximumf>, %180, %cst_65 [1] : vector<16x16xf32> to vector<16xf32>
      %182 = vector.shape_cast %181 : vector<16xf32> to vector<16x1xf32>
      %183 = arith.maximumf %arg9, %182 : vector<16x1xf32>
      %184 = arith.subf %arg9, %183 : vector<16x1xf32>
      %185 = math.exp %184 : vector<16x1xf32>
      %186 = vector.broadcast %183 : vector<16x1xf32> to vector<16x16xf32>
      %187 = arith.subf %180, %186 : vector<16x16xf32>
      %188 = math.exp %187 : vector<16x16xf32>
      %189 = arith.mulf %185, %arg10 : vector<16x1xf32>
      %cst_66 = arith.constant dense<0.000000e+00> : vector<16xf32>
      %190 = vector.multi_reduction <add>, %188, %cst_66 [1] : vector<16x16xf32> to vector<16xf32>
      %191 = vector.shape_cast %190 : vector<16xf32> to vector<16x1xf32>
      %192 = arith.addf %189, %191 : vector<16x1xf32>
      %193 = vector.broadcast %185 : vector<16x1xf32> to vector<16x128xf32>
      %194 = arith.mulf %193, %arg11 : vector<16x128xf32>
      %cst_67 = arith.constant dense<0.000000e+00> : vector<16x128xf32>
      %195 = tpu.matmul %188, %179, %cst_67 {dimension_numbers = #tpu.dot_dimension_numbers<[1], [0], [0], [1], [0, 0, 1, 1], [], []>} : vector<16x16xf32>, vector<16x128xf32>, vector<16x128xf32> -> vector<16x128xf32>
      %196 = arith.addf %194, %195 : vector<16x128xf32>
      scf.yield %183, %192, %196 : vector<16x1xf32>, vector<16x1xf32>, vector<16x128xf32>
    }
    %c16_i32_21 = arith.constant 16 : i32
    %61 = arith.muli %arg1, %c16_i32_21 : i32
    %62 = tpu.assume_multiple %61, 16 : i32
    %63 = arith.index_cast %62 : i32 to index
    %c640 = arith.constant 640 : index
    %64 = vector.load %arg7[%63, %c640] : memref<16x1536xf32, #tpu.memory_space<vmem>>, vector<16x128xf32>
    %65 = arith.index_cast %62 : i32 to index
    %c1152 = arith.constant 1152 : index
    %66 = vector.load %arg7[%65, %c1152] : memref<16x1536xf32, #tpu.memory_space<vmem>>, vector<16x128xf32>
    %cst_22 = arith.constant dense<0.000000e+00> : vector<16x16xf32>
    %67 = tpu.matmul %54, %64, %cst_22 {dimension_numbers = #tpu.dot_dimension_numbers<[1], [1], [0], [0], [0, 0, 1, 0], [], []>} : vector<16x128xf32>, vector<16x128xf32>, vector<16x16xf32> -> vector<16x16xf32>
    %cst_23 = arith.constant -1.000000e+30 : f32
    %68 = vector.broadcast %cst_23 : f32 to vector<16x16xf32>
    %69 = arith.select %11, %68, %67 : vector<16x16xi1>, vector<16x16xf32>
    %cst_24 = arith.constant dense<0xFF800000> : vector<16xf32>
    %70 = vector.multi_reduction <maximumf>, %69, %cst_24 [1] : vector<16x16xf32> to vector<16xf32>
    %71 = vector.shape_cast %70 : vector<16xf32> to vector<16x1xf32>
    %72 = arith.maximumf %60#0, %71 : vector<16x1xf32>
    %73 = arith.subf %60#0, %72 : vector<16x1xf32>
    %74 = math.exp %73 : vector<16x1xf32>
    %75 = vector.broadcast %72 : vector<16x1xf32> to vector<16x16xf32>
    %76 = arith.subf %69, %75 : vector<16x16xf32>
    %77 = math.exp %76 : vector<16x16xf32>
    %78 = arith.mulf %74, %60#1 : vector<16x1xf32>
    %cst_25 = arith.constant dense<0.000000e+00> : vector<16xf32>
    %79 = vector.multi_reduction <add>, %77, %cst_25 [1] : vector<16x16xf32> to vector<16xf32>
    %80 = vector.shape_cast %79 : vector<16xf32> to vector<16x1xf32>
    %81 = arith.addf %78, %80 : vector<16x1xf32>
    %82 = vector.broadcast %74 : vector<16x1xf32> to vector<16x128xf32>
    %83 = arith.mulf %82, %60#2 : vector<16x128xf32>
    %cst_26 = arith.constant dense<0.000000e+00> : vector<16x128xf32>
    %84 = tpu.matmul %77, %66, %cst_26 {dimension_numbers = #tpu.dot_dimension_numbers<[1], [0], [0], [1], [0, 0, 1, 1], [], []>} : vector<16x16xf32>, vector<16x128xf32>, vector<16x128xf32> -> vector<16x128xf32>
    %85 = arith.addf %83, %84 : vector<16x128xf32>
    %cst_27 = arith.constant 1.000000e+00 : f32
    %86 = vector.broadcast %cst_27 : f32 to vector<16x1xf32>
    %87 = arith.divf %86, %81 : vector<16x1xf32>
    %88 = vector.broadcast %87 : vector<16x1xf32> to vector<16x128xf32>
    %89 = arith.mulf %85, %88 : vector<16x128xf32>
    %c128 = arith.constant 128 : index
    %c0_28 = arith.constant 0 : index
    %90 = vector.load %arg4[%c128, %c0_28] : memref<512x64xf32, #tpu.memory_space<vmem>>, vector<128x64xf32>
    %cst_29 = arith.constant dense<0.000000e+00> : vector<16x64xf32>
    %91 = tpu.matmul %89, %90, %cst_29 {dimension_numbers = #tpu.dot_dimension_numbers<[1], [0], [0], [1], [0, 0, 1, 1], [], []>} : vector<16x128xf32>, vector<128x64xf32>, vector<16x64xf32> -> vector<16x64xf32>
    %92 = arith.addf %53, %91 : vector<16x64xf32>
    %93 = vector.extract_strided_slice %6 {offsets = [0, 256], sizes = [16, 128], strides = [1, 1]} : vector<16x512xf32> to vector<16x128xf32>
    %cst_30 = arith.constant -1.000000e+30 : f32
    %94 = vector.broadcast %cst_30 : f32 to vector<16x1xf32>
    %cst_31 = arith.constant 0.000000e+00 : f32
    %95 = vector.broadcast %cst_31 : f32 to vector<16x1xf32>
    %cst_32 = arith.constant 0.000000e+00 : f32
    %96 = vector.broadcast %cst_32 : f32 to vector<16x128xf32>
    %c0_i32_33 = arith.constant 0 : i32
    %97 = arith.subi %arg1, %c0_i32_33 : i32
    %98 = arith.addi %c0_i32_33, %97 : i32
    %c1_i32_34 = arith.constant 1 : i32
    %99:3 = scf.for %arg8 = %c0_i32_33 to %98 step %c1_i32_34 iter_args(%arg9 = %94, %arg10 = %95, %arg11 = %96) -> (vector<16x1xf32>, vector<16x1xf32>, vector<16x128xf32>)  : i32 {
      %c16_i32_61 = arith.constant 16 : i32
      %174 = arith.muli %arg8, %c16_i32_61 : i32
      %175 = tpu.assume_multiple %174, 16 : i32
      %176 = arith.index_cast %175 : i32 to index
      %c768_62 = arith.constant 768 : index
      %177 = vector.load %arg7[%176, %c768_62] : memref<16x1536xf32, #tpu.memory_space<vmem>>, vector<16x128xf32>
      %178 = arith.index_cast %175 : i32 to index
      %c1280_63 = arith.constant 1280 : index
      %179 = vector.load %arg7[%178, %c1280_63] : memref<16x1536xf32, #tpu.memory_space<vmem>>, vector<16x128xf32>
      %cst_64 = arith.constant dense<0.000000e+00> : vector<16x16xf32>
      %180 = tpu.matmul %93, %177, %cst_64 {dimension_numbers = #tpu.dot_dimension_numbers<[1], [1], [0], [0], [0, 0, 1, 0], [], []>} : vector<16x128xf32>, vector<16x128xf32>, vector<16x16xf32> -> vector<16x16xf32>
      %cst_65 = arith.constant dense<0xFF800000> : vector<16xf32>
      %181 = vector.multi_reduction <maximumf>, %180, %cst_65 [1] : vector<16x16xf32> to vector<16xf32>
      %182 = vector.shape_cast %181 : vector<16xf32> to vector<16x1xf32>
      %183 = arith.maximumf %arg9, %182 : vector<16x1xf32>
      %184 = arith.subf %arg9, %183 : vector<16x1xf32>
      %185 = math.exp %184 : vector<16x1xf32>
      %186 = vector.broadcast %183 : vector<16x1xf32> to vector<16x16xf32>
      %187 = arith.subf %180, %186 : vector<16x16xf32>
      %188 = math.exp %187 : vector<16x16xf32>
      %189 = arith.mulf %185, %arg10 : vector<16x1xf32>
      %cst_66 = arith.constant dense<0.000000e+00> : vector<16xf32>
      %190 = vector.multi_reduction <add>, %188, %cst_66 [1] : vector<16x16xf32> to vector<16xf32>
      %191 = vector.shape_cast %190 : vector<16xf32> to vector<16x1xf32>
      %192 = arith.addf %189, %191 : vector<16x1xf32>
      %193 = vector.broadcast %185 : vector<16x1xf32> to vector<16x128xf32>
      %194 = arith.mulf %193, %arg11 : vector<16x128xf32>
      %cst_67 = arith.constant dense<0.000000e+00> : vector<16x128xf32>
      %195 = tpu.matmul %188, %179, %cst_67 {dimension_numbers = #tpu.dot_dimension_numbers<[1], [0], [0], [1], [0, 0, 1, 1], [], []>} : vector<16x16xf32>, vector<16x128xf32>, vector<16x128xf32> -> vector<16x128xf32>
      %196 = arith.addf %194, %195 : vector<16x128xf32>
      scf.yield %183, %192, %196 : vector<16x1xf32>, vector<16x1xf32>, vector<16x128xf32>
    }
    %c16_i32_35 = arith.constant 16 : i32
    %100 = arith.muli %arg1, %c16_i32_35 : i32
    %101 = tpu.assume_multiple %100, 16 : i32
    %102 = arith.index_cast %101 : i32 to index
    %c768 = arith.constant 768 : index
    %103 = vector.load %arg7[%102, %c768] : memref<16x1536xf32, #tpu.memory_space<vmem>>, vector<16x128xf32>
    %104 = arith.index_cast %101 : i32 to index
    %c1280 = arith.constant 1280 : index
    %105 = vector.load %arg7[%104, %c1280] : memref<16x1536xf32, #tpu.memory_space<vmem>>, vector<16x128xf32>
    %cst_36 = arith.constant dense<0.000000e+00> : vector<16x16xf32>
    %106 = tpu.matmul %93, %103, %cst_36 {dimension_numbers = #tpu.dot_dimension_numbers<[1], [1], [0], [0], [0, 0, 1, 0], [], []>} : vector<16x128xf32>, vector<16x128xf32>, vector<16x16xf32> -> vector<16x16xf32>
    %cst_37 = arith.constant -1.000000e+30 : f32
    %107 = vector.broadcast %cst_37 : f32 to vector<16x16xf32>
    %108 = arith.select %11, %107, %106 : vector<16x16xi1>, vector<16x16xf32>
    %cst_38 = arith.constant dense<0xFF800000> : vector<16xf32>
    %109 = vector.multi_reduction <maximumf>, %108, %cst_38 [1] : vector<16x16xf32> to vector<16xf32>
    %110 = vector.shape_cast %109 : vector<16xf32> to vector<16x1xf32>
    %111 = arith.maximumf %99#0, %110 : vector<16x1xf32>
    %112 = arith.subf %99#0, %111 : vector<16x1xf32>
    %113 = math.exp %112 : vector<16x1xf32>
    %114 = vector.broadcast %111 : vector<16x1xf32> to vector<16x16xf32>
    %115 = arith.subf %108, %114 : vector<16x16xf32>
    %116 = math.exp %115 : vector<16x16xf32>
    %117 = arith.mulf %113, %99#1 : vector<16x1xf32>
    %cst_39 = arith.constant dense<0.000000e+00> : vector<16xf32>
    %118 = vector.multi_reduction <add>, %116, %cst_39 [1] : vector<16x16xf32> to vector<16xf32>
    %119 = vector.shape_cast %118 : vector<16xf32> to vector<16x1xf32>
    %120 = arith.addf %117, %119 : vector<16x1xf32>
    %121 = vector.broadcast %113 : vector<16x1xf32> to vector<16x128xf32>
    %122 = arith.mulf %121, %99#2 : vector<16x128xf32>
    %cst_40 = arith.constant dense<0.000000e+00> : vector<16x128xf32>
    %123 = tpu.matmul %116, %105, %cst_40 {dimension_numbers = #tpu.dot_dimension_numbers<[1], [0], [0], [1], [0, 0, 1, 1], [], []>} : vector<16x16xf32>, vector<16x128xf32>, vector<16x128xf32> -> vector<16x128xf32>
    %124 = arith.addf %122, %123 : vector<16x128xf32>
    %cst_41 = arith.constant 1.000000e+00 : f32
    %125 = vector.broadcast %cst_41 : f32 to vector<16x1xf32>
    %126 = arith.divf %125, %120 : vector<16x1xf32>
    %127 = vector.broadcast %126 : vector<16x1xf32> to vector<16x128xf32>
    %128 = arith.mulf %124, %127 : vector<16x128xf32>
    %c256 = arith.constant 256 : index
    %c0_42 = arith.constant 0 : index
    %129 = vector.load %arg4[%c256, %c0_42] : memref<512x64xf32, #tpu.memory_space<vmem>>, vector<128x64xf32>
    %cst_43 = arith.constant dense<0.000000e+00> : vector<16x64xf32>
    %130 = tpu.matmul %128, %129, %cst_43 {dimension_numbers = #tpu.dot_dimension_numbers<[1], [0], [0], [1], [0, 0, 1, 1], [], []>} : vector<16x128xf32>, vector<128x64xf32>, vector<16x64xf32> -> vector<16x64xf32>
    %131 = arith.addf %92, %130 : vector<16x64xf32>
    %132 = vector.extract_strided_slice %6 {offsets = [0, 384], sizes = [16, 128], strides = [1, 1]} : vector<16x512xf32> to vector<16x128xf32>
    %cst_44 = arith.constant -1.000000e+30 : f32
    %133 = vector.broadcast %cst_44 : f32 to vector<16x1xf32>
    %cst_45 = arith.constant 0.000000e+00 : f32
    %134 = vector.broadcast %cst_45 : f32 to vector<16x1xf32>
    %cst_46 = arith.constant 0.000000e+00 : f32
    %135 = vector.broadcast %cst_46 : f32 to vector<16x128xf32>
    %c0_i32_47 = arith.constant 0 : i32
    %136 = arith.subi %arg1, %c0_i32_47 : i32
    %137 = arith.addi %c0_i32_47, %136 : i32
    %c1_i32_48 = arith.constant 1 : i32
    %138:3 = scf.for %arg8 = %c0_i32_47 to %137 step %c1_i32_48 iter_args(%arg9 = %133, %arg10 = %134, %arg11 = %135) -> (vector<16x1xf32>, vector<16x1xf32>, vector<16x128xf32>)  : i32 {
      %c16_i32_61 = arith.constant 16 : i32
      %174 = arith.muli %arg8, %c16_i32_61 : i32
      %175 = tpu.assume_multiple %174, 16 : i32
      %176 = arith.index_cast %175 : i32 to index
      %c896_62 = arith.constant 896 : index
      %177 = vector.load %arg7[%176, %c896_62] : memref<16x1536xf32, #tpu.memory_space<vmem>>, vector<16x128xf32>
      %178 = arith.index_cast %175 : i32 to index
      %c1408_63 = arith.constant 1408 : index
      %179 = vector.load %arg7[%178, %c1408_63] : memref<16x1536xf32, #tpu.memory_space<vmem>>, vector<16x128xf32>
      %cst_64 = arith.constant dense<0.000000e+00> : vector<16x16xf32>
      %180 = tpu.matmul %132, %177, %cst_64 {dimension_numbers = #tpu.dot_dimension_numbers<[1], [1], [0], [0], [0, 0, 1, 0], [], []>} : vector<16x128xf32>, vector<16x128xf32>, vector<16x16xf32> -> vector<16x16xf32>
      %cst_65 = arith.constant dense<0xFF800000> : vector<16xf32>
      %181 = vector.multi_reduction <maximumf>, %180, %cst_65 [1] : vector<16x16xf32> to vector<16xf32>
      %182 = vector.shape_cast %181 : vector<16xf32> to vector<16x1xf32>
      %183 = arith.maximumf %arg9, %182 : vector<16x1xf32>
      %184 = arith.subf %arg9, %183 : vector<16x1xf32>
      %185 = math.exp %184 : vector<16x1xf32>
      %186 = vector.broadcast %183 : vector<16x1xf32> to vector<16x16xf32>
      %187 = arith.subf %180, %186 : vector<16x16xf32>
      %188 = math.exp %187 : vector<16x16xf32>
      %189 = arith.mulf %185, %arg10 : vector<16x1xf32>
      %cst_66 = arith.constant dense<0.000000e+00> : vector<16xf32>
      %190 = vector.multi_reduction <add>, %188, %cst_66 [1] : vector<16x16xf32> to vector<16xf32>
      %191 = vector.shape_cast %190 : vector<16xf32> to vector<16x1xf32>
      %192 = arith.addf %189, %191 : vector<16x1xf32>
      %193 = vector.broadcast %185 : vector<16x1xf32> to vector<16x128xf32>
      %194 = arith.mulf %193, %arg11 : vector<16x128xf32>
      %cst_67 = arith.constant dense<0.000000e+00> : vector<16x128xf32>
      %195 = tpu.matmul %188, %179, %cst_67 {dimension_numbers = #tpu.dot_dimension_numbers<[1], [0], [0], [1], [0, 0, 1, 1], [], []>} : vector<16x16xf32>, vector<16x128xf32>, vector<16x128xf32> -> vector<16x128xf32>
      %196 = arith.addf %194, %195 : vector<16x128xf32>
      scf.yield %183, %192, %196 : vector<16x1xf32>, vector<16x1xf32>, vector<16x128xf32>
    }
    %c16_i32_49 = arith.constant 16 : i32
    %139 = arith.muli %arg1, %c16_i32_49 : i32
    %140 = tpu.assume_multiple %139, 16 : i32
    %141 = arith.index_cast %140 : i32 to index
    %c896 = arith.constant 896 : index
    %142 = vector.load %arg7[%141, %c896] : memref<16x1536xf32, #tpu.memory_space<vmem>>, vector<16x128xf32>
    %143 = arith.index_cast %140 : i32 to index
    %c1408 = arith.constant 1408 : index
    %144 = vector.load %arg7[%143, %c1408] : memref<16x1536xf32, #tpu.memory_space<vmem>>, vector<16x128xf32>
    %cst_50 = arith.constant dense<0.000000e+00> : vector<16x16xf32>
    %145 = tpu.matmul %132, %142, %cst_50 {dimension_numbers = #tpu.dot_dimension_numbers<[1], [1], [0], [0], [0, 0, 1, 0], [], []>} : vector<16x128xf32>, vector<16x128xf32>, vector<16x16xf32> -> vector<16x16xf32>
    %cst_51 = arith.constant -1.000000e+30 : f32
    %146 = vector.broadcast %cst_51 : f32 to vector<16x16xf32>
    %147 = arith.select %11, %146, %145 : vector<16x16xi1>, vector<16x16xf32>
    %cst_52 = arith.constant dense<0xFF800000> : vector<16xf32>
    %148 = vector.multi_reduction <maximumf>, %147, %cst_52 [1] : vector<16x16xf32> to vector<16xf32>
    %149 = vector.shape_cast %148 : vector<16xf32> to vector<16x1xf32>
    %150 = arith.maximumf %138#0, %149 : vector<16x1xf32>
    %151 = arith.subf %138#0, %150 : vector<16x1xf32>
    %152 = math.exp %151 : vector<16x1xf32>
    %153 = vector.broadcast %150 : vector<16x1xf32> to vector<16x16xf32>
    %154 = arith.subf %147, %153 : vector<16x16xf32>
    %155 = math.exp %154 : vector<16x16xf32>
    %156 = arith.mulf %152, %138#1 : vector<16x1xf32>
    %cst_53 = arith.constant dense<0.000000e+00> : vector<16xf32>
    %157 = vector.multi_reduction <add>, %155, %cst_53 [1] : vector<16x16xf32> to vector<16xf32>
    %158 = vector.shape_cast %157 : vector<16xf32> to vector<16x1xf32>
    %159 = arith.addf %156, %158 : vector<16x1xf32>
    %160 = vector.broadcast %152 : vector<16x1xf32> to vector<16x128xf32>
    %161 = arith.mulf %160, %138#2 : vector<16x128xf32>
    %cst_54 = arith.constant dense<0.000000e+00> : vector<16x128xf32>
    %162 = tpu.matmul %155, %144, %cst_54 {dimension_numbers = #tpu.dot_dimension_numbers<[1], [0], [0], [1], [0, 0, 1, 1], [], []>} : vector<16x16xf32>, vector<16x128xf32>, vector<16x128xf32> -> vector<16x128xf32>
    %163 = arith.addf %161, %162 : vector<16x128xf32>
    %cst_55 = arith.constant 1.000000e+00 : f32
    %164 = vector.broadcast %cst_55 : f32 to vector<16x1xf32>
    %165 = arith.divf %164, %159 : vector<16x1xf32>
    %166 = vector.broadcast %165 : vector<16x1xf32> to vector<16x128xf32>
    %167 = arith.mulf %163, %166 : vector<16x128xf32>
    %c384 = arith.constant 384 : index
    %c0_56 = arith.constant 0 : index
    %168 = vector.load %arg4[%c384, %c0_56] : memref<512x64xf32, #tpu.memory_space<vmem>>, vector<128x64xf32>
    %cst_57 = arith.constant dense<0.000000e+00> : vector<16x64xf32>
    %169 = tpu.matmul %167, %168, %cst_57 {dimension_numbers = #tpu.dot_dimension_numbers<[1], [0], [0], [1], [0, 0, 1, 1], [], []>} : vector<16x128xf32>, vector<128x64xf32>, vector<16x64xf32> -> vector<16x64xf32>
    %170 = arith.addf %131, %169 : vector<16x64xf32>
    %c0_58 = arith.constant 0 : index
    %c0_59 = arith.constant 0 : index
    %c0_60 = arith.constant 0 : index
    %171 = vector.load %arg6[%c0_58, %c0_59, %c0_60] : memref<1x16x64xf32, #tpu.memory_space<vmem>>, vector<1x16x64xf32>
    %172 = vector.shape_cast %171 : vector<1x16x64xf32> to vector<16x64xf32>
    %173 = vector.shape_cast %170 : vector<16x64xf32> to vector<1x16x64xf32>
    tpu.vector_store %arg6[%c0_58, %c0_59, %c0_60], %173 {strides = array<i32>} : memref<1x16x64xf32, #tpu.memory_space<vmem>>, vector<1x16x64xf32>,
    return
  }
  func.func @transform_0(%arg0: i32, %arg1: i32) -> (i32, i32, i32) {
    %c0_i32 = arith.constant 0 : i32
    %c0_i32_0 = arith.constant 0 : i32
    %c0_i32_1 = arith.constant 0 : i32
    return %arg0, %c0_i32, %c0_i32_0 : i32, i32, i32
  }
  func.func @transform_1(%arg0: i32, %arg1: i32) -> (i32, i32) {
    %c0_i32 = arith.constant 0 : i32
    %c0_i32_0 = arith.constant 0 : i32
    %c0_i32_1 = arith.constant 0 : i32
    return %c0_i32, %c0_i32_0 : i32, i32
  }
  func.func @transform_2(%arg0: i32, %arg1: i32) -> (i32, i32) {
    %c0_i32 = arith.constant 0 : i32
    %c0_i32_0 = arith.constant 0 : i32
    %c0_i32_1 = arith.constant 0 : i32
    return %c0_i32, %c0_i32_0 : i32, i32
  }
  func.func @transform_3(%arg0: i32, %arg1: i32) -> (i32, i32) {
    %c0_i32 = arith.constant 0 : i32
    %c0_i32_0 = arith.constant 0 : i32
    %c0_i32_1 = arith.constant 0 : i32
    return %c0_i32, %c0_i32_0 : i32, i32
  }
  func.func @transform_4(%arg0: i32, %arg1: i32) -> (i32, i32, i32) {
    %c0_i32 = arith.constant 0 : i32
    %c0_i32_0 = arith.constant 0 : i32
    return %arg0, %arg1, %c0_i32 : i32, i32, i32
  }
}

</mosaic_0001>

<bundles_post_ra>
// kernel: tpu_custom_call.1
= control target key start
LH: loop header
LB: loop body
LE: loop exit
PB: predicated region body
PF: predicated region fallthrough
CT: control target
= control target key end

     0   :  { %s4578_s0 = inlined_call_operand.hbm [shape: f32[2,16,32], index: 0, kind: input, shape index: {}]   ;;  %s4579_s1 = inlined_call_operand.hbm [shape: f32[32,1536], index: 1, kind: input, shape index: {}]   ;;  %s4580_s2 = inlined_call_operand.hbm [shape: f32[512,64], index: 2, kind: input, shape index: {}]   ;;  %s4581_s3 = inlined_call_operand.hbm [shape: f32[1,64], index: 3, kind: input, shape index: {}]   ;;  %s4582_s4 = inlined_call_operand.hbm [shape: f32[2,16,64], index: 4, kind: output, shape index: {}]  }
   0x1   :  { %4587 = sst [smem:[#allocation16_spill]] %s4579_s1 }
   0x2   :  { %9 = vsyncpa [#allocation4], 0 }
   0x3   :  { %11 = vsyncpa [#allocation4 + $0x1], 0 }
   0x4   :  { %12 = vsyncpa [#allocation7], 0 }
   0x5   :  { %13 = vsyncpa [#allocation10], 0 }
   0x6   :  { %14 = vsyncpa [#allocation5], 0 }
   0x7   :  { %16 = vsyncpa [#allocation5 + $0x1], 0  ;;  %s4086_s15 = smov 0   ;;  %s4088_s16 = smov 0  }
   0x8   :  { %s4090_s17 = smov 0   ;;  %s4092_s18 = smov 0  }
   0x9   :  { %s4094_s19 = smov 0   ;;  %s4096_s20 = smov 0  }
   0xa LB: > { %s3115_s21 = sadd.s32 4294967295, %s4047_s20   ;;  %s3116_s22 = sadd.s32 4294967294, %s4047_s20   ;;  %s4047_s20 = sphi %s4096_s20, %s22_s20   ;;  %s4043_s19 = sphi %s4094_s19, %s4609_s19   ;;  %s4039_s18 = sphi %s4092_s18, %s4608_s18   ;;  %s4035_s17 = sphi %s4090_s17, %s4607_s17   ;;  %s4031_s16 = sphi %s4088_s16, %s4606_s16   ;;  %s4027_s15 = sphi %s4086_s15, %s4605_s15  }
   0xb   : > { %p54_p0 = scmp.ne.s32.totalorder %s4031_s16, %s4027_s15  ;;  %p4120_p1 = scmp.eq.s32.totalorder %s3115_s21, 0 }
   0xc   : > { %p4124_p2 = scmp.eq.s32.totalorder %s3115_s21, 1  ;;  %p149_p3 = scmp.eq.s32.totalorder %s3116_s22, 1 }
   0xd   : > { %s4588_s23 = scalar_select %p4120_p1, 1, 0 }
   0xe   : > { %s4589_s24 = scalar_select %p4124_p2, 1, 0 }
   0xf   : > { %p4130_p4 = por %p4120_p1, %p54_p0  ;;  %p3117_p5 = scmp.ge.s32.totalorder %s4047_s20, 1 }
  0x10   : > { %p4135_p6 = por %p149_p3, %p54_p0  ;;  %p156_p7 = scmp.lt.s32.totalorder %s4047_s20, 3 }
  0x11   : > { %s4590_s25 = scalar_select %p4130_p4, 1, 0 }
  0x12   : > { %s4591_s26 = scalar_select %p4135_p6, 1, 0 }
  0x13   : > { %p4140_p8 = pnand %p3117_p5, %p156_p7  ;;  %s4049_s28 = smov [#allocation6]  }
  0x14   : > { %s168_s29 = sshll.u32 %s4049_s28, 4  ;;  %s4050_s5 = smov [#allocation8]   ;;  %s4144_s29 = int_to_ptr.vmem [resolvable:$true] %s168_s29 }
  0x15   : > { %s4592_s27 = scalar_select %p4140_p8, 1, 0 }
  0x16   : > { %p3711_p9 = pneg %p4140_p8  ;;  %s181_s6 = sshll.u32 %s4050_s5, 4  ;;  %s4155_s6 = int_to_ptr.vmem [resolvable:$true] %s181_s6 }
  0x17   : > { %s4594_s1 = sld [smem:[#allocation16_spill]] }
  0x18   : > { %p4151_p11 = pnand %p3711_p9, %p4120_p1 }
  0x1a   : > { %p4165_p13 = pneg %p4151_p11 }
  0x1d   : > { %s3843_s9 = scalar_lea.hbm %s4594_s1, 6144 }
  0x1e   : > { %p3844_p12 = scmp.ne.s32.totalorder %s4594_s1, %s3843_s9  ;;  %p3850_p5 = scmp.lt.u32.totalorder %s3843_s9, %s4594_s1 }
  0x20   : > { %p3846_p0 = pnand %p4165_p13, %p3844_p12 }
  0x22   : > { %p3847_p3 = pneg %p3846_p0 }
  0x24   : > { %p3852_p7 = pnand %p3850_p5, %p3847_p3 }
  0x26   : > { %3855 = shalt.err (!%p3852_p7)
}
  0x27   : > { %s3856_s21 = scalar_lea.vmem %s4144_s29, 6144  ;;  %p3864_p1 = scmp.lt.s32.totalorder %s4144_s29, %s4144_s29 }
  0x28   : > { %p3857_p9 = scmp.ne.s32.totalorder %s4144_s29, %s3856_s21  ;;  %p3865_p4 = scmp.lt.s32.totalorder %s3856_s21, %s3856_s21 }
  0x2a   : > { %p3859_p10 = pnand %p3857_p9, %p4165_p13  ;;  %p3866_p12 = por %p3865_p4, %p3864_p1 }
  0x2c   : > { %p3860_p6 = pneg %p3859_p10 }
  0x2e   : > { %p3867_p0 = pnand %p3866_p12, %p3860_p6 }
  0x30   : > { %3870 = shalt.err (!%p3867_p0)
}
  0x31   : > { %s4051_s22 = smov 1536   ;;  %s4052_s28 = smov 96  }
  0x32   : > { %3714 = dma.hbm_to_vmem [thread:$0]  (!%p4151_p11), %s4594_s1, 6144, %s4144_s29, [#allocation7], %s4051_s22, %s4051_s22, %s4052_s28  }
  0x33   : > { %s3871_s10 = scalar_lea.hbm %s4580_s2, 8192 }
  0x34   : > { %p3872_p1 = scmp.ne.s32.totalorder %s4580_s2, %s3871_s10  ;;  %p3878_p10 = scmp.lt.u32.totalorder %s3871_s10, %s4580_s2 }
  0x36   : > { %p3874_p4 = pnand %p3872_p1, %p4165_p13 }
  0x38   : > { %p3875_p6 = pneg %p3874_p4 }
  0x3a   : > { %p3880_p3 = pnand %p3878_p10, %p3875_p6 }
  0x3c   : > { %3883 = shalt.err (!%p3880_p3)
}
  0x3d   : > { %s3884_s29 = scalar_lea.vmem %s4155_s6, 8192  ;;  %p3892_p12 = scmp.lt.s32.totalorder %s4155_s6, %s4155_s6 }
  0x3e   : > { %p3885_p5 = scmp.ne.s32.totalorder %s4155_s6, %s3884_s29  ;;  %p3893_p0 = scmp.lt.s32.totalorder %s3884_s29, %s3884_s29 }
  0x40   : > { %p3887_p7 = pnand %p3885_p5, %p4165_p13  ;;  %p3894_p1 = por %p3893_p0, %p3892_p12 }
  0x42   : > { %p3888_p9 = pneg %p3887_p7 }
  0x44   : > { %p3895_p4 = pnand %p3894_p1, %p3888_p9 }
  0x46   : > { %3898 = shalt.err (!%p3895_p4)
}
  0x47   : > { %s4053_s22 = smov 128   ;;  %s4054_s28 = smov 8  }
  0x48   : > { %3717 = dma.hbm_to_vmem [thread:$0]  (!%p4151_p11), %s4580_s2, 8192, %s4155_s6, [#allocation7], %s4053_s22, %s4053_s22, %s4054_s28  }
  0x49   : > { %s4055_s8 = smov [#allocation9]   ;;  %s3899_s13 = scalar_lea.hbm %s4581_s3, 16 }
  0x4a   : > { %s195_s9 = sshll.u32 %s4055_s8, 4  ;;  %p3900_p6 = scmp.ne.s32.totalorder %s4581_s3, %s3899_s13  ;;  %s196_s9 = int_to_ptr.vmem [resolvable:$true] %s195_s9 }
  0x4b   : > { %p3906_p5 = scmp.lt.u32.totalorder %s3899_s13, %s4581_s3 }
  0x4c   : > { %p3902_p10 = pnand %p3900_p6, %p4165_p13 }
  0x4e   : > { %p3903_p3 = pneg %p3902_p10 }
  0x50   : > { %p3908_p7 = pnand %p3906_p5, %p3903_p3 }
  0x52   : > { %3911 = shalt.err (!%p3908_p7)
}
  0x53   : > { %s3912_s6 = scalar_lea.vmem %s196_s9, 16  ;;  %s3919_s5 = scalar_lea.vmem %s196_s9, 32 }
  0x54   : > { %p3913_p9 = scmp.ne.s32.totalorder %s196_s9, %s3912_s6  ;;  %p3920_p1 = scmp.lt.s32.totalorder %s196_s9, %s196_s9 }
  0x55   : > { %p3921_p4 = scmp.lt.s32.totalorder %s3919_s5, %s3912_s6 }
  0x56   : > { %p3915_p12 = pnand %p3913_p9, %p4165_p13 }
  0x57   : > { %p3922_p8 = por %p3921_p4, %p3920_p1 }
  0x58   : > { %p3916_p0 = pneg %p3915_p12 }
  0x5a   : > { %p3923_p2 = pnand %p3922_p8, %p3916_p0 }
  0x5c   : > { %3926 = shalt.err (!%p3923_p2)
}
  0x5d   : > { %3720 = dma.hbm_to_vmem [thread:$0]  (!%p4151_p11), %s4581_s3, 16, %s196_s9, [#allocation10]  }
  0x5e   : > { %s34_s1 = sadd.s32 1, %s4043_s19  ;;  %s41_s12 = sadd.s32 1, %s4035_s17 }
  0x5f   : > { %p36_p8 = scmp.ge.s32.totalorder %s34_s1, 2  ;;  %p48_p2 = scmp.ne.s32.totalorder %s4035_s17, %s4031_s16 }
  0x60   : > { %p49_p13 = scmp.eq.s32.totalorder %s4047_s20, 0  ;;  %p4597_p10 = scmp.ne.s32.totalorder %s4589_s24, 0 }
  0x61   : > { %s4611_s1 = smov (%p36_p8, %s34_s1), 0  ;;  %p3732_p11 = scmp.lt.s32.totalorder %s4047_s20, 2 }
  0x62   : > { %p4237_p6 = por %p49_p13, %p48_p2  ;;  %p4243_p3 = por %p4597_p10, %p48_p2 }
  0x63   : > { %s38_s11 = ssub.s32 %s4043_s19, %s4611_s1  ;;  %s206_s9 = sand.u32 1, %s4035_s17  }
  0x64   : > { %p39_p5 = scmp.eq.s32.totalorder %s38_s11, 0  ;;  %s3122_s13 = sshll.u32 %s206_s9, 4 }
  0x65   : > { %s3173_s21 = sshll.u32 %s4043_s19, 8  ;;  %s210_s24 = scalar_lea.vmem [#allocation3], %s3122_s13 }
  0x66   : > { %s4252_s14 = scalar_select %p39_p5, %s4035_s17, %s41_s12  }
  0x67   : > { %s4258_s5 = scalar_lea.hbm %s4578_s0, %s3173_s21  ;;  %s217_s7 = sshll.u32 %s210_s24, 4  ;;  %s4260_s7 = int_to_ptr.vmem [resolvable:$true] %s217_s7 }
  0x68   : > { %p4264_p7 = pnand %p3732_p11, %p4237_p6  ;;  %s4268_s12 = scalar_lea.sflag [#allocation4], %s206_s9 }
  0x69   : > { %s3927_s11 = scalar_lea.hbm %s4258_s5, 256  ;;  %s3932_s30 = scalar_lea.hbm %s4578_s0, 512 }
  0x6a   : > { %p3928_p9 = scmp.ne.s32.totalorder %s4258_s5, %s3927_s11  ;;  %p3929_p12 = pneg %p4264_p7 }
  0x6b   : > { %p3933_p4 = scmp.lt.u32.totalorder %s4258_s5, %s4578_s0  ;;  %p3934_p8 = scmp.lt.u32.totalorder %s3932_s30, %s3927_s11 }
  0x6c   : > { %p3930_p0 = pnand %p3929_p12, %p3928_p9  ;;  %p3936_p13 = scmp.lt.u32.totalorder %s3927_s11, %s4258_s5 }
  0x6d   : > { %p3935_p2 = por %p3934_p8, %p3933_p4 }
  0x6e   : > { %p3931_p1 = pneg %p3930_p0 }
  0x6f   : > { %p3937_p6 = por %p3936_p13, %p3935_p2 }
  0x71   : > { %p3938_p10 = pnand %p3937_p6, %p3931_p1 }
  0x73   : > { %3941 = shalt.err (!%p3938_p10)
}
  0x74   : > { %s3942_s9 = scalar_lea.vmem %s4260_s7, 256  ;;  %s4056_s24 = smov [#allocation3]  }
  0x75   : > { %p3943_p11 = scmp.ne.s32.totalorder %s4260_s7, %s3942_s9  ;;  %s3947_s13 = sshll.u32 %s4056_s24, 4  ;;  %s3948_s13 = int_to_ptr.vmem [resolvable:$false] %s3947_s13 }
  0x76   : > { %s3949_s21 = scalar_lea.vmem %s3948_s13, 512  ;;  %p3950_p0 = scmp.lt.s32.totalorder %s4260_s7, %s3948_s13 }
  0x77   : > { %p3945_p5 = pnand %p3943_p11, %p3929_p12  ;;  %p3951_p4 = scmp.lt.s32.totalorder %s3949_s21, %s3942_s9 }
  0x79   : > { %p3946_p9 = pneg %p3945_p5  ;;  %p3952_p8 = por %p3951_p4, %p3950_p0 }
  0x7b   : > { %p3953_p2 = pnand %p3952_p8, %p3946_p9 }
  0x7d   : > { %3956 = shalt.err (!%p3953_p2)
}
  0x7e   : > { %3724 = dma.hbm_to_vmem [thread:$0]  (!%p4264_p7), %s4258_s5, 256, %s4260_s7, %s4268_s12, %s4053_s22, %s4053_s22, %s4054_s28  }
  0x7f   : > { %p4600_p12 = scmp.ne.s32.totalorder %s4592_s27, 0 }
  0x80   : > { %s4302_s11 = sand.u32 (!%p4600_p12), 1, %s4031_s16   ;;  %p4601_p1 = scmp.ne.s32.totalorder (!%p4600_p12), %s4590_s25, 0 }
  0x81   : > { %229 = sbr.rel (%p4600_p12) target bundleno = 2573 (0xa0d), region = 36  ;;  %s3126_s30 = sshll.u32 (!%p4600_p12), %s4302_s11, 4 }
  0x82   : > { %s232_s29 = scalar_lea.sflag (!%p4600_p12), [#allocation4], %s4302_s11  ;;  %s4308_s8 = scalar_lea.vmem (!%p4600_p12), [#allocation3], %s3126_s30 }
  0x88   : > { %4010 = dma.done.wait (%p4601_p1), %s232_s29, 256  }
  0x89   : > { %4012 = vsyncadd (%p4601_p1), %s232_s29, 4294967040  ;;  %p4602_p7 = scmp.ne.s32.totalorder %s4588_s23, 0 }
  0x8b   : > { %4014 = dma.done.wait (%p4602_p7), [#allocation7], 14336  }
  0x8c   : > { %4016 = vsyncadd (%p4602_p7), [#allocation7], 4294952960 }
  0x8d   : > { %4018 = dma.done.wait (%p4602_p7), [#allocation10], 16  }
  0x8e   : > { %4020 = vsyncadd (%p4602_p7), [#allocation10], 4294967280  ;;  %v4057_v0 = vmov 0.0   ;;  %v284_v1 = vld [vmem:[#allocation6 + $0x28] sm:$0xff]  ;;  %v283_v3 = vld [vmem:[#allocation6 + $0x20] sm:$0xff]  ;;  %vm327_vm0 = vcmask 261120  }
  0x8f   : > { %552 = vmatprep.mubr.f32.mxu0 %v4057_v0  ;;  %398 = vmatprep.mubr.f32.mxu1 %v4057_v0  ;;  %v296_v2 = vld [vmem:[#allocation6 + $0x88] sm:$0xff]  ;;  %v295_v5 = vld [vmem:[#allocation6 + $0x80] sm:$0xff]  ;;  %v282_v24 = vld [vmem:[#allocation6 + $0x18] sm:$0xff]  ;;  %vm1145_vm2 = vcmask 130048   ;;  %s271_s23 = scalar_lea.vmem [#allocation11], %s3126_s30  ;;  %s3178_s27 = sshll.u32 %s4039_s18, 8 }
  0x90   : > { %v3495_v4 = vpack.c.bf16 %v296_v2, %v284_v1  ;;  %v308_v6 = vld [vmem:[#allocation6 + $0xe8] sm:$0xff]  ;;  %v3497_v8 = vpack.c.bf16 %v295_v5, %v283_v3  ;;  %v307_v10 = vld [vmem:[#allocation6 + $0xe0] sm:$0xff]  ;;  %v294_v25 = vld [vmem:[#allocation6 + $0x78] sm:$0xff]  ;;  %s2900_s25 = sshll.u32 %s271_s23, 4  ;;  %vm2881_vm4 = vcmask 523264   ;;  %s4529_s5 = scalar_lea.hbm %s4582_s4, %s3178_s27  ;;  %s4524_s25 = int_to_ptr.vmem [resolvable:$true] %s2900_s25 }
  0x91   : > { %v320_v7 = vld [vmem:[#allocation6 + $0x148] sm:$0xff]  ;;  %v319_v11 = vld [vmem:[#allocation6 + $0x140] sm:$0xff]  ;;  %v3487_v28 = vpack.c.bf16 %v294_v25, %v282_v24  ;;  %v281_v29 = vld [vmem:[#allocation6 + $0x10] sm:$0xff]  ;;  %s2885_s18 = scalar_lea.sflag [#allocation5], %s4302_s11  ;;  %s3957_s7 = scalar_lea.vmem %s4524_s25, 256 }
  0x92   : > { %v3499_v9 = vpack.c.bf16 %v320_v7, %v308_v6  ;;  %3496 = vmatprep.subr.bf16.mxu0 %v3495_v4  ;;  %v280_v12 = vld [vmem:[#allocation6 + $0x8] sm:$0xff]  ;;  %v279_v14 = vld [vmem:[#allocation6] sm:$0xff]  ;;  %v3501_v15 = vpack.c.bf16 %v319_v11, %v307_v10  ;;  %v293_v30 = vld [vmem:[#allocation6 + $0x70] sm:$0xff]  ;;  %p3958_p13 = scmp.ne.s32.totalorder %s4524_s25, %s3957_s7  ;;  %s4058_s12 = smov [#allocation11]  }
  0x93   : > { %v292_v13 = vld [vmem:[#allocation6 + $0x68] sm:$0xff]  ;;  %3498 = vmatpush1.bf16.msra.mxu0 %v3497_v8  ;;  %v291_v17 = vld [vmem:[#allocation6 + $0x60] sm:$0xff]  ;;  %v306_v31 = vld [vmem:[#allocation6 + $0xd8] sm:$0xff]  ;;  %v3489_v34 = vpack.c.bf16 %v293_v30, %v281_v29  ;;  %s3961_s6 = sshll.u32 %s4058_s12, 4  ;;  %s3962_s6 = int_to_ptr.vmem [resolvable:$false] %s3961_s6 }
  0x94   : > { %v3479_v16 = vpack.c.bf16 %v292_v13, %v280_v12  ;;  %v304_v18 = vld [vmem:[#allocation6 + $0xc8] sm:$0xff]  ;;  %3500 = vmatprep.subr.bf16.mxu0 %v3499_v9  ;;  %v3481_v19 = vpack.c.bf16 %v291_v17, %v279_v14  ;;  %v303_v21 = vld [vmem:[#allocation6 + $0xc0] sm:$0xff]  ;;  %v318_v32 = vld [vmem:[#allocation6 + $0x138] sm:$0xff]  ;;  %p3959_p6 = pnand %p3958_p13, %p4243_p3  ;;  %s3963_s9 = scalar_lea.vmem %s3962_s6, 512 }
  0x95   : > { %v316_v20 = vld [vmem:[#allocation6 + $0x128] sm:$0xff]  ;;  %v315_v22 = vld [vmem:[#allocation6 + $0x120] sm:$0xff]  ;;  %v3491_v35 = vpack.c.bf16 %v318_v32, %v306_v31  ;;  %v305_v36 = vld [vmem:[#allocation6 + $0xd0] sm:$0xff]  ;;  %p3964_p11 = scmp.lt.s32.totalorder %s4524_s25, %s3962_s6  ;;  %p3965_p5 = scmp.lt.s32.totalorder %s3963_s9, %s3957_s7 }
  0x96   : > { %3480 = vmatprep.subr.bf16.mxu1 %v3479_v16  ;;  %v3483_v23 = vpack.c.bf16 %v316_v20, %v304_v18  ;;  %v3485_v26 = vpack.c.bf16 %v315_v22, %v303_v21  ;;  %v4325_v27 = vld [vmem:[%s4308_s8] sm:$0xff]  ;;  %v4331_v33 = vld [vmem:[%s4308_s8 + $0x8] sm:$0xff]  ;;  %p3960_p10 = pneg %p3959_p6 }
  0x97   : > { %3482 = vmatpush1.bf16.msra.mxu1 %v3481_v19  ;;  %3502 = vmatpush1.bf16.msra.mxu0 %v3501_v15  ;;  %v317_v37 = vld [vmem:[#allocation6 + $0x130] sm:$0xff]  ;;  %v286_v38 = vld [vmem:[#allocation6 + $0x38] sm:$0xff]  ;;  %v288_v63 = vld [vmem:[#allocation6 + $0x48] sm:$0xff]  ;;  %p3966_p9 = por %p3965_p5, %p3964_p11 }
  0x98   : > { %3484 = vmatprep.subr.bf16.mxu1 %v3483_v23  ;;  %v298_v39 = vld [vmem:[#allocation6 + $0x98] sm:$0xff]  ;;  %v3493_v40 = vpack.c.bf16 %v317_v37, %v305_v36  ;;  %v285_v42 = vld [vmem:[#allocation6 + $0x30] sm:$0xff]  ;;  %v300_v1 = vld [vmem:[#allocation6 + $0xa8] sm:$0xff]  ;;  %v837_v37 = vlaneseq }
  0x99   : > { %v3503_v41 = vpack.c.bf16 %v298_v39, %v286_v38  ;;  %v297_v43 = vld [vmem:[#allocation6 + $0x90] sm:$0xff]  ;;  %v310_v44 = vld [vmem:[#allocation6 + $0xf8] sm:$0xff]  ;;  %v287_v2 = vld [vmem:[#allocation6 + $0x40] sm:$0xff]  ;;  %v3511_v3 = vpack.c.bf16 %v300_v1, %v288_v63  ;;  %p3967_p0 = pnand %p3966_p9, %p3960_p10 }
  0x9a   : > { %3135 = vmatmul.mubr.msk.f32.vlgmr.msra.gmra.mrb[0].mxu0 %vm327_vm0, %v4325_v27  ;;  %v322_v45 = vld [vmem:[#allocation6 + $0x158] sm:$0xff]  ;;  %v3505_v46 = vpack.c.bf16 %v297_v43, %v285_v42  ;;  %v309_v48 = vld [vmem:[#allocation6 + $0xf0] sm:$0xff]  ;;  %v299_v4 = vld [vmem:[#allocation6 + $0xa0] sm:$0xff]  ;;  %v4386_v38 = vshrl.u32 %v837_v37, 7  ;;  %v4388_v39 = vand.u32 127, %v837_v37 }
  0x9b   : > { %3486 = vmatpush1.bf16.msra.mxu1 %v3485_v26  ;;  %558 = vmatprep.mubr.f32.mxu0 %v4057_v0  ;;  %v3507_v47 = vpack.c.bf16 %v322_v45, %v310_v44  ;;  %v321_v49 = vld [vmem:[#allocation6 + $0x150] sm:$0xff]  ;;  %v290_v50 = vld [vmem:[#allocation6 + $0x58] sm:$0xff]  ;;  %v312_v5 = vld [vmem:[#allocation6 + $0x108] sm:$0xff]  ;;  %v3513_v7 = vpack.c.bf16 %v299_v4, %v287_v2 }
  0x9c   : > { %3488 = vmatprep.subr.bf16.mxu1 %v3487_v28  ;;  %v302_v51 = vld [vmem:[#allocation6 + $0xb8] sm:$0xff]  ;;  %v3509_v52 = vpack.c.bf16 %v321_v49, %v309_v48  ;;  %v289_v54 = vld [vmem:[#allocation6 + $0x50] sm:$0xff]  ;;  %v324_v6 = vld [vmem:[#allocation6 + $0x168] sm:$0xff]  ;;  %3512 = vmatprep.subr.bf16.mxu0 %v3511_v3  ;;  %vm842_vm1 = vcmp.gt.s32.totalorder %v4388_v39, %v4386_v38 }
  0x9d   : > { %v3519_v53 = vpack.c.bf16 %v302_v51, %v290_v50  ;;  %v301_v55 = vld [vmem:[#allocation6 + $0xb0] sm:$0xff]  ;;  %v314_v56 = vld [vmem:[#allocation6 + $0x118] sm:$0xff]  ;;  %v3515_v8 = vpack.c.bf16 %v324_v6, %v312_v5  ;;  %v311_v9 = vld [vmem:[#allocation6 + $0x100] sm:$0xff]  ;;  %3514 = vmatpush1.bf16.msra.mxu0 %v3513_v7 }
  0x9e   : > { %3131 = vmatmul.mubr.msk.f32.vlgmr.msra.gmra.mrb[0].mxu1 %vm327_vm0, %v4325_v27  ;;  %3136 = vmatmul.mubr.msk.f32.gmra.mrb[2].mxu0 %vm327_vm0, %v4331_v33  ;;  %v326_v57 = vld [vmem:[#allocation6 + $0x178] sm:$0xff]  ;;  %v3521_v58 = vpack.c.bf16 %v301_v55, %v289_v54  ;;  %v313_v60 = vld [vmem:[#allocation6 + $0x110] sm:$0xff]  ;;  %v323_v10 = vld [vmem:[#allocation6 + $0x160] sm:$0xff] }
  0x9f   : > { %404 = vmatprep.mubr.f32.mxu1 %v4057_v0  ;;  %3490 = vmatpush1.bf16.msra.mxu1 %v3489_v34  ;;  %v3523_v59 = vpack.c.bf16 %v326_v57, %v314_v56  ;;  %v325_v61 = vld [vmem:[#allocation6 + $0x170] sm:$0xff]  ;;  %v3517_v11 = vpack.c.bf16 %v323_v10, %v311_v9  ;;  %v1268_v54 = vld [vmem:[#allocation8 + $0x8] sm:$0xff]  ;;  %v1270_v3 = vld [vmem:[#allocation8 + $0x18] sm:$0xff] }
  0xa0   : > { %706 = vmatprep.mubr.f32.mxu0 %v4057_v0  ;;  %3492 = vmatprep.subr.bf16.mxu1 %v3491_v35  ;;  %v3525_v62 = vpack.c.bf16 %v325_v61, %v313_v60  ;;  %v1269_v2 = vld [vmem:[#allocation8 + $0x10] sm:$0xff]  ;;  %v1271_v7 = vld [vmem:[#allocation8 + $0x20] sm:$0xff] }
  0xa1   : > { %3516 = vmatprep.subr.bf16.mxu0 %v3515_v8  ;;  %v3539_v5 = vpack.c.bf16 %v1270_v3, %v1269_v2  ;;  %v1272_v8 = vld [vmem:[#allocation8 + $0x28] sm:$0xff] }
  0xa2   : > { %3132 = vmatmul.mubr.msk.f32.gmra.mrb[2].mxu1 %vm327_vm0, %v4331_v33  ;;  %3518 = vmatpush1.bf16.msra.mxu0 %v3517_v11  ;;  %v3543_v10 = vpack.c.bf16 %v1272_v8, %v1271_v7  ;;  %v1273_v11 = vld [vmem:[#allocation8 + $0x30] sm:$0xff] }
  0xa3   : > { %475 = vmatprep.mubr.f32.mxu1 %v4057_v0  ;;  %3494 = vmatpush1.bf16.msra.mxu1 %v3493_v40  ;;  %v4391_v40 = vadd.s32 8, %v4386_v38 }
  0xa4   : > { %3504 = vmatprep.subr.bf16.mxu1 %v3503_v41 }
  0xa5   : > { %3139 = vmatmul.mubr.msk.f32.vlgmr.msra.gmra.mrb[4].mxu0 %vm327_vm0, %v4325_v27  ;;  %vm843_vm3 = vcmp.gt.s32.totalorder %v4388_v39, %v4391_v40  ;;  %v1780_v39 = vld [vmem:[#allocation8 + $0xb0] sm:$0xff] }
  0xa6   : > { %3133 = vmatmul.mubr.msk.f32.vlgmr.msra.gmra.mrb[4].mxu1 %vm327_vm0, %v4325_v27  ;;  %712 = vmatprep.mubr.f32.mxu0 %v4057_v0 }
  0xa7   : > { %3506 = vmatpush1.bf16.msra.mxu1 %v3505_v46  ;;  %481 = vmatprep.mubr.f32.mxu1 %v4057_v0 }
  0xa8   : > { %3508 = vmatprep.subr.bf16.mxu1 %v3507_v47 }
  0xa9   : > { %3140 = vmatmul.mubr.msk.f32.gmra.mrb[6].mxu0 %vm327_vm0, %v4331_v33 }
  0xaa   : > { %3134 = vmatmul.mubr.msk.f32.gmra.mrb[6].mxu1 %vm327_vm0, %v4331_v33 }
  0xab   : > { %3510 = vmatpush1.bf16.msra.mxu1 %v3509_v52  ;;  %629 = vmatprep.mubr.f32.mxu1 %v4057_v0 }
  0xac   : > { %3520 = vmatprep.subr.bf16.mxu1 %v3519_v53  ;;  %v1267_v53 = vld [vmem:[#allocation8] sm:$0xff] }
  0xad   : > { %v3535_v55 = vpack.c.bf16 %v1268_v54, %v1267_v53 }
  0xae   : > { %3137 = vmatmul.mubr.msk.f32.vlgmr.msra.gmra.mrb[8].mxu1 %vm327_vm0, %v4325_v27 }
  0xaf   : > { %635 = vmatprep.mubr.f32.mxu1 %v4057_v0  ;;  %3522 = vmatpush1.bf16.msra.mxu1 %v3521_v58 }
  0xb0   : > { %3524 = vmatprep.subr.bf16.mxu1 %v3523_v59 }
  0xb2   : > { %3138 = vmatmul.mubr.msk.f32.gmra.mrb[10].mxu1 %vm327_vm0, %v4331_v33 }
  0xb3   : > { %3526 = vmatpush1.bf16.msra.mxu1 %v3525_v62  ;;  %783 = vmatprep.mubr.f32.mxu1 %v4057_v0 }
  0xb6   : > { %3141 = vmatmul.mubr.msk.f32.vlgmr.msra.gmra.mrb[12].mxu1 %vm327_vm0, %v4325_v27 }
  0xb7   : > { %789 = vmatprep.mubr.f32.mxu1 %v4057_v0 }
  0xba   : > { %3142 = vmatmul.mubr.msk.f32.gmra.mrb[14].mxu1 %vm327_vm0, %v4331_v33 }
 0x16d   : > { %v554_v12 = vpop.f32.mrb[0].mxu0 }
 0x16e   : > { %v556_v13 = vpop.f32.mrb[1].mxu0 }
 0x171   : > { %v400_v14 = vpop.f32.mrb[0].mxu1  ;;  %v560_v15 = vpop.f32.mrb[2].mxu0 }
 0x172   : > { %v4364_v16 = vpop.f32.mrb[1].mxu1  ;;  %3287 = vmatprep.mubr.f32.mxu1 %v400_v14  ;;  %v3527_v17 = vpack.c.bf16 %v560_v15, %v554_v12  ;;  %v562_v18 = vpop.f32.mrb[3].mxu0  ;;  %v1274_v12 = vld [vmem:[#allocation8 + $0x38] sm:$0xff]  ;;  %v1275_v14 = vld [vmem:[#allocation8 + $0x40] sm:$0xff]  ;;  %v1276_v15 = vld [vmem:[#allocation8 + $0x48] sm:$0xff] }
 0x173   : > { %v4366_v19 = vpack.c.bf16 %v562_v18, %v556_v13  ;;  %v3547_v13 = vpack.c.bf16 %v1274_v12, %v1273_v11  ;;  %v1277_v18 = vld [vmem:[#allocation8 + $0x50] sm:$0xff] }
 0x174   : > { %3528 = vmatprep.subr.bf16.mxu1 %v3527_v17 }
 0x175   : > { %v406_v20 = vpop.f32.mrb[2].mxu1  ;;  %3530 = vmatpush3.bf16.xpose.msra.mxu1 %v3527_v17  ;;  %v3551_v17 = vpack.c.bf16 %v1276_v15, %v1275_v14 }
 0x176   : > { %v4368_v21 = vpop.f32.mrb[3].mxu1 }
 0x178   : > { %v708_v47 = vpop.f32.mrb[4].mxu0 }
 0x179   : > { %v4370_v0 = vpop.f32.mrb[4].mxu1  ;;  %v710_v48 = vpop.f32.mrb[5].mxu0 }
 0x17a   : > { %v4372_v22 = vpop.f32.mrb[5].mxu1 }
 0x17c   : > { %3288 = vmatmul.mubr.f32.vlgmr.msra.gmra.mrb[16].mxu1 %v406_v20  ;;  %v714_v49 = vpop.f32.mrb[6].mxu0  ;;  %v1278_v20 = vld [vmem:[#allocation8 + $0x58] sm:$0xff] }
 0x17d   : > { %v4374_v23 = vpop.f32.mrb[6].mxu1  ;;  %v3531_v50 = vpack.c.bf16 %v714_v49, %v708_v47  ;;  %v716_v51 = vpop.f32.mrb[7].mxu0 }
 0x17e   : > { %v4376_v24 = vpop.f32.mrb[7].mxu1  ;;  %v4405_v52 = vpack.c.bf16 %v716_v51, %v710_v48 }
 0x17f   : > { %3532 = vmatprep.subr.bf16.mxu1 %v3531_v50 }
 0x180   : > { %3534 = vmatpush3.bf16.msra.mxu1 %v3531_v50 }
 0x181   : > { %v631_v25 = vpop.f32.mrb[8].mxu1  ;;  %3536 = vmatprep.subr.bf16.mxu1 %v3535_v55 }
 0x182   : > { %v633_v26 = vpop.f32.mrb[9].mxu1 }
 0x185   : > { %v637_v27 = vpop.f32.mrb[10].mxu1 }
 0x186   : > { %v4378_v28 = vpack.c.bf16 %v637_v27, %v631_v25  ;;  %v639_v29 = vpop.f32.mrb[11].mxu1  ;;  %v3555_v25 = vpack.c.bf16 %v1278_v20, %v1277_v18  ;;  %v1280_v27 = vld [vmem:[#allocation8 + $0x68] sm:$0xff] }
 0x187   : > { %v4380_v30 = vpack.c.bf16 %v639_v29, %v633_v26  ;;  %v1279_v26 = vld [vmem:[#allocation8 + $0x60] sm:$0xff] }
 0x188   : > { %v3559_v29 = vpack.c.bf16 %v1280_v27, %v1279_v26 }
 0x189   : > { %v785_v31 = vpop.f32.mrb[12].mxu1 }
 0x18a   : > { %v787_v32 = vpop.f32.mrb[13].mxu1 }
 0x18d   : > { %v791_v33 = vpop.f32.mrb[14].mxu1 }
 0x18e   : > { %v4382_v34 = vpack.c.bf16 %v791_v33, %v785_v31  ;;  %v793_v35 = vpop.f32.mrb[15].mxu1  ;;  %v1281_v31 = vld [vmem:[#allocation8 + $0x70] sm:$0xff] }
 0x18f   : > { %v4384_v36 = vpack.c.bf16 %v793_v35, %v787_v32  ;;  %v1282_v32 = vld [vmem:[#allocation8 + $0x78] sm:$0xff] }
 0x190   : > { %v3563_v33 = vpack.c.bf16 %v1282_v32, %v1281_v31 }
 0x24f   : > { %v3289_v41 = vpop.f32.mrb[16].mxu1 }
 0x250   : > { %v1134_v42 = vpop.f32.mrb[17].mxu1  ;;  %v1144_v45 = vsel %vm843_vm3, -1e+30, %v3289_v41 }
 0x251   : > { %v1143_v43 = vsel %vm842_vm1, -1e+30, %v1134_v42  ;;  %v1149_v46 = vsel %vm1145_vm2, %v1144_v45, -inf }
 0x252   : > { %v1146_v44 = vsel %vm1145_vm2, %v1143_v43, -inf }
 0x253   : > { %1147 = vmax.xlane.f32.xlu0 %v1146_v44 }
 0x257   : > { %1150 = vmax.xlane.f32.xlu0 %v1149_v46 }
 0x2e0   : > { %v1148_v56 = vpop.xlane.xlu0 %1147 }
 0x2e1   : > { %v1152_v57 = vmax.f32 %v1148_v56, -1e+30 }
 0x2e3   : > { %v1160_v58 = vsub.f32 %v1143_v43, %v1152_v57  ;;  %v1154_v37 = vsub.f32 -1e+30, %v1152_v57 }
 0x2e4   : > { %v1151_v59 = vpop.xlane.xlu0 %1150 }
 0x2e5   : > { %v1162_v60 = vmul.f32 1.442695, %v1160_v58  ;;  %v1153_v61 = vmax.f32 %v1151_v59, -1e+30  ;;  %v1156_v42 = vmul.f32 1.442695, %v1154_v37 }
 0x2e7   : > { %v1161_v62 = vsub.f32 %v1144_v45, %v1153_v61  ;;  %3795 = vpow2.f32 %v1162_v60  ;;  %v1155_v35 = vsub.f32 -1e+30, %v1153_v61 }
 0x2e9   : > { %v1164_v63 = vmul.f32 1.442695, %v1161_v62  ;;  %v1158_v41 = vmul.f32 1.442695, %v1155_v35 }
 0x2eb   : > { %3797 = vpow2.f32 %v1164_v63 }
 0x2ec   : > { %3799 = vpow2.f32 %v1158_v41 }
 0x2ed   : > { %3801 = vpow2.f32 %v1156_v42 }
 0x2f1   : > { %v3796_v1 = vpop.eup %3795 }
 0x2f2   : > { %3294 = vmatprep.mubr.msk.f32.mxu1 %vm1145_vm2, %v3796_v1  ;;  %v1168_v4 = vsel %vm1145_vm2, %v3796_v1, 0.0 }
 0x2f3   : > { %1169 = vadd.xlane.f32.xlu1 %v1168_v4 }
 0x2f5   : > { %v3798_v6 = vpop.eup %3797 }
 0x2f6   : > { %3295 = vmatmul.mubr.msk.f32.vlgmr.msra.gmra.mrb[18].mxu1 %vm1145_vm2, %v3798_v6  ;;  %v1171_v9 = vsel %vm1145_vm2, %v3798_v6, 0.0  ;;  %v3800_v44 = vpop.eup %3799 }
 0x2f7   : > { %3538 = vmatpush3.bf16.msra.mxu1 %v3535_v55  ;;  %1172 = vadd.xlane.f32.xlu1 %v1171_v9  ;;  %v3802_v45 = vpop.eup %3801  ;;  %v1167_v47 = vmul.f32 0.0, %v3800_v44 }
 0x2f8   : > { %3540 = vmatprep.subr.bf16.mxu1 %v3539_v5  ;;  %v1166_v48 = vmul.f32 0.0, %v3802_v45 }
 0x2fb   : > { %3542 = vmatpush3.bf16.msra.mxu1 %v3539_v5 }
 0x2fc   : > { %3544 = vmatprep.subr.bf16.mxu1 %v3543_v10 }
 0x2ff   : > { %3546 = vmatpush3.bf16.msra.mxu1 %v3543_v10 }
 0x300   : > { %3548 = vmatprep.subr.bf16.mxu1 %v3547_v13 }
 0x303   : > { %3550 = vmatpush3.bf16.msra.mxu1 %v3547_v13 }
 0x304   : > { %3552 = vmatprep.subr.bf16.mxu1 %v3551_v17 }
 0x307   : > { %3554 = vmatpush3.bf16.msra.mxu1 %v3551_v17 }
 0x308   : > { %3556 = vmatprep.subr.bf16.mxu1 %v3555_v25 }
 0x30b   : > { %3558 = vmatpush3.bf16.msra.mxu1 %v3555_v25 }
 0x30c   : > { %3560 = vmatprep.subr.bf16.mxu1 %v3559_v29 }
 0x30f   : > { %3562 = vmatpush3.bf16.msra.mxu1 %v3559_v29 }
 0x310   : > { %3564 = vmatprep.subr.bf16.mxu1 %v3563_v33 }
 0x313   : > { %3566 = vmatpush3.bf16.msra.mxu1 %v3563_v33 }
 0x314   : > { %3568 = vmatprep.subr.bf16.mxu1 %v4366_v19 }
 0x380   : > { %v1170_v43 = vpop.xlane.xlu1 %1169 }
 0x381   : > { %v1174_v50 = vadd.f32 %v1170_v43, %v1166_v48 }
 0x384   : > { %v1173_v46 = vpop.xlane.xlu1 %1172 }
 0x385   : > { %v1175_v49 = vadd.f32 %v1173_v46, %v1167_v47 }
 0x387   : > { %3803 = vrcp.f32 %v1175_v49  ;;  %v1775_v49 = vld [vmem:[#allocation8 + $0x88] sm:$0xff] }
 0x388   : > { %3805 = vrcp.f32 %v1174_v50  ;;  %v1776_v50 = vld [vmem:[#allocation8 + $0x90] sm:$0xff] }
 0x391   : > { %v3804_v55 = vpop.eup %3803 }
 0x392   : > { %v3806_v57 = vpop.eup %3805 }
 0x3c9   : > { %v3296_v51 = vpop.f32.mrb[18].mxu1 }
 0x3ca   : > { %v1260_v53 = vadd.f32 %v3296_v51, %v1167_v47  ;;  %v1250_v54 = vpop.f32.mrb[19].mxu1 }
 0x3cb   : > { %v1259_v56 = vadd.f32 %v1250_v54, %v1166_v48  ;;  %v1774_v48 = vld [vmem:[#allocation8 + $0x80] sm:$0xff] }
 0x3cc   : > { %v1266_v58 = vmul.f32 %v3804_v55, %v1260_v53  ;;  %v3575_v51 = vpack.c.bf16 %v1775_v49, %v1774_v48  ;;  %v1777_v53 = vld [vmem:[#allocation8 + $0x98] sm:$0xff]  ;;  %v1778_v55 = vld [vmem:[#allocation8 + $0xa0] sm:$0xff] }
 0x3cd   : > { %v1265_v59 = vmul.f32 %v3806_v57, %v1259_v56  ;;  %v3579_v54 = vpack.c.bf16 %v1777_v53, %v1776_v50  ;;  %v1779_v56 = vld [vmem:[#allocation8 + $0xa8] sm:$0xff] }
 0x3ce   : > { %3576 = vmatprep.subr.bf16.mxu0 %v3575_v51 }
 0x3cf   : > { %3329 = vmatprep.mubr.f32.mxu1 %v1265_v59  ;;  %3578 = vmatpush3.bf16.msra.mxu0 %v3575_v51 }
 0x3d0   : > { %3330 = vmatmul.mubr.f32.vlgmr.msra.gmra.mrb[20].mxu1 %v1266_v58  ;;  %3580 = vmatprep.subr.bf16.mxu0 %v3579_v54 }
 0x3d1   : > { %3570 = vmatpush3.bf16.xpose.msra.mxu1 %v4366_v19  ;;  %3336 = vmatprep.mubr.f32.mxu1 %v4364_v16 }
 0x3d2   : > { %3572 = vmatprep.subr.bf16.mxu1 %v4405_v52 }
 0x3d3   : > { %3582 = vmatpush3.bf16.msra.mxu0 %v3579_v54 }
 0x3d8   : > { %3337 = vmatmul.mubr.f32.vlgmr.msra.gmra.mrb[22].mxu1 %v4368_v21 }
 0x3d9   : > { %3574 = vmatpush3.bf16.msra.mxu1 %v4405_v52 }
 0x3da   : > { %3608 = vmatprep.subr.bf16.mxu1 %v4378_v28 }
 0x4a3   : > { %v4418_v60 = vpop.f32.mrb[20].mxu1 }
 0x4a4   : > { %v4420_v61 = vpop.f32.mrb[21].mxu1 }
 0x4ab   : > { %v3338_v62 = vpop.f32.mrb[22].mxu1 }
 0x4ac   : > { %v1652_v63 = vsel %vm843_vm3, -1e+30, %v3338_v62  ;;  %v1642_v19 = vpop.f32.mrb[23].mxu1 }
 0x4ad   : > { %v1651_v16 = vsel %vm842_vm1, -1e+30, %v1642_v19  ;;  %v1656_v21 = vsel %vm1145_vm2, %v1652_v63, -inf }
 0x4ae   : > { %1657 = vmax.xlane.f32.xlu1 %v1656_v21  ;;  %v1653_v52 = vsel %vm1145_vm2, %v1651_v16, -inf }
 0x4af   : > { %1654 = vmax.xlane.f32.xlu0 %v1653_v52 }
 0x53b   : > { %v1658_v1 = vpop.xlane.xlu1 %1657 }
 0x53c   : > { %v1660_v2 = vmax.f32 %v1658_v1, -1e+30  ;;  %v1655_v3 = vpop.xlane.xlu0 %1654 }
 0x53d   : > { %v1659_v4 = vmax.f32 %v1655_v3, -1e+30 }
 0x53e   : > { %v1668_v5 = vsub.f32 %v1652_v63, %v1660_v2  ;;  %v1662_v11 = vsub.f32 -1e+30, %v1660_v2 }
 0x53f   : > { %v1667_v6 = vsub.f32 %v1651_v16, %v1659_v4  ;;  %v1661_v12 = vsub.f32 -1e+30, %v1659_v4 }
 0x540   : > { %v1671_v8 = vmul.f32 1.442695, %v1668_v5  ;;  %v1665_v13 = vmul.f32 1.442695, %v1662_v11  ;;  %v1781_v11 = vld [vmem:[#allocation8 + $0xb8] sm:$0xff] }
 0x541   : > { %v1669_v7 = vmul.f32 1.442695, %v1667_v6  ;;  %v1663_v14 = vmul.f32 1.442695, %v1661_v12  ;;  %v3587_v12 = vpack.c.bf16 %v1781_v11, %v1780_v39  ;;  %v2294_v39 = vld [vmem:[#allocation8 + $0x168] sm:$0xff] }
 0x543   : > { %3807 = vpow2.f32 %v1669_v7 }
 0x544   : > { %3809 = vpow2.f32 %v1671_v8 }
 0x545   : > { %3811 = vpow2.f32 %v1665_v13  ;;  %v1782_v13 = vld [vmem:[#allocation8 + $0xc0] sm:$0xff] }
 0x546   : > { %3813 = vpow2.f32 %v1663_v14  ;;  %v1783_v14 = vld [vmem:[#allocation8 + $0xc8] sm:$0xff] }
 0x54d   : > { %v4430_v9 = vpop.eup %3807 }
 0x54e   : > { %v4432_v10 = vpop.eup %3809  ;;  %3343 = vmatprep.mubr.msk.f32.mxu1 %vm1145_vm2, %v4430_v9  ;;  %v1675_v8 = vsel %vm1145_vm2, %v4430_v9, 0.0 }
 0x54f   : > { %3344 = vmatmul.mubr.msk.f32.vlgmr.msra.gmra.mrb[24].mxu1 %vm1145_vm2, %v4432_v10  ;;  %v3812_v15 = vpop.eup %3811  ;;  %v1678_v7 = vsel %vm1145_vm2, %v4432_v10, 0.0  ;;  %v1784_v10 = vld [vmem:[#allocation8 + $0xd0] sm:$0xff] }
 0x550   : > { %3610 = vmatpush3.bf16.xpose.msra.mxu1 %v4378_v28  ;;  %3385 = vmatprep.mubr.f32.mxu1 %v4370_v0  ;;  %v3814_v17 = vpop.eup %3813  ;;  %v4444_v18 = vmul.f32 0.0, %v3812_v15  ;;  %v3591_v15 = vpack.c.bf16 %v1783_v14, %v1782_v13  ;;  %v2296_v13 = vld [vmem:[#allocation8 + $0x178] sm:$0xff] }
 0x551   : > { %3612 = vmatprep.subr.bf16.mxu1 %v4382_v34  ;;  %v4446_v0 = vmul.f32 0.0, %v3814_v17  ;;  %v1785_v17 = vld [vmem:[#allocation8 + $0xd8] sm:$0xff] }
 0x552   : > { %v3595_v9 = vpack.c.bf16 %v1785_v17, %v1784_v10  ;;  %v2789_v10 = vld [vmem:[#allocation8 + $0x188] sm:$0xff] }
 0x557   : > { %3386 = vmatmul.mubr.f32.vlgmr.msra.gmra.mrb[26].mxu1 %v4374_v23 }
 0x558   : > { %3614 = vmatpush3.bf16.msra.mxu1 %v4382_v34 }
 0x559   : > { %3648 = vmatprep.subr.bf16.mxu1 %v4380_v30 }
 0x622   : > { %v3345_v28 = vpop.f32.mrb[24].mxu1 }
 0x623   : > { %v4449_v20 = vadd.f32 %v3345_v28, %v4444_v18  ;;  %v1757_v23 = vpop.f32.mrb[25].mxu1  ;;  %v1786_v28 = vld [vmem:[#allocation8 + $0xe0] sm:$0xff] }
 0x624   : > { %v4452_v34 = vadd.f32 %v1757_v23, %v4446_v0  ;;  %v1787_v23 = vld [vmem:[#allocation8 + $0xe8] sm:$0xff] }
 0x62a   : > { %v3387_v25 = vpop.f32.mrb[26].mxu1 }
 0x62b   : > { %v2159_v26 = vsel %vm843_vm3, -1e+30, %v3387_v25  ;;  %v2149_v27 = vpop.f32.mrb[27].mxu1  ;;  %v1788_v25 = vld [vmem:[#allocation8 + $0xf0] sm:$0xff] }
 0x62c   : > { %v2158_v29 = vsel %vm842_vm1, -1e+30, %v2149_v27  ;;  %v2163_v31 = vsel %vm1145_vm2, %v2159_v26, -inf  ;;  %v1789_v27 = vld [vmem:[#allocation8 + $0xf8] sm:$0xff] }
 0x62d   : > { %2164 = vmax.xlane.f32.xlu1 %v2163_v31  ;;  %v2160_v32 = vsel %vm1145_vm2, %v2158_v29, -inf  ;;  %v2281_v31 = vld [vmem:[#allocation8 + $0x100] sm:$0xff] }
 0x62e   : > { %2161 = vmax.xlane.f32.xlu0 %v2160_v32  ;;  %v2282_v32 = vld [vmem:[#allocation8 + $0x108] sm:$0xff] }
 0x6ba   : > { %v2165_v33 = vpop.xlane.xlu1 %2164 }
 0x6bb   : > { %v2167_v35 = vmax.f32 %v2165_v33, -1e+30  ;;  %v2162_v37 = vpop.xlane.xlu0 %2161  ;;  %v3615_v33 = vpack.c.bf16 %v2282_v32, %v2281_v31  ;;  %v2795_v31 = vld [vmem:[#allocation8 + $0x1b8] sm:$0xff] }
 0x6bc   : > { %v2166_v41 = vmax.f32 %v2162_v37, -1e+30 }
 0x6bd   : > { %v2175_v42 = vsub.f32 %v2159_v26, %v2167_v35  ;;  %v3599_v26 = vpack.c.bf16 %v1787_v23, %v1786_v28  ;;  %v2791_v28 = vld [vmem:[#allocation8 + $0x198] sm:$0xff] }
 0x6be   : > { %v2174_v43 = vsub.f32 %v2158_v29, %v2166_v41  ;;  %v2168_v57 = vsub.f32 -1e+30, %v2166_v41  ;;  %v3603_v29 = vpack.c.bf16 %v1789_v27, %v1788_v25  ;;  %v2792_v25 = vld [vmem:[#allocation8 + $0x1a0] sm:$0xff] }
 0x6bf   : > { %v2178_v45 = vmul.f32 1.442695, %v2175_v42 }
 0x6c0   : > { %v2176_v44 = vmul.f32 1.442695, %v2174_v43  ;;  %v2170_v58 = vmul.f32 1.442695, %v2168_v57  ;;  %v2283_v57 = vld [vmem:[#allocation8 + $0x110] sm:$0xff] }
 0x6c2   : > { %3815 = vpow2.f32 %v2176_v44 }
 0x6c3   : > { %3817 = vpow2.f32 %v2178_v45 }
 0x6cc   : > { %v3816_v46 = vpop.eup %3815 }
 0x6cd   : > { %v3818_v47 = vpop.eup %3817  ;;  %3392 = vmatprep.mubr.msk.f32.mxu1 %vm1145_vm2, %v3816_v46  ;;  %v2182_v38 = vsel %vm1145_vm2, %v3816_v46, 0.0 }
 0x6ce   : > { %3393 = vmatmul.mubr.msk.f32.vlgmr.msra.gmra.mrb[28].mxu1 %vm1145_vm2, %v3818_v47  ;;  %v2185_v40 = vsel %vm1145_vm2, %v3818_v47, 0.0 }
 0x6cf   : > { %3650 = vmatpush3.bf16.xpose.msra.mxu1 %v4380_v30  ;;  %3434 = vmatprep.mubr.f32.mxu1 %v4372_v22  ;;  %v3583_v30 = vpack.c.bf16 %v1779_v56, %v1778_v55  ;;  %v2169_v22 = vsub.f32 -1e+30, %v2167_v35 }
 0x6d0   : > { %3652 = vmatprep.subr.bf16.mxu1 %v4384_v36 }
 0x6d1   : > { %3584 = vmatprep.subr.bf16.mxu0 %v3583_v30 }
 0x6d2   : > { %3586 = vmatpush3.bf16.msra.mxu0 %v3583_v30 }
 0x6d3   : > { %3588 = vmatprep.subr.bf16.mxu0 %v3587_v12 }
 0x6d6   : > { %3435 = vmatmul.mubr.f32.vlgmr.msra.gmra.mrb[30].mxu1 %v4376_v24  ;;  %v2172_v24 = vmul.f32 1.442695, %v2169_v22  ;;  %3590 = vmatpush3.bf16.msra.mxu0 %v3587_v12  ;;  %v2295_v12 = vld [vmem:[#allocation8 + $0x170] sm:$0xff] }
 0x6d7   : > { %3654 = vmatpush3.bf16.msra.mxu1 %v4384_v36  ;;  %3592 = vmatprep.subr.bf16.mxu0 %v3591_v15  ;;  %v3643_v14 = vpack.c.bf16 %v2296_v13, %v2295_v12 }
 0x6d8   : > { %3819 = vpow2.f32 %v2172_v24  ;;  %v2284_v24 = vld [vmem:[#allocation8 + $0x118] sm:$0xff] }
 0x6d9   : > { %3821 = vpow2.f32 %v2170_v58 }
 0x6da   : > { %3594 = vmatpush3.bf16.msra.mxu0 %v3591_v15  ;;  %v2788_v15 = vld [vmem:[#allocation8 + $0x180] sm:$0xff] }
 0x6db   : > { %3596 = vmatprep.subr.bf16.mxu0 %v3595_v9  ;;  %v3655_v17 = vpack.c.bf16 %v2789_v10, %v2788_v15 }
 0x6de   : > { %3598 = vmatpush3.bf16.msra.mxu0 %v3595_v9  ;;  %v2790_v9 = vld [vmem:[#allocation8 + $0x190] sm:$0xff] }
 0x6df   : > { %3600 = vmatprep.subr.bf16.mxu0 %v3599_v26  ;;  %v3659_v23 = vpack.c.bf16 %v2791_v28, %v2790_v9 }
 0x6e2   : > { %v3820_v36 = vpop.eup %3819  ;;  %3602 = vmatpush3.bf16.msra.mxu0 %v3599_v26  ;;  %v2793_v26 = vld [vmem:[#allocation8 + $0x1a8] sm:$0xff] }
 0x6e3   : > { %v3822_v59 = vpop.eup %3821  ;;  %v4469_v62 = vmul.f32 0.0, %v3820_v36  ;;  %3604 = vmatprep.subr.bf16.mxu0 %v3603_v29  ;;  %v3663_v27 = vpack.c.bf16 %v2793_v26, %v2792_v25 }
 0x6e4   : > { %v4471_v19 = vmul.f32 0.0, %v3822_v59 }
 0x6e6   : > { %3606 = vmatpush3.bf16.msra.mxu0 %v3603_v29  ;;  %v2794_v29 = vld [vmem:[#allocation8 + $0x1b0] sm:$0xff] }
 0x6e7   : > { %3616 = vmatprep.subr.bf16.mxu0 %v3615_v33  ;;  %v3667_v32 = vpack.c.bf16 %v2795_v31, %v2794_v29 }
 0x7a1   : > { %v3394_v63 = vpop.f32.mrb[28].mxu1 }
 0x7a2   : > { %v4474_v16 = vadd.f32 %v3394_v63, %v4469_v62  ;;  %v2264_v21 = vpop.f32.mrb[29].mxu1 }
 0x7a3   : > { %v4477_v52 = vadd.f32 %v2264_v21, %v4471_v19 }
 0x7a9   : > { %v3436_v1 = vpop.f32.mrb[30].mxu1 }
 0x7aa   : > { %v2666_v2 = vsel %vm843_vm3, -1e+30, %v3436_v1  ;;  %v2656_v3 = vpop.f32.mrb[31].mxu1 }
 0x7ab   : > { %v2665_v4 = vsel %vm842_vm1, -1e+30, %v2656_v3  ;;  %v2670_v5 = vsel %vm1145_vm2, %v2666_v2, -inf  ;;  %v2286_v3 = vld [vmem:[#allocation8 + $0x128] sm:$0xff] }
 0x7ac   : > { %2671 = vmax.xlane.f32.xlu1 %v2670_v5  ;;  %v2667_v6 = vsel %vm1145_vm2, %v2665_v4, -inf  ;;  %v2287_v5 = vld [vmem:[#allocation8 + $0x130] sm:$0xff] }
 0x7ad   : > { %2668 = vmax.xlane.f32.xlu0 %v2667_v6  ;;  %v2288_v6 = vld [vmem:[#allocation8 + $0x138] sm:$0xff] }
 0x7b0   : > { %1679 = vadd.xlane.f32.xlu1 %v1678_v7  ;;  %v2290_v7 = vld [vmem:[#allocation8 + $0x148] sm:$0xff] }
 0x7b1   : > { %1676 = vadd.xlane.f32.xlu0 %v1675_v8  ;;  %v2291_v8 = vld [vmem:[#allocation8 + $0x150] sm:$0xff] }
 0x7b4   : > { %2186 = vadd.xlane.f32.xlu1 %v2185_v40  ;;  %v2292_v40 = vld [vmem:[#allocation8 + $0x158] sm:$0xff] }
 0x7b5   : > { %2183 = vadd.xlane.f32.xlu0 %v2182_v38  ;;  %v2293_v38 = vld [vmem:[#allocation8 + $0x160] sm:$0xff] }
 0x7b6   : > { %v3639_v11 = vpack.c.bf16 %v2294_v39, %v2293_v38 }
 0x839   : > { %v4493_v35 = vpop.xlane.xlu1 %2671 }
 0x83a   : > { %v2674_v37 = vmax.f32 %v4493_v35, -1e+30  ;;  %v4496_v41 = vpop.xlane.xlu0 %2668 }
 0x83b   : > { %v2673_v42 = vmax.f32 %v4496_v41, -1e+30 }
 0x83c   : > { %v2682_v43 = vsub.f32 %v2666_v2, %v2674_v37  ;;  %v2285_v2 = vld [vmem:[#allocation8 + $0x120] sm:$0xff] }
 0x83d   : > { %v2681_v44 = vsub.f32 %v2665_v4, %v2673_v42  ;;  %v1680_v45 = vpop.xlane.xlu1 %1679  ;;  %v3623_v4 = vpack.c.bf16 %v2286_v3, %v2285_v2  ;;  %v3143_v2 = vld [vmem:[#allocation9] ss:$0 sm:$0xff] }
 0x83e   : > { %v2685_v46 = vmul.f32 1.442695, %v2682_v43  ;;  %v1677_v47 = vpop.xlane.xlu0 %1676  ;;  %v1682_v49 = vadd.f32 %v1680_v45, %v4444_v18  ;;  %v2797_v43 = vld [vmem:[#allocation8 + $0x1c8] sm:$0xff]  ;;  %v2798_v45 = vld [vmem:[#allocation8 + $0x1d0] sm:$0xff]  ;;  %v1359_v3 = vadd.f32 %v4418_v60, %v3143_v2 }
 0x83f   : > { %v2683_v48 = vmul.f32 1.442695, %v2681_v44  ;;  %v1681_v50 = vadd.f32 %v1677_v47, %v4446_v0 }
 0x840   : > { %3823 = vpow2.f32 %v2685_v46  ;;  %v2799_v46 = vld [vmem:[#allocation8 + $0x1d8] sm:$0xff] }
 0x841   : > { %v2187_v51 = vpop.xlane.xlu1 %2186  ;;  %3825 = vpow2.f32 %v2683_v48  ;;  %v3675_v47 = vpack.c.bf16 %v2799_v46, %v2798_v45  ;;  %v2800_v48 = vld [vmem:[#allocation8 + $0x1e0] sm:$0xff] }
 0x842   : > { %v2189_v53 = vadd.f32 %v2187_v51, %v4469_v62  ;;  %v2184_v54 = vpop.xlane.xlu0 %2183  ;;  %3827 = vrcp.f32 %v1682_v49  ;;  %v2801_v49 = vld [vmem:[#allocation8 + $0x1e8] sm:$0xff]  ;;  %v2802_v51 = vld [vmem:[#allocation8 + $0x1f0] sm:$0xff] }
 0x843   : > { %v2188_v55 = vadd.f32 %v2184_v54, %v4471_v19  ;;  %3829 = vrcp.f32 %v1681_v50  ;;  %v3619_v19 = vpack.c.bf16 %v2284_v24, %v2283_v57  ;;  %v3679_v50 = vpack.c.bf16 %v2801_v49, %v2800_v48 }
 0x844   : > { %3831 = vrcp.f32 %v2189_v53  ;;  %v2803_v53 = vld [vmem:[#allocation8 + $0x1f8] sm:$0xff] }
 0x845   : > { %3833 = vrcp.f32 %v2188_v55  ;;  %v3683_v54 = vpack.c.bf16 %v2803_v53, %v2802_v51  ;;  %v2676_v55 = vsub.f32 -1e+30, %v2674_v37 }
 0x84a   : > { %v3824_v56 = vpop.eup %3823 }
 0x84b   : > { %v2692_v30 = vsel %vm1145_vm2, %v3824_v56, 0.0  ;;  %v3826_v22 = vpop.eup %3825 }
 0x84c   : > { %2693 = vadd.xlane.f32.xlu1 %v2692_v30  ;;  %v3828_v18 = vpop.eup %3827  ;;  %3441 = vmatprep.mubr.msk.f32.mxu1 %vm1145_vm2, %v3826_v22  ;;  %v2689_v0 = vsel %vm1145_vm2, %v3826_v22, 0.0  ;;  %v2679_v30 = vmul.f32 1.442695, %v2676_v55 }
 0x84d   : > { %v3830_v58 = vpop.eup %3829  ;;  %3442 = vmatmul.mubr.msk.f32.vlgmr.msra.gmra.mrb[32].mxu1 %vm1145_vm2, %v3824_v56  ;;  %2690 = vadd.xlane.f32.xlu0 %v2689_v0  ;;  %v1773_v36 = vmul.f32 %v3828_v18, %v4449_v20  ;;  %v3627_v20 = vpack.c.bf16 %v2288_v6, %v2287_v5  ;;  %v2675_v56 = vsub.f32 -1e+30, %v2673_v42 }
 0x84e   : > { %v3832_v59 = vpop.eup %3831  ;;  %v1772_v62 = vmul.f32 %v3830_v58, %v4452_v34  ;;  %v2289_v34 = vld [vmem:[#allocation8 + $0x140] sm:$0xff]  ;;  %3835 = vpow2.f32 %v2679_v30 }
 0x84f   : > { %v3834_v63 = vpop.eup %3833  ;;  %v2280_v21 = vmul.f32 %v3832_v59, %v4474_v16  ;;  %v3631_v16 = vpack.c.bf16 %v2290_v7, %v2289_v34  ;;  %v2677_v22 = vmul.f32 1.442695, %v2675_v56 }
 0x850   : > { %3378 = vmatprep.mubr.f32.mxu0 %v1772_v62  ;;  %v2279_v1 = vmul.f32 %v3834_v63, %v4477_v52  ;;  %v3635_v52 = vpack.c.bf16 %v2292_v40, %v2291_v8 }
 0x851   : > { %3379 = vmatmul.mubr.f32.vlgmr.msra.gmra.mrb[8].mxu0 %v1773_v36  ;;  %3837 = vpow2.f32 %v2677_v22 }
 0x852   : > { %3618 = vmatpush3.bf16.msra.mxu0 %v3615_v33  ;;  %3427 = vmatprep.mubr.f32.mxu0 %v2279_v1  ;;  %v2796_v33 = vld [vmem:[#allocation8 + $0x1c0] sm:$0xff] }
 0x853   : > { %3620 = vmatprep.subr.bf16.mxu0 %v3619_v19  ;;  %v3671_v44 = vpack.c.bf16 %v2797_v43, %v2796_v33 }
 0x856   : > { %3622 = vmatpush3.bf16.msra.mxu0 %v3619_v19 }
 0x857   : > { %3624 = vmatprep.subr.bf16.mxu0 %v3623_v4 }
 0x858   : > { %v3836_v18 = vpop.eup %3835 }
 0x859   : > { %v2688_v24 = vmul.f32 0.0, %v3836_v18 }
 0x85a   : > { %3626 = vmatpush3.bf16.msra.mxu0 %v3623_v4  ;;  %v1358_v4 = vadd.f32 %v3143_v2, %v4420_v61 }
 0x85b   : > { %3628 = vmatprep.subr.bf16.mxu0 %v3627_v20  ;;  %v3838_v0 = vpop.eup %3837 }
 0x85c   : > { %v2687_v36 = vmul.f32 0.0, %v3838_v0 }
 0x85e   : > { %3630 = vmatpush3.bf16.msra.mxu0 %v3627_v20 }
 0x85f   : > { %3632 = vmatprep.subr.bf16.mxu0 %v3631_v16 }
 0x862   : > { %3634 = vmatpush3.bf16.msra.mxu0 %v3631_v16 }
 0x863   : > { %3636 = vmatprep.subr.bf16.mxu0 %v3635_v52 }
 0x866   : > { %3638 = vmatpush3.bf16.msra.mxu0 %v3635_v52 }
 0x867   : > { %3640 = vmatprep.subr.bf16.mxu0 %v3639_v11 }
 0x86a   : > { %3642 = vmatpush3.bf16.msra.mxu0 %v3639_v11 }
 0x86b   : > { %3644 = vmatprep.subr.bf16.mxu0 %v3643_v14 }
 0x86e   : > { %3646 = vmatpush3.bf16.msra.mxu0 %v3643_v14 }
 0x86f   : > { %3656 = vmatprep.subr.bf16.mxu0 %v3655_v17 }
 0x871   : > { %3428 = vmatmul.mubr.f32.vlgmr.msra.gmra.mrb[8].mxu0 %v2280_v21 }
 0x872   : > { %3658 = vmatpush3.bf16.msra.mxu0 %v3655_v17 }
 0x873   : > { %3660 = vmatprep.subr.bf16.mxu0 %v3659_v23 }
 0x876   : > { %3662 = vmatpush3.bf16.msra.mxu0 %v3659_v23 }
 0x877   : > { %3664 = vmatprep.subr.bf16.mxu0 %v3663_v27 }
 0x87a   : > { %3666 = vmatpush3.bf16.msra.mxu0 %v3663_v27 }
 0x87b   : > { %3668 = vmatprep.subr.bf16.mxu0 %v3667_v32 }
 0x87e   : > { %3670 = vmatpush3.bf16.msra.mxu0 %v3667_v32 }
 0x87f   : > { %3672 = vmatprep.subr.bf16.mxu0 %v3671_v44 }
 0x882   : > { %3674 = vmatpush3.bf16.msra.mxu0 %v3671_v44 }
 0x883   : > { %3676 = vmatprep.subr.bf16.mxu0 %v3675_v47 }
 0x886   : > { %3678 = vmatpush3.bf16.msra.mxu0 %v3675_v47 }
 0x887   : > { %3680 = vmatprep.subr.bf16.mxu0 %v3679_v50 }
 0x88a   : > { %3682 = vmatpush3.bf16.msra.mxu0 %v3679_v50 }
 0x88b   : > { %3684 = vmatprep.subr.bf16.mxu0 %v3683_v54 }
 0x88e   : > { %3686 = vmatpush3.bf16.msra.mxu0 %v3683_v54 }
 0x8d9   : > { %v2694_v57 = vpop.xlane.xlu1 %2693 }
 0x8da   : > { %v2691_v58 = vpop.xlane.xlu0 %2690  ;;  %v2696_v59 = vadd.f32 %v2694_v57, %v2688_v24 }
 0x8db   : > { %v2695_v62 = vadd.f32 %v2691_v58, %v2687_v36 }
 0x8dc   : > { %3839 = vrcp.f32 %v2696_v59 }
 0x8dd   : > { %3841 = vrcp.f32 %v2695_v62 }
 0x8e6   : > { %v3840_v42 = vpop.eup %3839 }
 0x8e7   : > { %v3842_v19 = vpop.eup %3841 }
 0x920   : > { %v3443_v35 = vpop.f32.mrb[32].mxu1 }
 0x921   : > { %v2781_v37 = vadd.f32 %v3443_v35, %v2688_v24  ;;  %v2771_v41 = vpop.f32.mrb[33].mxu1 }
 0x922   : > { %v2780_v63 = vadd.f32 %v2771_v41, %v2687_v36 }
 0x923   : > { %v2787_v21 = vmul.f32 %v3840_v42, %v2781_v37 }
 0x924   : > { %v2786_v1 = vmul.f32 %v3842_v19, %v2780_v63 }
 0x926   : > { %3476 = vmatprep.mubr.f32.mxu0 %v2786_v1 }
 0x927   : > { %3477 = vmatmul.mubr.f32.vlgmr.msra.gmra.mrb[8].mxu0 %v2787_v21 }
 0x9fa   : > { %v3478_v5 = vpop.f32.mrb[8].mxu0 }
 0x9fb   : > { %v3688_v6 = vadd.f32 %v3478_v5, %v1359_v3  ;;  %v2870_v20 = vpop.f32.mrb[9].mxu0 }
 0x9fc   : > { %v3690_v34 = vadd.f32 %v2870_v20, %v1358_v4 }
 0x9fd   : > { %2883 = vst.msk [vmem:[%s271_s23 + $0x8] sm:$0xff] %vm2881_vm4, %v3688_v6 }
 0x9fe   : > { %2882 = vst.msk [vmem:[%s271_s23] sm:$0xff] %vm2881_vm4, %v3690_v34 }
 0x9ff   : > { %3970 = shalt.err (!%p3967_p0)
}
 0xa00   : > { %s3971_s24 = scalar_lea.hbm %s4529_s5, 256  ;;  %s3975_s30 = scalar_lea.hbm %s4582_s4, 512 }
 0xa01   : > { %p3972_p4 = scmp.ne.s32.totalorder %s4529_s5, %s3971_s24  ;;  %p3976_p12 = scmp.lt.u32.totalorder %s4529_s5, %s4582_s4 }
 0xa02   : > { %p3977_p1 = scmp.lt.u32.totalorder %s3975_s30, %s3971_s24  ;;  %p3979_p13 = scmp.lt.u32.totalorder %s3971_s24, %s4529_s5 }
 0xa03   : > { %p3973_p8 = pnand %p3972_p4, %p4243_p3 }
 0xa04   : > { %p3978_p7 = por %p3977_p1, %p3976_p12 }
 0xa05   : > { %p3974_p2 = pneg %p3973_p8 }
 0xa06   : > { %p3980_p6 = por %p3979_p13, %p3978_p7 }
 0xa08   : > { %p3981_p10 = pnand %p3980_p6, %p3974_p2 }
 0xa0a   : > { %3984 = shalt.err (!%p3981_p10)
}
 0xa0b   : > { %s4059_s23 = smov 128   ;;  %s4060_s27 = smov 8  }
 0xa0c   : > { %3709 = dma.vmem_to_hbm [thread:$0]  (%p4243_p3), %s4524_s25, 256, %s4529_s5, %s2885_s18, %s4059_s23, %s4059_s23, %s4060_s27  }
 0xa0d PF: > { %s2915_s22 = sand.u32 1, %s4027_s15   ;;  %p4603_p11 = scmp.ne.s32.totalorder %s4591_s26, 0 }
 0xa0e   : > { %p4604_p5 = scmp.ge.s32.totalorder %s4047_s20, 2  ;;  %s2916_s28 = scalar_lea.sflag [#allocation5], %s2915_s22 }
 0xa10   : > { %p3726_p9 = pnand %p4604_p5, %p4603_p11 }
 0xa12   : > { %4022 = dma.done.wait (!%p3726_p9), %s2916_s28, 256  }
 0xa13   : > { %4024 = vsyncadd (!%p3726_p9), %s2916_s28, 4294967040  ;;  %s22_s20 = sadd.s32 1, %s4047_s20   ;;  %s4605_s15 = smov %s4031_s16 }
 0xa14   : > { %p19_p0 = scmp.ge.s32.totalorder %s22_s20, 4   ;;  %s4606_s16 = smov %s4035_s17 }
 0xa15   : > { %s4607_s17 = smov %s4252_s14  ;;  %s4608_s18 = smov %s4043_s19 }
 0xa16   : > { %s4609_s19 = smov %s4611_s1  ;;  %21 = sbr.rel (!%p19_p0) target bundleno = 10 (0xa), region = 175 }
 0xa1d   :  { %2921 = vsyncpa [#allocation4], 1 }
 0xa1e   :  { %2923 = vsyncpa [#allocation4 + $0x1], 1 }
 0xa1f   :  { %2924 = vsyncpa [#allocation7], 1 }
 0xa20   :  { %2925 = vsyncpa [#allocation10], 1 }
 0xa21   :  { %2926 = vsyncpa [#allocation5], 1 }
 0xa22   :  { %2928 = vsyncpa [#allocation5 + $0x1], 1 }

// kernel: tpu_custom_call.1
= control target key start
LH: loop header
LB: loop body
LE: loop exit
PB: predicated region body
PF: predicated region fallthrough
CT: control target
= control target key end

     0   :  { %s4578_s0 = inlined_call_operand.hbm [shape: f32[2,16,32], index: 0, kind: input, shape index: {}]   ;;  %s4579_s1 = inlined_call_operand.hbm [shape: f32[32,1536], index: 1, kind: input, shape index: {}]   ;;  %s4580_s2 = inlined_call_operand.hbm [shape: f32[512,64], index: 2, kind: input, shape index: {}]   ;;  %s4581_s3 = inlined_call_operand.hbm [shape: f32[1,64], index: 3, kind: input, shape index: {}]   ;;  %s4582_s4 = inlined_call_operand.hbm [shape: f32[2,16,64], index: 4, kind: output, shape index: {}]  }
   0x1   :  { %4587 = sst [smem:[#allocation16_spill]] %s4579_s1 }
   0x2   :  { %9 = vsyncpa [#allocation4], 0 }
   0x3   :  { %11 = vsyncpa [#allocation4 + $0x1], 0 }
   0x4   :  { %12 = vsyncpa [#allocation7], 0 }
   0x5   :  { %13 = vsyncpa [#allocation10], 0 }
   0x6   :  { %14 = vsyncpa [#allocation5], 0 }
   0x7   :  { %16 = vsyncpa [#allocation5 + $0x1], 0  ;;  %s4086_s15 = smov 0   ;;  %s4088_s16 = smov 0  }
   0x8   :  { %s4090_s17 = smov 0   ;;  %s4092_s18 = smov 0  }
   0x9   :  { %s4094_s19 = smov 0   ;;  %s4096_s20 = smov 0  }
   0xa LB: > { %s3115_s21 = sadd.s32 4294967295, %s4047_s20   ;;  %s3116_s22 = sadd.s32 4294967294, %s4047_s20   ;;  %s4047_s20 = sphi %s4096_s20, %s22_s20   ;;  %s4043_s19 = sphi %s4094_s19, %s4609_s19   ;;  %s4039_s18 = sphi %s4092_s18, %s4608_s18   ;;  %s4035_s17 = sphi %s4090_s17, %s4607_s17   ;;  %s4031_s16 = sphi %s4088_s16, %s4606_s16   ;;  %s4027_s15 = sphi %s4086_s15, %s4605_s15  }
   0xb   : > { %p54_p0 = scmp.ne.s32.totalorder %s4031_s16, %s4027_s15  ;;  %p4120_p1 = scmp.eq.s32.totalorder %s3115_s21, 0 }
   0xc   : > { %p4124_p2 = scmp.eq.s32.totalorder %s3115_s21, 1  ;;  %p149_p3 = scmp.eq.s32.totalorder %s3116_s22, 1 }
   0xd   : > { %s4588_s23 = scalar_select %p4120_p1, 1, 0 }
   0xe   : > { %s4589_s24 = scalar_select %p4124_p2, 1, 0 }
   0xf   : > { %p4130_p4 = por %p4120_p1, %p54_p0  ;;  %p3117_p5 = scmp.ge.s32.totalorder %s4047_s20, 1 }
  0x10   : > { %p4135_p6 = por %p149_p3, %p54_p0  ;;  %p156_p7 = scmp.lt.s32.totalorder %s4047_s20, 3 }
  0x11   : > { %s4590_s25 = scalar_select %p4130_p4, 1, 0 }
  0x12   : > { %s4591_s26 = scalar_select %p4135_p6, 1, 0 }
  0x13   : > { %p4140_p8 = pnand %p3117_p5, %p156_p7  ;;  %s4049_s28 = smov [#allocation6]  }
  0x14   : > { %s168_s29 = sshll.u32 %s4049_s28, 4  ;;  %s4050_s5 = smov [#allocation8]   ;;  %s4144_s29 = int_to_ptr.vmem [resolvable:$true] %s168_s29 }
  0x15   : > { %s4592_s27 = scalar_select %p4140_p8, 1, 0 }
  0x16   : > { %p3711_p9 = pneg %p4140_p8  ;;  %s181_s6 = sshll.u32 %s4050_s5, 4  ;;  %s4155_s6 = int_to_ptr.vmem [resolvable:$true] %s181_s6 }
  0x17   : > { %s4594_s1 = sld [smem:[#allocation16_spill]] }
  0x18   : > { %p4151_p11 = pnand %p3711_p9, %p4120_p1 }
  0x1a   : > { %p4165_p13 = pneg %p4151_p11 }
  0x1d   : > { %s3843_s9 = scalar_lea.hbm %s4594_s1, 6144 }
  0x1e   : > { %p3844_p12 = scmp.ne.s32.totalorder %s4594_s1, %s3843_s9  ;;  %p3850_p5 = scmp.lt.u32.totalorder %s3843_s9, %s4594_s1 }
  0x20   : > { %p3846_p0 = pnand %p4165_p13, %p3844_p12 }
  0x22   : > { %p3847_p3 = pneg %p3846_p0 }
  0x24   : > { %p3852_p7 = pnand %p3850_p5, %p3847_p3 }
  0x26   : > { %3855 = shalt.err (!%p3852_p7)
}
  0x27   : > { %s3856_s21 = scalar_lea.vmem %s4144_s29, 6144  ;;  %p3864_p1 = scmp.lt.s32.totalorder %s4144_s29, %s4144_s29 }
  0x28   : > { %p3857_p9 = scmp.ne.s32.totalorder %s4144_s29, %s3856_s21  ;;  %p3865_p4 = scmp.lt.s32.totalorder %s3856_s21, %s3856_s21 }
  0x2a   : > { %p3859_p10 = pnand %p3857_p9, %p4165_p13  ;;  %p3866_p12 = por %p3865_p4, %p3864_p1 }
  0x2c   : > { %p3860_p6 = pneg %p3859_p10 }
  0x2e   : > { %p3867_p0 = pnand %p3866_p12, %p3860_p6 }
  0x30   : > { %3870 = shalt.err (!%p3867_p0)
}
  0x31   : > { %s4051_s22 = smov 1536   ;;  %s4052_s28 = smov 96  }
  0x32   : > { %3714 = dma.hbm_to_vmem [thread:$0]  (!%p4151_p11), %s4594_s1, 6144, %s4144_s29, [#allocation7], %s4051_s22, %s4051_s22, %s4052_s28  }
  0x33   : > { %s3871_s10 = scalar_lea.hbm %s4580_s2, 8192 }
  0x34   : > { %p3872_p1 = scmp.ne.s32.totalorder %s4580_s2, %s3871_s10  ;;  %p3878_p10 = scmp.lt.u32.totalorder %s3871_s10, %s4580_s2 }
  0x36   : > { %p3874_p4 = pnand %p3872_p1, %p4165_p13 }
  0x38   : > { %p3875_p6 = pneg %p3874_p4 }
  0x3a   : > { %p3880_p3 = pnand %p3878_p10, %p3875_p6 }
  0x3c   : > { %3883 = shalt.err (!%p3880_p3)
}
  0x3d   : > { %s3884_s29 = scalar_lea.vmem %s4155_s6, 8192  ;;  %p3892_p12 = scmp.lt.s32.totalorder %s4155_s6, %s4155_s6 }
  0x3e   : > { %p3885_p5 = scmp.ne.s32.totalorder %s4155_s6, %s3884_s29  ;;  %p3893_p0 = scmp.lt.s32.totalorder %s3884_s29, %s3884_s29 }
  0x40   : > { %p3887_p7 = pnand %p3885_p5, %p4165_p13  ;;  %p3894_p1 = por %p3893_p0, %p3892_p12 }
  0x42   : > { %p3888_p9 = pneg %p3887_p7 }
  0x44   : > { %p3895_p4 = pnand %p3894_p1, %p3888_p9 }
  0x46   : > { %3898 = shalt.err (!%p3895_p4)
}
  0x47   : > { %s4053_s22 = smov 128   ;;  %s4054_s28 = smov 8  }
  0x48   : > { %3717 = dma.hbm_to_vmem [thread:$0]  (!%p4151_p11), %s4580_s2, 8192, %s4155_s6, [#allocation7], %s4053_s22, %s4053_s22, %s4054_s28  }
  0x49   : > { %s4055_s8 = smov [#allocation9]   ;;  %s3899_s13 = scalar_lea.hbm %s4581_s3, 16 }
  0x4a   : > { %s195_s9 = sshll.u32 %s4055_s8, 4  ;;  %p3900_p6 = scmp.ne.s32.totalorder %s4581_s3, %s3899_s13  ;;  %s196_s9 = int_to_ptr.vmem [resolvable:$true] %s195_s9 }
  0x4b   : > { %p3906_p5 = scmp.lt.u32.totalorder %s3899_s13, %s4581_s3 }
  0x4c   : > { %p3902_p10 = pnand %p3900_p6, %p4165_p13 }
  0x4e   : > { %p3903_p3 = pneg %p3902_p10 }
  0x50   : > { %p3908_p7 = pnand %p3906_p5, %p3903_p3 }
  0x52   : > { %3911 = shalt.err (!%p3908_p7)
}
  0x53   : > { %s3912_s6 = scalar_lea.vmem %s196_s9, 16  ;;  %s3919_s5 = scalar_lea.vmem %s196_s9, 32 }
  0x54   : > { %p3913_p9 = scmp.ne.s32.totalorder %s196_s9, %s3912_s6  ;;  %p3920_p1 = scmp.lt.s32.totalorder %s196_s9, %s196_s9 }
  0x55   : > { %p3921_p4 = scmp.lt.s32.totalorder %s3919_s5, %s3912_s6 }
  0x56   : > { %p3915_p12 = pnand %p3913_p9, %p4165_p13 }
  0x57   : > { %p3922_p8 = por %p3921_p4, %p3920_p1 }
  0x58   : > { %p3916_p0 = pneg %p3915_p12 }
  0x5a   : > { %p3923_p2 = pnand %p3922_p8, %p3916_p0 }
  0x5c   : > { %3926 = shalt.err (!%p3923_p2)
}
  0x5d   : > { %3720 = dma.hbm_to_vmem [thread:$0]  (!%p4151_p11), %s4581_s3, 16, %s196_s9, [#allocation10]  }
  0x5e   : > { %s34_s1 = sadd.s32 1, %s4043_s19  ;;  %s41_s12 = sadd.s32 1, %s4035_s17 }
  0x5f   : > { %p36_p8 = scmp.ge.s32.totalorder %s34_s1, 2  ;;  %p48_p2 = scmp.ne.s32.totalorder %s4035_s17, %s4031_s16 }
  0x60   : > { %p49_p13 = scmp.eq.s32.totalorder %s4047_s20, 0  ;;  %p4597_p10 = scmp.ne.s32.totalorder %s4589_s24, 0 }
  0x61   : > { %s4611_s1 = smov (%p36_p8, %s34_s1), 0  ;;  %p3732_p11 = scmp.lt.s32.totalorder %s4047_s20, 2 }
  0x62   : > { %p4237_p6 = por %p49_p13, %p48_p2  ;;  %p4243_p3 = por %p4597_p10, %p48_p2 }
  0x63   : > { %s38_s11 = ssub.s32 %s4043_s19, %s4611_s1  ;;  %s206_s9 = sand.u32 1, %s4035_s17  }
  0x64   : > { %p39_p5 = scmp.eq.s32.totalorder %s38_s11, 0  ;;  %s3122_s13 = sshll.u32 %s206_s9, 4 }
  0x65   : > { %s3173_s21 = sshll.u32 %s4043_s19, 8  ;;  %s210_s24 = scalar_lea.vmem [#allocation3], %s3122_s13 }
  0x66   : > { %s4252_s14 = scalar_select %p39_p5, %s4035_s17, %s41_s12  }
  0x67   : > { %s4258_s5 = scalar_lea.hbm %s4578_s0, %s3173_s21  ;;  %s217_s7 = sshll.u32 %s210_s24, 4  ;;  %s4260_s7 = int_to_ptr.vmem [resolvable:$true] %s217_s7 }
  0x68   : > { %p4264_p7 = pnand %p3732_p11, %p4237_p6  ;;  %s4268_s12 = scalar_lea.sflag [#allocation4], %s206_s9 }
  0x69   : > { %s3927_s11 = scalar_lea.hbm %s4258_s5, 256  ;;  %s3932_s30 = scalar_lea.hbm %s4578_s0, 512 }
  0x6a   : > { %p3928_p9 = scmp.ne.s32.totalorder %s4258_s5, %s3927_s11  ;;  %p3929_p12 = pneg %p4264_p7 }
  0x6b   : > { %p3933_p4 = scmp.lt.u32.totalorder %s4258_s5, %s4578_s0  ;;  %p3934_p8 = scmp.lt.u32.totalorder %s3932_s30, %s3927_s11 }
  0x6c   : > { %p3930_p0 = pnand %p3929_p12, %p3928_p9  ;;  %p3936_p13 = scmp.lt.u32.totalorder %s3927_s11, %s4258_s5 }
  0x6d   : > { %p3935_p2 = por %p3934_p8, %p3933_p4 }
  0x6e   : > { %p3931_p1 = pneg %p3930_p0 }
  0x6f   : > { %p3937_p6 = por %p3936_p13, %p3935_p2 }
  0x71   : > { %p3938_p10 = pnand %p3937_p6, %p3931_p1 }
  0x73   : > { %3941 = shalt.err (!%p3938_p10)
}
  0x74   : > { %s3942_s9 = scalar_lea.vmem %s4260_s7, 256  ;;  %s4056_s24 = smov [#allocation3]  }
  0x75   : > { %p3943_p11 = scmp.ne.s32.totalorder %s4260_s7, %s3942_s9  ;;  %s3947_s13 = sshll.u32 %s4056_s24, 4  ;;  %s3948_s13 = int_to_ptr.vmem [resolvable:$false] %s3947_s13 }
  0x76   : > { %s3949_s21 = scalar_lea.vmem %s3948_s13, 512  ;;  %p3950_p0 = scmp.lt.s32.totalorder %s4260_s7, %s3948_s13 }
  0x77   : > { %p3945_p5 = pnand %p3943_p11, %p3929_p12  ;;  %p3951_p4 = scmp.lt.s32.totalorder %s3949_s21, %s3942_s9 }
  0x79   : > { %p3946_p9 = pneg %p3945_p5  ;;  %p3952_p8 = por %p3951_p4, %p3950_p0 }
  0x7b   : > { %p3953_p2 = pnand %p3952_p8, %p3946_p9 }
  0x7d   : > { %3956 = shalt.err (!%p3953_p2)
}
  0x7e   : > { %3724 = dma.hbm_to_vmem [thread:$0]  (!%p4264_p7), %s4258_s5, 256, %s4260_s7, %s4268_s12, %s4053_s22, %s4053_s22, %s4054_s28  }
  0x7f   : > { %p4600_p12 = scmp.ne.s32.totalorder %s4592_s27, 0 }
  0x80   : > { %s4302_s11 = sand.u32 (!%p4600_p12), 1, %s4031_s16   ;;  %p4601_p1 = scmp.ne.s32.totalorder (!%p4600_p12), %s4590_s25, 0 }
  0x81   : > { %229 = sbr.rel (%p4600_p12) target bundleno = 2573 (0xa0d), region = 36  ;;  %s3126_s30 = sshll.u32 (!%p4600_p12), %s4302_s11, 4 }
  0x82   : > { %s232_s29 = scalar_lea.sflag (!%p4600_p12), [#allocation4], %s4302_s11  ;;  %s4308_s8 = scalar_lea.vmem (!%p4600_p12), [#allocation3], %s3126_s30 }
  0x88   : > { %4010 = dma.done.wait (%p4601_p1), %s232_s29, 256  }
  0x89   : > { %4012 = vsyncadd (%p4601_p1), %s232_s29, 4294967040  ;;  %p4602_p7 = scmp.ne.s32.totalorder %s4588_s23, 0 }
  0x8b   : > { %4014 = dma.done.wait (%p4602_p7), [#allocation7], 14336  }
  0x8c   : > { %4016 = vsyncadd (%p4602_p7), [#allocation7], 4294952960 }
  0x8d   : > { %4018 = dma.done.wait (%p4602_p7), [#allocation10], 16  }
  0x8e   : > { %4020 = vsyncadd (%p4602_p7), [#allocation10], 4294967280  ;;  %v4057_v0 = vmov 0.0   ;;  %v284_v1 = vld [vmem:[#allocation6 + $0x28] sm:$0xff]  ;;  %v283_v3 = vld [vmem:[#allocation6 + $0x20] sm:$0xff]  ;;  %vm327_vm0 = vcmask 261120  }
  0x8f   : > { %552 = vmatprep.mubr.f32.mxu0 %v4057_v0  ;;  %398 = vmatprep.mubr.f32.mxu1 %v4057_v0  ;;  %v296_v2 = vld [vmem:[#allocation6 + $0x88] sm:$0xff]  ;;  %v295_v5 = vld [vmem:[#allocation6 + $0x80] sm:$0xff]  ;;  %v282_v24 = vld [vmem:[#allocation6 + $0x18] sm:$0xff]  ;;  %vm1145_vm2 = vcmask 130048   ;;  %s271_s23 = scalar_lea.vmem [#allocation11], %s3126_s30  ;;  %s3178_s27 = sshll.u32 %s4039_s18, 8 }
  0x90   : > { %v3495_v4 = vpack.c.bf16 %v296_v2, %v284_v1  ;;  %v308_v6 = vld [vmem:[#allocation6 + $0xe8] sm:$0xff]  ;;  %v3497_v8 = vpack.c.bf16 %v295_v5, %v283_v3  ;;  %v307_v10 = vld [vmem:[#allocation6 + $0xe0] sm:$0xff]  ;;  %v294_v25 = vld [vmem:[#allocation6 + $0x78] sm:$0xff]  ;;  %s2900_s25 = sshll.u32 %s271_s23, 4  ;;  %vm2881_vm4 = vcmask 523264   ;;  %s4529_s5 = scalar_lea.hbm %s4582_s4, %s3178_s27  ;;  %s4524_s25 = int_to_ptr.vmem [resolvable:$true] %s2900_s25 }
  0x91   : > { %v320_v7 = vld [vmem:[#allocation6 + $0x148] sm:$0xff]  ;;  %v319_v11 = vld [vmem:[#allocation6 + $0x140] sm:$0xff]  ;;  %v3487_v28 = vpack.c.bf16 %v294_v25, %v282_v24  ;;  %v281_v29 = vld [vmem:[#allocation6 + $0x10] sm:$0xff]  ;;  %s2885_s18 = scalar_lea.sflag [#allocation5], %s4302_s11  ;;  %s3957_s7 = scalar_lea.vmem %s4524_s25, 256 }
  0x92   : > { %v3499_v9 = vpack.c.bf16 %v320_v7, %v308_v6  ;;  %3496 = vmatprep.subr.bf16.mxu0 %v3495_v4  ;;  %v280_v12 = vld [vmem:[#allocation6 + $0x8] sm:$0xff]  ;;  %v279_v14 = vld [vmem:[#allocation6] sm:$0xff]  ;;  %v3501_v15 = vpack.c.bf16 %v319_v11, %v307_v10  ;;  %v293_v30 = vld [vmem:[#allocation6 + $0x70] sm:$0xff]  ;;  %p3958_p13 = scmp.ne.s32.totalorder %s4524_s25, %s3957_s7  ;;  %s4058_s12 = smov [#allocation11]  }
  0x93   : > { %v292_v13 = vld [vmem:[#allocation6 + $0x68] sm:$0xff]  ;;  %3498 = vmatpush1.bf16.msra.mxu0 %v3497_v8  ;;  %v291_v17 = vld [vmem:[#allocation6 + $0x60] sm:$0xff]  ;;  %v306_v31 = vld [vmem:[#allocation6 + $0xd8] sm:$0xff]  ;;  %v3489_v34 = vpack.c.bf16 %v293_v30, %v281_v29  ;;  %s3961_s6 = sshll.u32 %s4058_s12, 4  ;;  %s3962_s6 = int_to_ptr.vmem [resolvable:$false] %s3961_s6 }
  0x94   : > { %v3479_v16 = vpack.c.bf16 %v292_v13, %v280_v12  ;;  %v304_v18 = vld [vmem:[#allocation6 + $0xc8] sm:$0xff]  ;;  %3500 = vmatprep.subr.bf16.mxu0 %v3499_v9  ;;  %v3481_v19 = vpack.c.bf16 %v291_v17, %v279_v14  ;;  %v303_v21 = vld [vmem:[#allocation6 + $0xc0] sm:$0xff]  ;;  %v318_v32 = vld [vmem:[#allocation6 + $0x138] sm:$0xff]  ;;  %p3959_p6 = pnand %p3958_p13, %p4243_p3  ;;  %s3963_s9 = scalar_lea.vmem %s3962_s6, 512 }
  0x95   : > { %v316_v20 = vld [vmem:[#allocation6 + $0x128] sm:$0xff]  ;;  %v315_v22 = vld [vmem:[#allocation6 + $0x120] sm:$0xff]  ;;  %v3491_v35 = vpack.c.bf16 %v318_v32, %v306_v31  ;;  %v305_v36 = vld [vmem:[#allocation6 + $0xd0] sm:$0xff]  ;;  %p3964_p11 = scmp.lt.s32.totalorder %s4524_s25, %s3962_s6  ;;  %p3965_p5 = scmp.lt.s32.totalorder %s3963_s9, %s3957_s7 }
  0x96   : > { %3480 = vmatprep.subr.bf16.mxu1 %v3479_v16  ;;  %v3483_v23 = vpack.c.bf16 %v316_v20, %v304_v18  ;;  %v3485_v26 = vpack.c.bf16 %v315_v22, %v303_v21  ;;  %v4325_v27 = vld [vmem:[%s4308_s8] sm:$0xff]  ;;  %v4331_v33 = vld [vmem:[%s4308_s8 + $0x8] sm:$0xff]  ;;  %p3960_p10 = pneg %p3959_p6 }
  0x97   : > { %3482 = vmatpush1.bf16.msra.mxu1 %v3481_v19  ;;  %3502 = vmatpush1.bf16.msra.mxu0 %v3501_v15  ;;  %v317_v37 = vld [vmem:[#allocation6 + $0x130] sm:$0xff]  ;;  %v286_v38 = vld [vmem:[#allocation6 + $0x38] sm:$0xff]  ;;  %v288_v63 = vld [vmem:[#allocation6 + $0x48] sm:$0xff]  ;;  %p3966_p9 = por %p3965_p5, %p3964_p11 }
  0x98   : > { %3484 = vmatprep.subr.bf16.mxu1 %v3483_v23  ;;  %v298_v39 = vld [vmem:[#allocation6 + $0x98] sm:$0xff]  ;;  %v3493_v40 = vpack.c.bf16 %v317_v37, %v305_v36  ;;  %v285_v42 = vld [vmem:[#allocation6 + $0x30] sm:$0xff]  ;;  %v300_v1 = vld [vmem:[#allocation6 + $0xa8] sm:$0xff]  ;;  %v837_v37 = vlaneseq }
  0x99   : > { %v3503_v41 = vpack.c.bf16 %v298_v39, %v286_v38  ;;  %v297_v43 = vld [vmem:[#allocation6 + $0x90] sm:$0xff]  ;;  %v310_v44 = vld [vmem:[#allocation6 + $0xf8] sm:$0xff]  ;;  %v287_v2 = vld [vmem:[#allocation6 + $0x40] sm:$0xff]  ;;  %v3511_v3 = vpack.c.bf16 %v300_v1, %v288_v63  ;;  %p3967_p0 = pnand %p3966_p9, %p3960_p10 }
  0x9a   : > { %3135 = vmatmul.mubr.msk.f32.vlgmr.msra.gmra.mrb[0].mxu0 %vm327_vm0, %v4325_v27  ;;  %v322_v45 = vld [vmem:[#allocation6 + $0x158] sm:$0xff]  ;;  %v3505_v46 = vpack.c.bf16 %v297_v43, %v285_v42  ;;  %v309_v48 = vld [vmem:[#allocation6 + $0xf0] sm:$0xff]  ;;  %v299_v4 = vld [vmem:[#allocation6 + $0xa0] sm:$0xff]  ;;  %v4386_v38 = vshrl.u32 %v837_v37, 7  ;;  %v4388_v39 = vand.u32 127, %v837_v37 }
  0x9b   : > { %3486 = vmatpush1.bf16.msra.mxu1 %v3485_v26  ;;  %558 = vmatprep.mubr.f32.mxu0 %v4057_v0  ;;  %v3507_v47 = vpack.c.bf16 %v322_v45, %v310_v44  ;;  %v321_v49 = vld [vmem:[#allocation6 + $0x150] sm:$0xff]  ;;  %v290_v50 = vld [vmem:[#allocation6 + $0x58] sm:$0xff]  ;;  %v312_v5 = vld [vmem:[#allocation6 + $0x108] sm:$0xff]  ;;  %v3513_v7 = vpack.c.bf16 %v299_v4, %v287_v2 }
  0x9c   : > { %3488 = vmatprep.subr.bf16.mxu1 %v3487_v28  ;;  %v302_v51 = vld [vmem:[#allocation6 + $0xb8] sm:$0xff]  ;;  %v3509_v52 = vpack.c.bf16 %v321_v49, %v309_v48  ;;  %v289_v54 = vld [vmem:[#allocation6 + $0x50] sm:$0xff]  ;;  %v324_v6 = vld [vmem:[#allocation6 + $0x168] sm:$0xff]  ;;  %3512 = vmatprep.subr.bf16.mxu0 %v3511_v3  ;;  %vm842_vm1 = vcmp.gt.s32.totalorder %v4388_v39, %v4386_v38 }
  0x9d   : > { %v3519_v53 = vpack.c.bf16 %v302_v51, %v290_v50  ;;  %v301_v55 = vld [vmem:[#allocation6 + $0xb0] sm:$0xff]  ;;  %v314_v56 = vld [vmem:[#allocation6 + $0x118] sm:$0xff]  ;;  %v3515_v8 = vpack.c.bf16 %v324_v6, %v312_v5  ;;  %v311_v9 = vld [vmem:[#allocation6 + $0x100] sm:$0xff]  ;;  %3514 = vmatpush1.bf16.msra.mxu0 %v3513_v7 }
  0x9e   : > { %3131 = vmatmul.mubr.msk.f32.vlgmr.msra.gmra.mrb[0].mxu1 %vm327_vm0, %v4325_v27  ;;  %3136 = vmatmul.mubr.msk.f32.gmra.mrb[2].mxu0 %vm327_vm0, %v4331_v33  ;;  %v326_v57 = vld [vmem:[#allocation6 + $0x178] sm:$0xff]  ;;  %v3521_v58 = vpack.c.bf16 %v301_v55, %v289_v54  ;;  %v313_v60 = vld [vmem:[#allocation6 + $0x110] sm:$0xff]  ;;  %v323_v10 = vld [vmem:[#allocation6 + $0x160] sm:$0xff] }
  0x9f   : > { %404 = vmatprep.mubr.f32.mxu1 %v4057_v0  ;;  %3490 = vmatpush1.bf16.msra.mxu1 %v3489_v34  ;;  %v3523_v59 = vpack.c.bf16 %v326_v57, %v314_v56  ;;  %v325_v61 = vld [vmem:[#allocation6 + $0x170] sm:$0xff]  ;;  %v3517_v11 = vpack.c.bf16 %v323_v10, %v311_v9  ;;  %v1268_v54 = vld [vmem:[#allocation8 + $0x8] sm:$0xff]  ;;  %v1270_v3 = vld [vmem:[#allocation8 + $0x18] sm:$0xff] }
  0xa0   : > { %706 = vmatprep.mubr.f32.mxu0 %v4057_v0  ;;  %3492 = vmatprep.subr.bf16.mxu1 %v3491_v35  ;;  %v3525_v62 = vpack.c.bf16 %v325_v61, %v313_v60  ;;  %v1269_v2 = vld [vmem:[#allocation8 + $0x10] sm:$0xff]  ;;  %v1271_v7 = vld [vmem:[#allocation8 + $0x20] sm:$0xff] }
  0xa1   : > { %3516 = vmatprep.subr.bf16.mxu0 %v3515_v8  ;;  %v3539_v5 = vpack.c.bf16 %v1270_v3, %v1269_v2  ;;  %v1272_v8 = vld [vmem:[#allocation8 + $0x28] sm:$0xff] }
  0xa2   : > { %3132 = vmatmul.mubr.msk.f32.gmra.mrb[2].mxu1 %vm327_vm0, %v4331_v33  ;;  %3518 = vmatpush1.bf16.msra.mxu0 %v3517_v11  ;;  %v3543_v10 = vpack.c.bf16 %v1272_v8, %v1271_v7  ;;  %v1273_v11 = vld [vmem:[#allocation8 + $0x30] sm:$0xff] }
  0xa3   : > { %475 = vmatprep.mubr.f32.mxu1 %v4057_v0  ;;  %3494 = vmatpush1.bf16.msra.mxu1 %v3493_v40  ;;  %v4391_v40 = vadd.s32 8, %v4386_v38 }
  0xa4   : > { %3504 = vmatprep.subr.bf16.mxu1 %v3503_v41 }
  0xa5   : > { %3139 = vmatmul.mubr.msk.f32.vlgmr.msra.gmra.mrb[4].mxu0 %vm327_vm0, %v4325_v27  ;;  %vm843_vm3 = vcmp.gt.s32.totalorder %v4388_v39, %v4391_v40  ;;  %v1780_v39 = vld [vmem:[#allocation8 + $0xb0] sm:$0xff] }
  0xa6   : > { %3133 = vmatmul.mubr.msk.f32.vlgmr.msra.gmra.mrb[4].mxu1 %vm327_vm0, %v4325_v27  ;;  %712 = vmatprep.mubr.f32.mxu0 %v4057_v0 }
  0xa7   : > { %3506 = vmatpush1.bf16.msra.mxu1 %v3505_v46  ;;  %481 = vmatprep.mubr.f32.mxu1 %v4057_v0 }
  0xa8   : > { %3508 = vmatprep.subr.bf16.mxu1 %v3507_v47 }
  0xa9   : > { %3140 = vmatmul.mubr.msk.f32.gmra.mrb[6].mxu0 %vm327_vm0, %v4331_v33 }
  0xaa   : > { %3134 = vmatmul.mubr.msk.f32.gmra.mrb[6].mxu1 %vm327_vm0, %v4331_v33 }
  0xab   : > { %3510 = vmatpush1.bf16.msra.mxu1 %v3509_v52  ;;  %629 = vmatprep.mubr.f32.mxu1 %v4057_v0 }
  0xac   : > { %3520 = vmatprep.subr.bf16.mxu1 %v3519_v53  ;;  %v1267_v53 = vld [vmem:[#allocation8] sm:$0xff] }
  0xad   : > { %v3535_v55 = vpack.c.bf16 %v1268_v54, %v1267_v53 }
  0xae   : > { %3137 = vmatmul.mubr.msk.f32.vlgmr.msra.gmra.mrb[8].mxu1 %vm327_vm0, %v4325_v27 }
  0xaf   : > { %635 = vmatprep.mubr.f32.mxu1 %v4057_v0  ;;  %3522 = vmatpush1.bf16.msra.mxu1 %v3521_v58 }
  0xb0   : > { %3524 = vmatprep.subr.bf16.mxu1 %v3523_v59 }
  0xb2   : > { %3138 = vmatmul.mubr.msk.f32.gmra.mrb[10].mxu1 %vm327_vm0, %v4331_v33 }
  0xb3   : > { %3526 = vmatpush1.bf16.msra.mxu1 %v3525_v62  ;;  %783 = vmatprep.mubr.f32.mxu1 %v4057_v0 }
  0xb6   : > { %3141 = vmatmul.mubr.msk.f32.vlgmr.msra.gmra.mrb[12].mxu1 %vm327_vm0, %v4325_v27 }
  0xb7   : > { %789 = vmatprep.mubr.f32.mxu1 %v4057_v0 }
  0xba   : > { %3142 = vmatmul.mubr.msk.f32.gmra.mrb[14].mxu1 %vm327_vm0, %v4331_v33 }
 0x16d   : > { %v554_v12 = vpop.f32.mrb[0].mxu0 }
 0x16e   : > { %v556_v13 = vpop.f32.mrb[1].mxu0 }
 0x171   : > { %v400_v14 = vpop.f32.mrb[0].mxu1  ;;  %v560_v15 = vpop.f32.mrb[2].mxu0 }
 0x172   : > { %v4364_v16 = vpop.f32.mrb[1].mxu1  ;;  %3287 = vmatprep.mubr.f32.mxu1 %v400_v14  ;;  %v3527_v17 = vpack.c.bf16 %v560_v15, %v554_v12  ;;  %v562_v18 = vpop.f32.mrb[3].mxu0  ;;  %v1274_v12 = vld [vmem:[#allocation8 + $0x38] sm:$0xff]  ;;  %v1275_v14 = vld [vmem:[#allocation8 + $0x40] sm:$0xff]  ;;  %v1276_v15 = vld [vmem:[#allocation8 + $0x48] sm:$0xff] }
 0x173   : > { %v4366_v19 = vpack.c.bf16 %v562_v18, %v556_v13  ;;  %v3547_v13 = vpack.c.bf16 %v1274_v12, %v1273_v11  ;;  %v1277_v18 = vld [vmem:[#allocation8 + $0x50] sm:$0xff] }
 0x174   : > { %3528 = vmatprep.subr.bf16.mxu1 %v3527_v17 }
 0x175   : > { %v406_v20 = vpop.f32.mrb[2].mxu1  ;;  %3530 = vmatpush3.bf16.xpose.msra.mxu1 %v3527_v17  ;;  %v3551_v17 = vpack.c.bf16 %v1276_v15, %v1275_v14 }
 0x176   : > { %v4368_v21 = vpop.f32.mrb[3].mxu1 }
 0x178   : > { %v708_v47 = vpop.f32.mrb[4].mxu0 }
 0x179   : > { %v4370_v0 = vpop.f32.mrb[4].mxu1  ;;  %v710_v48 = vpop.f32.mrb[5].mxu0 }
 0x17a   : > { %v4372_v22 = vpop.f32.mrb[5].mxu1 }
 0x17c   : > { %3288 = vmatmul.mubr.f32.vlgmr.msra.gmra.mrb[16].mxu1 %v406_v20  ;;  %v714_v49 = vpop.f32.mrb[6].mxu0  ;;  %v1278_v20 = vld [vmem:[#allocation8 + $0x58] sm:$0xff] }
 0x17d   : > { %v4374_v23 = vpop.f32.mrb[6].mxu1  ;;  %v3531_v50 = vpack.c.bf16 %v714_v49, %v708_v47  ;;  %v716_v51 = vpop.f32.mrb[7].mxu0 }
 0x17e   : > { %v4376_v24 = vpop.f32.mrb[7].mxu1  ;;  %v4405_v52 = vpack.c.bf16 %v716_v51, %v710_v48 }
 0x17f   : > { %3532 = vmatprep.subr.bf16.mxu1 %v3531_v50 }
 0x180   : > { %3534 = vmatpush3.bf16.msra.mxu1 %v3531_v50 }
 0x181   : > { %v631_v25 = vpop.f32.mrb[8].mxu1  ;;  %3536 = vmatprep.subr.bf16.mxu1 %v3535_v55 }
 0x182   : > { %v633_v26 = vpop.f32.mrb[9].mxu1 }
 0x185   : > { %v637_v27 = vpop.f32.mrb[10].mxu1 }
 0x186   : > { %v4378_v28 = vpack.c.bf16 %v637_v27, %v631_v25  ;;  %v639_v29 = vpop.f32.mrb[11].mxu1  ;;  %v3555_v25 = vpack.c.bf16 %v1278_v20, %v1277_v18  ;;  %v1280_v27 = vld [vmem:[#allocation8 + $0x68] sm:$0xff] }
 0x187   : > { %v4380_v30 = vpack.c.bf16 %v639_v29, %v633_v26  ;;  %v1279_v26 = vld [vmem:[#allocation8 + $0x60] sm:$0xff] }
 0x188   : > { %v3559_v29 = vpack.c.bf16 %v1280_v27, %v1279_v26 }
 0x189   : > { %v785_v31 = vpop.f32.mrb[12].mxu1 }
 0x18a   : > { %v787_v32 = vpop.f32.mrb[13].mxu1 }
 0x18d   : > { %v791_v33 = vpop.f32.mrb[14].mxu1 }
 0x18e   : > { %v4382_v34 = vpack.c.bf16 %v791_v33, %v785_v31  ;;  %v793_v35 = vpop.f32.mrb[15].mxu1  ;;  %v1281_v31 = vld [vmem:[#allocation8 + $0x70] sm:$0xff] }
 0x18f   : > { %v4384_v36 = vpack.c.bf16 %v793_v35, %v787_v32  ;;  %v1282_v32 = vld [vmem:[#allocation8 + $0x78] sm:$0xff] }
 0x190   : > { %v3563_v33 = vpack.c.bf16 %v1282_v32, %v1281_v31 }
 0x24f   : > { %v3289_v41 = vpop.f32.mrb[16].mxu1 }
 0x250   : > { %v1134_v42 = vpop.f32.mrb[17].mxu1  ;;  %v1144_v45 = vsel %vm843_vm3, -1e+30, %v3289_v41 }
 0x251   : > { %v1143_v43 = vsel %vm842_vm1, -1e+30, %v1134_v42  ;;  %v1149_v46 = vsel %vm1145_vm2, %v1144_v45, -inf }
 0x252   : > { %v1146_v44 = vsel %vm1145_vm2, %v1143_v43, -inf }
 0x253   : > { %1147 = vmax.xlane.f32.xlu0 %v1146_v44 }
 0x257   : > { %1150 = vmax.xlane.f32.xlu0 %v1149_v46 }
 0x2e0   : > { %v1148_v56 = vpop.xlane.xlu0 %1147 }
 0x2e1   : > { %v1152_v57 = vmax.f32 %v1148_v56, -1e+30 }
 0x2e3   : > { %v1160_v58 = vsub.f32 %v1143_v43, %v1152_v57  ;;  %v1154_v37 = vsub.f32 -1e+30, %v1152_v57 }
 0x2e4   : > { %v1151_v59 = vpop.xlane.xlu0 %1150 }
 0x2e5   : > { %v1162_v60 = vmul.f32 1.442695, %v1160_v58  ;;  %v1153_v61 = vmax.f32 %v1151_v59, -1e+30  ;;  %v1156_v42 = vmul.f32 1.442695, %v1154_v37 }
 0x2e7   : > { %v1161_v62 = vsub.f32 %v1144_v45, %v1153_v61  ;;  %3795 = vpow2.f32 %v1162_v60  ;;  %v1155_v35 = vsub.f32 -1e+30, %v1153_v61 }
 0x2e9   : > { %v1164_v63 = vmul.f32 1.442695, %v1161_v62  ;;  %v1158_v41 = vmul.f32 1.442695, %v1155_v35 }
 0x2eb   : > { %3797 = vpow2.f32 %v1164_v63 }
 0x2ec   : > { %3799 = vpow2.f32 %v1158_v41 }
 0x2ed   : > { %3801 = vpow2.f32 %v1156_v42 }
 0x2f1   : > { %v3796_v1 = vpop.eup %3795 }
 0x2f2   : > { %3294 = vmatprep.mubr.msk.f32.mxu1 %vm1145_vm2, %v3796_v1  ;;  %v1168_v4 = vsel %vm1145_vm2, %v3796_v1, 0.0 }
 0x2f3   : > { %1169 = vadd.xlane.f32.xlu1 %v1168_v4 }
 0x2f5   : > { %v3798_v6 = vpop.eup %3797 }
 0x2f6   : > { %3295 = vmatmul.mubr.msk.f32.vlgmr.msra.gmra.mrb[18].mxu1 %vm1145_vm2, %v3798_v6  ;;  %v1171_v9 = vsel %vm1145_vm2, %v3798_v6, 0.0  ;;  %v3800_v44 = vpop.eup %3799 }
 0x2f7   : > { %3538 = vmatpush3.bf16.msra.mxu1 %v3535_v55  ;;  %1172 = vadd.xlane.f32.xlu1 %v1171_v9  ;;  %v3802_v45 = vpop.eup %3801  ;;  %v1167_v47 = vmul.f32 0.0, %v3800_v44 }
 0x2f8   : > { %3540 = vmatprep.subr.bf16.mxu1 %v3539_v5  ;;  %v1166_v48 = vmul.f32 0.0, %v3802_v45 }
 0x2fb   : > { %3542 = vmatpush3.bf16.msra.mxu1 %v3539_v5 }
 0x2fc   : > { %3544 = vmatprep.subr.bf16.mxu1 %v3543_v10 }
 0x2ff   : > { %3546 = vmatpush3.bf16.msra.mxu1 %v3543_v10 }
 0x300   : > { %3548 = vmatprep.subr.bf16.mxu1 %v3547_v13 }
 0x303   : > { %3550 = vmatpush3.bf16.msra.mxu1 %v3547_v13 }
 0x304   : > { %3552 = vmatprep.subr.bf16.mxu1 %v3551_v17 }
 0x307   : > { %3554 = vmatpush3.bf16.msra.mxu1 %v3551_v17 }
 0x308   : > { %3556 = vmatprep.subr.bf16.mxu1 %v3555_v25 }
 0x30b   : > { %3558 = vmatpush3.bf16.msra.mxu1 %v3555_v25 }
 0x30c   : > { %3560 = vmatprep.subr.bf16.mxu1 %v3559_v29 }
 0x30f   : > { %3562 = vmatpush3.bf16.msra.mxu1 %v3559_v29 }
 0x310   : > { %3564 = vmatprep.subr.bf16.mxu1 %v3563_v33 }
 0x313   : > { %3566 = vmatpush3.bf16.msra.mxu1 %v3563_v33 }
 0x314   : > { %3568 = vmatprep.subr.bf16.mxu1 %v4366_v19 }
 0x380   : > { %v1170_v43 = vpop.xlane.xlu1 %1169 }
 0x381   : > { %v1174_v50 = vadd.f32 %v1170_v43, %v1166_v48 }
 0x384   : > { %v1173_v46 = vpop.xlane.xlu1 %1172 }
 0x385   : > { %v1175_v49 = vadd.f32 %v1173_v46, %v1167_v47 }
 0x387   : > { %3803 = vrcp.f32 %v1175_v49  ;;  %v1775_v49 = vld [vmem:[#allocation8 + $0x88] sm:$0xff] }
 0x388   : > { %3805 = vrcp.f32 %v1174_v50  ;;  %v1776_v50 = vld [vmem:[#allocation8 + $0x90] sm:$0xff] }
 0x391   : > { %v3804_v55 = vpop.eup %3803 }
 0x392   : > { %v3806_v57 = vpop.eup %3805 }
 0x3c9   : > { %v3296_v51 = vpop.f32.mrb[18].mxu1 }
 0x3ca   : > { %v1260_v53 = vadd.f32 %v3296_v51, %v1167_v47  ;;  %v1250_v54 = vpop.f32.mrb[19].mxu1 }
 0x3cb   : > { %v1259_v56 = vadd.f32 %v1250_v54, %v1166_v48  ;;  %v1774_v48 = vld [vmem:[#allocation8 + $0x80] sm:$0xff] }
 0x3cc   : > { %v1266_v58 = vmul.f32 %v3804_v55, %v1260_v53  ;;  %v3575_v51 = vpack.c.bf16 %v1775_v49, %v1774_v48  ;;  %v1777_v53 = vld [vmem:[#allocation8 + $0x98] sm:$0xff]  ;;  %v1778_v55 = vld [vmem:[#allocation8 + $0xa0] sm:$0xff] }
 0x3cd   : > { %v1265_v59 = vmul.f32 %v3806_v57, %v1259_v56  ;;  %v3579_v54 = vpack.c.bf16 %v1777_v53, %v1776_v50  ;;  %v1779_v56 = vld [vmem:[#allocation8 + $0xa8] sm:$0xff] }
 0x3ce   : > { %3576 = vmatprep.subr.bf16.mxu0 %v3575_v51 }
 0x3cf   : > { %3329 = vmatprep.mubr.f32.mxu1 %v1265_v59  ;;  %3578 = vmatpush3.bf16.msra.mxu0 %v3575_v51 }
 0x3d0   : > { %3330 = vmatmul.mubr.f32.vlgmr.msra.gmra.mrb[20].mxu1 %v1266_v58  ;;  %3580 = vmatprep.subr.bf16.mxu0 %v3579_v54 }
 0x3d1   : > { %3570 = vmatpush3.bf16.xpose.msra.mxu1 %v4366_v19  ;;  %3336 = vmatprep.mubr.f32.mxu1 %v4364_v16 }
 0x3d2   : > { %3572 = vmatprep.subr.bf16.mxu1 %v4405_v52 }
 0x3d3   : > { %3582 = vmatpush3.bf16.msra.mxu0 %v3579_v54 }
 0x3d8   : > { %3337 = vmatmul.mubr.f32.vlgmr.msra.gmra.mrb[22].mxu1 %v4368_v21 }
 0x3d9   : > { %3574 = vmatpush3.bf16.msra.mxu1 %v4405_v52 }
 0x3da   : > { %3608 = vmatprep.subr.bf16.mxu1 %v4378_v28 }
 0x4a3   : > { %v4418_v60 = vpop.f32.mrb[20].mxu1 }
 0x4a4   : > { %v4420_v61 = vpop.f32.mrb[21].mxu1 }
 0x4ab   : > { %v3338_v62 = vpop.f32.mrb[22].mxu1 }
 0x4ac   : > { %v1652_v63 = vsel %vm843_vm3, -1e+30, %v3338_v62  ;;  %v1642_v19 = vpop.f32.mrb[23].mxu1 }
 0x4ad   : > { %v1651_v16 = vsel %vm842_vm1, -1e+30, %v1642_v19  ;;  %v1656_v21 = vsel %vm1145_vm2, %v1652_v63, -inf }
 0x4ae   : > { %1657 = vmax.xlane.f32.xlu1 %v1656_v21  ;;  %v1653_v52 = vsel %vm1145_vm2, %v1651_v16, -inf }
 0x4af   : > { %1654 = vmax.xlane.f32.xlu0 %v1653_v52 }
 0x53b   : > { %v1658_v1 = vpop.xlane.xlu1 %1657 }
 0x53c   : > { %v1660_v2 = vmax.f32 %v1658_v1, -1e+30  ;;  %v1655_v3 = vpop.xlane.xlu0 %1654 }
 0x53d   : > { %v1659_v4 = vmax.f32 %v1655_v3, -1e+30 }
 0x53e   : > { %v1668_v5 = vsub.f32 %v1652_v63, %v1660_v2  ;;  %v1662_v11 = vsub.f32 -1e+30, %v1660_v2 }
 0x53f   : > { %v1667_v6 = vsub.f32 %v1651_v16, %v1659_v4  ;;  %v1661_v12 = vsub.f32 -1e+30, %v1659_v4 }
 0x540   : > { %v1671_v8 = vmul.f32 1.442695, %v1668_v5  ;;  %v1665_v13 = vmul.f32 1.442695, %v1662_v11  ;;  %v1781_v11 = vld [vmem:[#allocation8 + $0xb8] sm:$0xff] }
 0x541   : > { %v1669_v7 = vmul.f32 1.442695, %v1667_v6  ;;  %v1663_v14 = vmul.f32 1.442695, %v1661_v12  ;;  %v3587_v12 = vpack.c.bf16 %v1781_v11, %v1780_v39  ;;  %v2294_v39 = vld [vmem:[#allocation8 + $0x168] sm:$0xff] }
 0x543   : > { %3807 = vpow2.f32 %v1669_v7 }
 0x544   : > { %3809 = vpow2.f32 %v1671_v8 }
 0x545   : > { %3811 = vpow2.f32 %v1665_v13  ;;  %v1782_v13 = vld [vmem:[#allocation8 + $0xc0] sm:$0xff] }
 0x546   : > { %3813 = vpow2.f32 %v1663_v14  ;;  %v1783_v14 = vld [vmem:[#allocation8 + $0xc8] sm:$0xff] }
 0x54d   : > { %v4430_v9 = vpop.eup %3807 }
 0x54e   : > { %v4432_v10 = vpop.eup %3809  ;;  %3343 = vmatprep.mubr.msk.f32.mxu1 %vm1145_vm2, %v4430_v9  ;;  %v1675_v8 = vsel %vm1145_vm2, %v4430_v9, 0.0 }
 0x54f   : > { %3344 = vmatmul.mubr.msk.f32.vlgmr.msra.gmra.mrb[24].mxu1 %vm1145_vm2, %v4432_v10  ;;  %v3812_v15 = vpop.eup %3811  ;;  %v1678_v7 = vsel %vm1145_vm2, %v4432_v10, 0.0  ;;  %v1784_v10 = vld [vmem:[#allocation8 + $0xd0] sm:$0xff] }
 0x550   : > { %3610 = vmatpush3.bf16.xpose.msra.mxu1 %v4378_v28  ;;  %3385 = vmatprep.mubr.f32.mxu1 %v4370_v0  ;;  %v3814_v17 = vpop.eup %3813  ;;  %v4444_v18 = vmul.f32 0.0, %v3812_v15  ;;  %v3591_v15 = vpack.c.bf16 %v1783_v14, %v1782_v13  ;;  %v2296_v13 = vld [vmem:[#allocation8 + $0x178] sm:$0xff] }
 0x551   : > { %3612 = vmatprep.subr.bf16.mxu1 %v4382_v34  ;;  %v4446_v0 = vmul.f32 0.0, %v3814_v17  ;;  %v1785_v17 = vld [vmem:[#allocation8 + $0xd8] sm:$0xff] }
 0x552   : > { %v3595_v9 = vpack.c.bf16 %v1785_v17, %v1784_v10  ;;  %v2789_v10 = vld [vmem:[#allocation8 + $0x188] sm:$0xff] }
 0x557   : > { %3386 = vmatmul.mubr.f32.vlgmr.msra.gmra.mrb[26].mxu1 %v4374_v23 }
 0x558   : > { %3614 = vmatpush3.bf16.msra.mxu1 %v4382_v34 }
 0x559   : > { %3648 = vmatprep.subr.bf16.mxu1 %v4380_v30 }
 0x622   : > { %v3345_v28 = vpop.f32.mrb[24].mxu1 }
 0x623   : > { %v4449_v20 = vadd.f32 %v3345_v28, %v4444_v18  ;;  %v1757_v23 = vpop.f32.mrb[25].mxu1  ;;  %v1786_v28 = vld [vmem:[#allocation8 + $0xe0] sm:$0xff] }
 0x624   : > { %v4452_v34 = vadd.f32 %v1757_v23, %v4446_v0  ;;  %v1787_v23 = vld [vmem:[#allocation8 + $0xe8] sm:$0xff] }
 0x62a   : > { %v3387_v25 = vpop.f32.mrb[26].mxu1 }
 0x62b   : > { %v2159_v26 = vsel %vm843_vm3, -1e+30, %v3387_v25  ;;  %v2149_v27 = vpop.f32.mrb[27].mxu1  ;;  %v1788_v25 = vld [vmem:[#allocation8 + $0xf0] sm:$0xff] }
 0x62c   : > { %v2158_v29 = vsel %vm842_vm1, -1e+30, %v2149_v27  ;;  %v2163_v31 = vsel %vm1145_vm2, %v2159_v26, -inf  ;;  %v1789_v27 = vld [vmem:[#allocation8 + $0xf8] sm:$0xff] }
 0x62d   : > { %2164 = vmax.xlane.f32.xlu1 %v2163_v31  ;;  %v2160_v32 = vsel %vm1145_vm2, %v2158_v29, -inf  ;;  %v2281_v31 = vld [vmem:[#allocation8 + $0x100] sm:$0xff] }
 0x62e   : > { %2161 = vmax.xlane.f32.xlu0 %v2160_v32  ;;  %v2282_v32 = vld [vmem:[#allocation8 + $0x108] sm:$0xff] }
 0x6ba   : > { %v2165_v33 = vpop.xlane.xlu1 %2164 }
 0x6bb   : > { %v2167_v35 = vmax.f32 %v2165_v33, -1e+30  ;;  %v2162_v37 = vpop.xlane.xlu0 %2161  ;;  %v3615_v33 = vpack.c.bf16 %v2282_v32, %v2281_v31  ;;  %v2795_v31 = vld [vmem:[#allocation8 + $0x1b8] sm:$0xff] }
 0x6bc   : > { %v2166_v41 = vmax.f32 %v2162_v37, -1e+30 }
 0x6bd   : > { %v2175_v42 = vsub.f32 %v2159_v26, %v2167_v35  ;;  %v3599_v26 = vpack.c.bf16 %v1787_v23, %v1786_v28  ;;  %v2791_v28 = vld [vmem:[#allocation8 + $0x198] sm:$0xff] }
 0x6be   : > { %v2174_v43 = vsub.f32 %v2158_v29, %v2166_v41  ;;  %v2168_v57 = vsub.f32 -1e+30, %v2166_v41  ;;  %v3603_v29 = vpack.c.bf16 %v1789_v27, %v1788_v25  ;;  %v2792_v25 = vld [vmem:[#allocation8 + $0x1a0] sm:$0xff] }
 0x6bf   : > { %v2178_v45 = vmul.f32 1.442695, %v2175_v42 }
 0x6c0   : > { %v2176_v44 = vmul.f32 1.442695, %v2174_v43  ;;  %v2170_v58 = vmul.f32 1.442695, %v2168_v57  ;;  %v2283_v57 = vld [vmem:[#allocation8 + $0x110] sm:$0xff] }
 0x6c2   : > { %3815 = vpow2.f32 %v2176_v44 }
 0x6c3   : > { %3817 = vpow2.f32 %v2178_v45 }
 0x6cc   : > { %v3816_v46 = vpop.eup %3815 }
 0x6cd   : > { %v3818_v47 = vpop.eup %3817  ;;  %3392 = vmatprep.mubr.msk.f32.mxu1 %vm1145_vm2, %v3816_v46  ;;  %v2182_v38 = vsel %vm1145_vm2, %v3816_v46, 0.0 }
 0x6ce   : > { %3393 = vmatmul.mubr.msk.f32.vlgmr.msra.gmra.mrb[28].mxu1 %vm1145_vm2, %v3818_v47  ;;  %v2185_v40 = vsel %vm1145_vm2, %v3818_v47, 0.0 }
 0x6cf   : > { %3650 = vmatpush3.bf16.xpose.msra.mxu1 %v4380_v30  ;;  %3434 = vmatprep.mubr.f32.mxu1 %v4372_v22  ;;  %v3583_v30 = vpack.c.bf16 %v1779_v56, %v1778_v55  ;;  %v2169_v22 = vsub.f32 -1e+30, %v2167_v35 }
 0x6d0   : > { %3652 = vmatprep.subr.bf16.mxu1 %v4384_v36 }
 0x6d1   : > { %3584 = vmatprep.subr.bf16.mxu0 %v3583_v30 }
 0x6d2   : > { %3586 = vmatpush3.bf16.msra.mxu0 %v3583_v30 }
 0x6d3   : > { %3588 = vmatprep.subr.bf16.mxu0 %v3587_v12 }
 0x6d6   : > { %3435 = vmatmul.mubr.f32.vlgmr.msra.gmra.mrb[30].mxu1 %v4376_v24  ;;  %v2172_v24 = vmul.f32 1.442695, %v2169_v22  ;;  %3590 = vmatpush3.bf16.msra.mxu0 %v3587_v12  ;;  %v2295_v12 = vld [vmem:[#allocation8 + $0x170] sm:$0xff] }
 0x6d7   : > { %3654 = vmatpush3.bf16.msra.mxu1 %v4384_v36  ;;  %3592 = vmatprep.subr.bf16.mxu0 %v3591_v15  ;;  %v3643_v14 = vpack.c.bf16 %v2296_v13, %v2295_v12 }
 0x6d8   : > { %3819 = vpow2.f32 %v2172_v24  ;;  %v2284_v24 = vld [vmem:[#allocation8 + $0x118] sm:$0xff] }
 0x6d9   : > { %3821 = vpow2.f32 %v2170_v58 }
 0x6da   : > { %3594 = vmatpush3.bf16.msra.mxu0 %v3591_v15  ;;  %v2788_v15 = vld [vmem:[#allocation8 + $0x180] sm:$0xff] }
 0x6db   : > { %3596 = vmatprep.subr.bf16.mxu0 %v3595_v9  ;;  %v3655_v17 = vpack.c.bf16 %v2789_v10, %v2788_v15 }
 0x6de   : > { %3598 = vmatpush3.bf16.msra.mxu0 %v3595_v9  ;;  %v2790_v9 = vld [vmem:[#allocation8 + $0x190] sm:$0xff] }
 0x6df   : > { %3600 = vmatprep.subr.bf16.mxu0 %v3599_v26  ;;  %v3659_v23 = vpack.c.bf16 %v2791_v28, %v2790_v9 }
 0x6e2   : > { %v3820_v36 = vpop.eup %3819  ;;  %3602 = vmatpush3.bf16.msra.mxu0 %v3599_v26  ;;  %v2793_v26 = vld [vmem:[#allocation8 + $0x1a8] sm:$0xff] }
 0x6e3   : > { %v3822_v59 = vpop.eup %3821  ;;  %v4469_v62 = vmul.f32 0.0, %v3820_v36  ;;  %3604 = vmatprep.subr.bf16.mxu0 %v3603_v29  ;;  %v3663_v27 = vpack.c.bf16 %v2793_v26, %v2792_v25 }
 0x6e4   : > { %v4471_v19 = vmul.f32 0.0, %v3822_v59 }
 0x6e6   : > { %3606 = vmatpush3.bf16.msra.mxu0 %v3603_v29  ;;  %v2794_v29 = vld [vmem:[#allocation8 + $0x1b0] sm:$0xff] }
 0x6e7   : > { %3616 = vmatprep.subr.bf16.mxu0 %v3615_v33  ;;  %v3667_v32 = vpack.c.bf16 %v2795_v31, %v2794_v29 }
 0x7a1   : > { %v3394_v63 = vpop.f32.mrb[28].mxu1 }
 0x7a2   : > { %v4474_v16 = vadd.f32 %v3394_v63, %v4469_v62  ;;  %v2264_v21 = vpop.f32.mrb[29].mxu1 }
 0x7a3   : > { %v4477_v52 = vadd.f32 %v2264_v21, %v4471_v19 }
 0x7a9   : > { %v3436_v1 = vpop.f32.mrb[30].mxu1 }
 0x7aa   : > { %v2666_v2 = vsel %vm843_vm3, -1e+30, %v3436_v1  ;;  %v2656_v3 = vpop.f32.mrb[31].mxu1 }
 0x7ab   : > { %v2665_v4 = vsel %vm842_vm1, -1e+30, %v2656_v3  ;;  %v2670_v5 = vsel %vm1145_vm2, %v2666_v2, -inf  ;;  %v2286_v3 = vld [vmem:[#allocation8 + $0x128] sm:$0xff] }
 0x7ac   : > { %2671 = vmax.xlane.f32.xlu1 %v2670_v5  ;;  %v2667_v6 = vsel %vm1145_vm2, %v2665_v4, -inf  ;;  %v2287_v5 = vld [vmem:[#allocation8 + $0x130] sm:$0xff] }
 0x7ad   : > { %2668 = vmax.xlane.f32.xlu0 %v2667_v6  ;;  %v2288_v6 = vld [vmem:[#allocation8 + $0x138] sm:$0xff] }
 0x7b0   : > { %1679 = vadd.xlane.f32.xlu1 %v1678_v7  ;;  %v2290_v7 = vld [vmem:[#allocation8 + $0x148] sm:$0xff] }
 0x7b1   : > { %1676 = vadd.xlane.f32.xlu0 %v1675_v8  ;;  %v2291_v8 = vld [vmem:[#allocation8 + $0x150] sm:$0xff] }
 0x7b4   : > { %2186 = vadd.xlane.f32.xlu1 %v2185_v40  ;;  %v2292_v40 = vld [vmem:[#allocation8 + $0x158] sm:$0xff] }
 0x7b5   : > { %2183 = vadd.xlane.f32.xlu0 %v2182_v38  ;;  %v2293_v38 = vld [vmem:[#allocation8 + $0x160] sm:$0xff] }
 0x7b6   : > { %v3639_v11 = vpack.c.bf16 %v2294_v39, %v2293_v38 }
 0x839   : > { %v4493_v35 = vpop.xlane.xlu1 %2671 }
 0x83a   : > { %v2674_v37 = vmax.f32 %v4493_v35, -1e+30  ;;  %v4496_v41 = vpop.xlane.xlu0 %2668 }
 0x83b   : > { %v2673_v42 = vmax.f32 %v4496_v41, -1e+30 }
 0x83c   : > { %v2682_v43 = vsub.f32 %v2666_v2, %v2674_v37  ;;  %v2285_v2 = vld [vmem:[#allocation8 + $0x120] sm:$0xff] }
 0x83d   : > { %v2681_v44 = vsub.f32 %v2665_v4, %v2673_v42  ;;  %v1680_v45 = vpop.xlane.xlu1 %1679  ;;  %v3623_v4 = vpack.c.bf16 %v2286_v3, %v2285_v2  ;;  %v3143_v2 = vld [vmem:[#allocation9] ss:$0 sm:$0xff] }
 0x83e   : > { %v2685_v46 = vmul.f32 1.442695, %v2682_v43  ;;  %v1677_v47 = vpop.xlane.xlu0 %1676  ;;  %v1682_v49 = vadd.f32 %v1680_v45, %v4444_v18  ;;  %v2797_v43 = vld [vmem:[#allocation8 + $0x1c8] sm:$0xff]  ;;  %v2798_v45 = vld [vmem:[#allocation8 + $0x1d0] sm:$0xff]  ;;  %v1359_v3 = vadd.f32 %v4418_v60, %v3143_v2 }
 0x83f   : > { %v2683_v48 = vmul.f32 1.442695, %v2681_v44  ;;  %v1681_v50 = vadd.f32 %v1677_v47, %v4446_v0 }
 0x840   : > { %3823 = vpow2.f32 %v2685_v46  ;;  %v2799_v46 = vld [vmem:[#allocation8 + $0x1d8] sm:$0xff] }
 0x841   : > { %v2187_v51 = vpop.xlane.xlu1 %2186  ;;  %3825 = vpow2.f32 %v2683_v48  ;;  %v3675_v47 = vpack.c.bf16 %v2799_v46, %v2798_v45  ;;  %v2800_v48 = vld [vmem:[#allocation8 + $0x1e0] sm:$0xff] }
 0x842   : > { %v2189_v53 = vadd.f32 %v2187_v51, %v4469_v62  ;;  %v2184_v54 = vpop.xlane.xlu0 %2183  ;;  %3827 = vrcp.f32 %v1682_v49  ;;  %v2801_v49 = vld [vmem:[#allocation8 + $0x1e8] sm:$0xff]  ;;  %v2802_v51 = vld [vmem:[#allocation8 + $0x1f0] sm:$0xff] }
 0x843   : > { %v2188_v55 = vadd.f32 %v2184_v54, %v4471_v19  ;;  %3829 = vrcp.f32 %v1681_v50  ;;  %v3619_v19 = vpack.c.bf16 %v2284_v24, %v2283_v57  ;;  %v3679_v50 = vpack.c.bf16 %v2801_v49, %v2800_v48 }
 0x844   : > { %3831 = vrcp.f32 %v2189_v53  ;;  %v2803_v53 = vld [vmem:[#allocation8 + $0x1f8] sm:$0xff] }
 0x845   : > { %3833 = vrcp.f32 %v2188_v55  ;;  %v3683_v54 = vpack.c.bf16 %v2803_v53, %v2802_v51  ;;  %v2676_v55 = vsub.f32 -1e+30, %v2674_v37 }
 0x84a   : > { %v3824_v56 = vpop.eup %3823 }
 0x84b   : > { %v2692_v30 = vsel %vm1145_vm2, %v3824_v56, 0.0  ;;  %v3826_v22 = vpop.eup %3825 }
 0x84c   : > { %2693 = vadd.xlane.f32.xlu1 %v2692_v30  ;;  %v3828_v18 = vpop.eup %3827  ;;  %3441 = vmatprep.mubr.msk.f32.mxu1 %vm1145_vm2, %v3826_v22  ;;  %v2689_v0 = vsel %vm1145_vm2, %v3826_v22, 0.0  ;;  %v2679_v30 = vmul.f32 1.442695, %v2676_v55 }
 0x84d   : > { %v3830_v58 = vpop.eup %3829  ;;  %3442 = vmatmul.mubr.msk.f32.vlgmr.msra.gmra.mrb[32].mxu1 %vm1145_vm2, %v3824_v56  ;;  %2690 = vadd.xlane.f32.xlu0 %v2689_v0  ;;  %v1773_v36 = vmul.f32 %v3828_v18, %v4449_v20  ;;  %v3627_v20 = vpack.c.bf16 %v2288_v6, %v2287_v5  ;;  %v2675_v56 = vsub.f32 -1e+30, %v2673_v42 }
 0x84e   : > { %v3832_v59 = vpop.eup %3831  ;;  %v1772_v62 = vmul.f32 %v3830_v58, %v4452_v34  ;;  %v2289_v34 = vld [vmem:[#allocation8 + $0x140] sm:$0xff]  ;;  %3835 = vpow2.f32 %v2679_v30 }
 0x84f   : > { %v3834_v63 = vpop.eup %3833  ;;  %v2280_v21 = vmul.f32 %v3832_v59, %v4474_v16  ;;  %v3631_v16 = vpack.c.bf16 %v2290_v7, %v2289_v34  ;;  %v2677_v22 = vmul.f32 1.442695, %v2675_v56 }
 0x850   : > { %3378 = vmatprep.mubr.f32.mxu0 %v1772_v62  ;;  %v2279_v1 = vmul.f32 %v3834_v63, %v4477_v52  ;;  %v3635_v52 = vpack.c.bf16 %v2292_v40, %v2291_v8 }
 0x851   : > { %3379 = vmatmul.mubr.f32.vlgmr.msra.gmra.mrb[8].mxu0 %v1773_v36  ;;  %3837 = vpow2.f32 %v2677_v22 }
 0x852   : > { %3618 = vmatpush3.bf16.msra.mxu0 %v3615_v33  ;;  %3427 = vmatprep.mubr.f32.mxu0 %v2279_v1  ;;  %v2796_v33 = vld [vmem:[#allocation8 + $0x1c0] sm:$0xff] }
 0x853   : > { %3620 = vmatprep.subr.bf16.mxu0 %v3619_v19  ;;  %v3671_v44 = vpack.c.bf16 %v2797_v43, %v2796_v33 }
 0x856   : > { %3622 = vmatpush3.bf16.msra.mxu0 %v3619_v19 }
 0x857   : > { %3624 = vmatprep.subr.bf16.mxu0 %v3623_v4 }
 0x858   : > { %v3836_v18 = vpop.eup %3835 }
 0x859   : > { %v2688_v24 = vmul.f32 0.0, %v3836_v18 }
 0x85a   : > { %3626 = vmatpush3.bf16.msra.mxu0 %v3623_v4  ;;  %v1358_v4 = vadd.f32 %v3143_v2, %v4420_v61 }
 0x85b   : > { %3628 = vmatprep.subr.bf16.mxu0 %v3627_v20  ;;  %v3838_v0 = vpop.eup %3837 }
 0x85c   : > { %v2687_v36 = vmul.f32 0.0, %v3838_v0 }
 0x85e   : > { %3630 = vmatpush3.bf16.msra.mxu0 %v3627_v20 }
 0x85f   : > { %3632 = vmatprep.subr.bf16.mxu0 %v3631_v16 }
 0x862   : > { %3634 = vmatpush3.bf16.msra.mxu0 %v3631_v16 }
 0x863   : > { %3636 = vmatprep.subr.bf16.mxu0 %v3635_v52 }
 0x866   : > { %3638 = vmatpush3.bf16.msra.mxu0 %v3635_v52 }
 0x867   : > { %3640 = vmatprep.subr.bf16.mxu0 %v3639_v11 }
 0x86a   : > { %3642 = vmatpush3.bf16.msra.mxu0 %v3639_v11 }
 0x86b   : > { %3644 = vmatprep.subr.bf16.mxu0 %v3643_v14 }
 0x86e   : > { %3646 = vmatpush3.bf16.msra.mxu0 %v3643_v14 }
 0x86f   : > { %3656 = vmatprep.subr.bf16.mxu0 %v3655_v17 }
 0x871   : > { %3428 = vmatmul.mubr.f32.vlgmr.msra.gmra.mrb[8].mxu0 %v2280_v21 }
 0x872   : > { %3658 = vmatpush3.bf16.msra.mxu0 %v3655_v17 }
 0x873   : > { %3660 = vmatprep.subr.bf16.mxu0 %v3659_v23 }
 0x876   : > { %3662 = vmatpush3.bf16.msra.mxu0 %v3659_v23 }
 0x877   : > { %3664 = vmatprep.subr.bf16.mxu0 %v3663_v27 }
 0x87a   : > { %3666 = vmatpush3.bf16.msra.mxu0 %v3663_v27 }
 0x87b   : > { %3668 = vmatprep.subr.bf16.mxu0 %v3667_v32 }
 0x87e   : > { %3670 = vmatpush3.bf16.msra.mxu0 %v3667_v32 }
 0x87f   : > { %3672 = vmatprep.subr.bf16.mxu0 %v3671_v44 }
 0x882   : > { %3674 = vmatpush3.bf16.msra.mxu0 %v3671_v44 }
 0x883   : > { %3676 = vmatprep.subr.bf16.mxu0 %v3675_v47 }
 0x886   : > { %3678 = vmatpush3.bf16.msra.mxu0 %v3675_v47 }
 0x887   : > { %3680 = vmatprep.subr.bf16.mxu0 %v3679_v50 }
 0x88a   : > { %3682 = vmatpush3.bf16.msra.mxu0 %v3679_v50 }
 0x88b   : > { %3684 = vmatprep.subr.bf16.mxu0 %v3683_v54 }
 0x88e   : > { %3686 = vmatpush3.bf16.msra.mxu0 %v3683_v54 }
 0x8d9   : > { %v2694_v57 = vpop.xlane.xlu1 %2693 }
 0x8da   : > { %v2691_v58 = vpop.xlane.xlu0 %2690  ;;  %v2696_v59 = vadd.f32 %v2694_v57, %v2688_v24 }
 0x8db   : > { %v2695_v62 = vadd.f32 %v2691_v58, %v2687_v36 }
 0x8dc   : > { %3839 = vrcp.f32 %v2696_v59 }
 0x8dd   : > { %3841 = vrcp.f32 %v2695_v62 }
 0x8e6   : > { %v3840_v42 = vpop.eup %3839 }
 0x8e7   : > { %v3842_v19 = vpop.eup %3841 }
 0x920   : > { %v3443_v35 = vpop.f32.mrb[32].mxu1 }
 0x921   : > { %v2781_v37 = vadd.f32 %v3443_v35, %v2688_v24  ;;  %v2771_v41 = vpop.f32.mrb[33].mxu1 }
 0x922   : > { %v2780_v63 = vadd.f32 %v2771_v41, %v2687_v36 }
 0x923   : > { %v2787_v21 = vmul.f32 %v3840_v42, %v2781_v37 }
 0x924   : > { %v2786_v1 = vmul.f32 %v3842_v19, %v2780_v63 }
 0x926   : > { %3476 = vmatprep.mubr.f32.mxu0 %v2786_v1 }
 0x927   : > { %3477 = vmatmul.mubr.f32.vlgmr.msra.gmra.mrb[8].mxu0 %v2787_v21 }
 0x9fa   : > { %v3478_v5 = vpop.f32.mrb[8].mxu0 }
 0x9fb   : > { %v3688_v6 = vadd.f32 %v3478_v5, %v1359_v3  ;;  %v2870_v20 = vpop.f32.mrb[9].mxu0 }
 0x9fc   : > { %v3690_v34 = vadd.f32 %v2870_v20, %v1358_v4 }
 0x9fd   : > { %2883 = vst.msk [vmem:[%s271_s23 + $0x8] sm:$0xff] %vm2881_vm4, %v3688_v6 }
 0x9fe   : > { %2882 = vst.msk [vmem:[%s271_s23] sm:$0xff] %vm2881_vm4, %v3690_v34 }
 0x9ff   : > { %3970 = shalt.err (!%p3967_p0)
}
 0xa00   : > { %s3971_s24 = scalar_lea.hbm %s4529_s5, 256  ;;  %s3975_s30 = scalar_lea.hbm %s4582_s4, 512 }
 0xa01   : > { %p3972_p4 = scmp.ne.s32.totalorder %s4529_s5, %s3971_s24  ;;  %p3976_p12 = scmp.lt.u32.totalorder %s4529_s5, %s4582_s4 }
 0xa02   : > { %p3977_p1 = scmp.lt.u32.totalorder %s3975_s30, %s3971_s24  ;;  %p3979_p13 = scmp.lt.u32.totalorder %s3971_s24, %s4529_s5 }
 0xa03   : > { %p3973_p8 = pnand %p3972_p4, %p4243_p3 }
 0xa04   : > { %p3978_p7 = por %p3977_p1, %p3976_p12 }
 0xa05   : > { %p3974_p2 = pneg %p3973_p8 }
 0xa06   : > { %p3980_p6 = por %p3979_p13, %p3978_p7 }
 0xa08   : > { %p3981_p10 = pnand %p3980_p6, %p3974_p2 }
 0xa0a   : > { %3984 = shalt.err (!%p3981_p10)
}
 0xa0b   : > { %s4059_s23 = smov 128   ;;  %s4060_s27 = smov 8  }
 0xa0c   : > { %3709 = dma.vmem_to_hbm [thread:$0]  (%p4243_p3), %s4524_s25, 256, %s4529_s5, %s2885_s18, %s4059_s23, %s4059_s23, %s4060_s27  }
 0xa0d PF: > { %s2915_s22 = sand.u32 1, %s4027_s15   ;;  %p4603_p11 = scmp.ne.s32.totalorder %s4591_s26, 0 }
 0xa0e   : > { %p4604_p5 = scmp.ge.s32.totalorder %s4047_s20, 2  ;;  %s2916_s28 = scalar_lea.sflag [#allocation5], %s2915_s22 }
 0xa10   : > { %p3726_p9 = pnand %p4604_p5, %p4603_p11 }
 0xa12   : > { %4022 = dma.done.wait (!%p3726_p9), %s2916_s28, 256  }
 0xa13   : > { %4024 = vsyncadd (!%p3726_p9), %s2916_s28, 4294967040  ;;  %s22_s20 = sadd.s32 1, %s4047_s20   ;;  %s4605_s15 = smov %s4031_s16 }
 0xa14   : > { %p19_p0 = scmp.ge.s32.totalorder %s22_s20, 4   ;;  %s4606_s16 = smov %s4035_s17 }
 0xa15   : > { %s4607_s17 = smov %s4252_s14  ;;  %s4608_s18 = smov %s4043_s19 }
 0xa16   : > { %s4609_s19 = smov %s4611_s1  ;;  %21 = sbr.rel (!%p19_p0) target bundleno = 10 (0xa), region = 175 }
 0xa1d   :  { %2921 = vsyncpa [#allocation4], 1 }
 0xa1e   :  { %2923 = vsyncpa [#allocation4 + $0x1], 1 }
 0xa1f   :  { %2924 = vsyncpa [#allocation7], 1 }
 0xa20   :  { %2925 = vsyncpa [#allocation10], 1 }
 0xa21   :  { %2926 = vsyncpa [#allocation5], 1 }
 0xa22   :  { %2928 = vsyncpa [#allocation5 + $0x1], 1 }

</bundles_post_ra>
